<compile_context>
chip_gen: v7x
topology: tpu7x:2x2x1
jax: 0.10.0
libtpu: 0.0.40
codegen_flags: <defaults>
</compile_context>

<pallas_src>
import functools

import jax
import jax.numpy as jnp
from jax import lax
from jax.experimental import pallas as pl
from jax.experimental.pallas import tpu as pltpu

# ----- small, forward-consistent configuration -----
B = 2             # batch
FEAT_CHANS = 32   # feature channels; must equal RNN (output_dense is Linear(2*rnn, V+1))
H_FEAT = 8        # feature-map height
W_FEAT = 32       # feature-map width  (HW = 256 -> lane-dense attention)
RNN = 32          # rnn_units
EMB = 32          # embedding_units; must equal RNN (LSTMCell(rnn, rnn) eats the embedding)
ATT = 32          # attention_units
VOCAB = 10
V1 = VOCAB + 1
MAXLEN = 4
T_STEPS = MAXLEN + 1
NPAD = 128        # lane-padded symbol / logits width
NEG = -1e30       # bias for the pad logit columns (keeps argmax semantics)


# ---------------------------------------------------------------------------
# Fused kernel: feat_conv matmul (loop-invariant) + T unrolled decode steps.
# Works both grid-less (Bn = B) and per-batch gridded (Bn = 1).
# ---------------------------------------------------------------------------
def sar_decoder_kernel(feats_ref, taps_ref, wk_ref, bk_ref,
                       w0x_ref, w0h_ref, b0_ref,
                       w1x_ref, w1h_ref, b1_ref,
                       wst_ref, watt_ref, wout_h_ref, wout_g_ref, bout_ref,
                       out_ref, *, eup_dtype):
    f32 = jnp.float32
    Bn, C, HW = feats_ref.shape
    A = wk_ref.shape[0]
    Hd = wst_ref.shape[0]            # rnn_units
    npad = bout_ref.shape[1]         # 128
    T = out_ref.shape[1]

    feats = feats_ref[...]                                   # (Bn, C, HW), HW lane-dense
    wk = wk_ref[...]                                         # (A, 9C)
    bk = bk_ref[...]                                         # (A, 1)

    # ---- AttentionModule.feat_conv (loop-invariant): im2col matmul per batch ----
    # taps arrive pre-laid-out from the wrapper as (Bn, 9C, HW).
    fproj = jnp.stack(
        [jnp.dot(wk, taps_ref[b], preferred_element_type=f32) + bk
         for b in range(Bn)],
        axis=0)                                              # (Bn, A, HW)

    # ---- decoder weights (pre-fused in the wrapper) ----
    w0x = w0x_ref[...]                                       # (NPAD, 4*RNN)  (embed folded)
    w0h = w0h_ref[...]                                       # (RNN, 4*RNN)
    w1x = w1x_ref[...]                                       # (RNN, 4*RNN)
    w1h = w1h_ref[...]                                       # (RNN, 4*RNN)
    wst = wst_ref[...]                                       # (RNN, A)
    wout_h = wout_h_ref[...]                                 # (RNN, NPAD)
    wout_g = wout_g_ref[...]                                 # (RNN, NPAD)

    # ---- loop invariants hoisted out of the static unroll ----
    b0 = jnp.broadcast_to(b0_ref[...], (Bn, 4 * Hd))
    b1 = jnp.broadcast_to(b1_ref[...], (Bn, 4 * Hd))
    bout = jnp.broadcast_to(bout_ref[...], (Bn, npad))
    watt_b = jnp.broadcast_to(watt_ref[...].reshape(1, A, 1), (Bn, A, HW))
    iota = lax.broadcasted_iota(jnp.int32, (Bn, npad), 1)

    def lstm_cell(x, h, wx, wh, b, c):
        # two summed dots (no lane-axis concat on the critical path)
        g = (jnp.dot(x, wx, preferred_element_type=f32)
             + jnp.dot(h, wh, preferred_element_type=f32) + b)   # (Bn, 4*RNN)
        i = jax.nn.sigmoid(g[:, 0 * Hd:1 * Hd])
        f = jax.nn.sigmoid(g[:, 1 * Hd:2 * Hd])
        gg = jnp.tanh(g[:, 2 * Hd:3 * Hd])
        o = jax.nn.sigmoid(g[:, 3 * Hd:4 * Hd])
        c_new = f * c + i * gg
        return o * jnp.tanh(c_new), c_new

    sym = jnp.zeros((Bn, npad), f32)                         # step-0 symbol is all zeros
    h0 = jnp.zeros((Bn, Hd), f32)
    c0 = jnp.zeros((Bn, Hd), f32)
    h1 = jnp.zeros((Bn, Hd), f32)
    c1 = jnp.zeros((Bn, Hd), f32)

    for t in range(T):                                       # static unroll (max_length+1)
        # embed + LSTMCell 0 (embedding folded into w0x rows)
        h0, c0 = lstm_cell(sym, h0, w0x, w0h, b0, c0)
        # LSTMCell 1
        h1, c1 = lstm_cell(h0, h1, w1x, w1h, b1, c1)

        # AttentionModule: tanh(feat_proj + state_proj) -> 1x1 projector -> softmax
        sp = jnp.dot(h1, wst, preferred_element_type=f32)            # (Bn, A)
        pre = fproj + sp[:, :, None]                                 # (Bn, A, HW)
        proj = jnp.tanh(pre.astype(eup_dtype)).astype(f32)           # bf16 EUP on v6e/v7x
        scores = jnp.sum(proj * watt_b, axis=1)                      # (Bn, HW)
        scores = scores - jnp.max(scores, axis=-1, keepdims=True)
        e = jnp.exp(scores.astype(eup_dtype)).astype(f32)
        att = e / jnp.sum(e, axis=-1, keepdims=True)                 # softmax over HW
        glimpse = jnp.sum(feats * att[:, None, :], axis=-1)          # (Bn, C)

        # output_dense on cat([hidden, glimpse]) as two summed dots;
        # pad columns: weight 0 / bias -1e30 (f32) to keep argmax semantics.
        logits = (jnp.dot(h1, wout_h, preferred_element_type=f32)
                  + jnp.dot(glimpse, wout_g, preferred_element_type=f32)
                  + bout)                                            # (Bn, NPAD)
        out_ref[:, t, :] = logits                                    # full 128-lane store

        # next symbol = one_hot(argmax(logits)) (first max index, like torch.argmax)
        mx = jnp.max(logits, axis=-1, keepdims=True)
        idx = jnp.min(jnp.where(logits >= mx, iota, jnp.int32(npad)),
                      axis=-1, keepdims=True)
        sym = (iota == idx).astype(f32)


# ---------------------------------------------------------------------------
# Parameter init (deterministic, synthetic) in PyTorch-like shapes, plus a
# one-time fusion / lane-padding pass (done once, outside the forward).
# ---------------------------------------------------------------------------
def init_params(key):
    ks = jax.random.split(key, 13)

    def n(k, shape, scale=0.1):
        return (scale * jax.random.normal(k, shape)).astype(jnp.float32)

    p = {}
    # embed: Linear(V+1, EMB, bias=False), stored pre-transposed (in, out)
    p['we'] = n(ks[0], (V1, EMB))
    # LSTMCells (rnn, rnn): weights pre-transposed (in, 4*rnn); b_ih + b_hh folded
    p['wih0'] = n(ks[1], (EMB, 4 * RNN))
    p['whh0'] = n(ks[2], (RNN, 4 * RNN))
    p['b0'] = n(ks[3], (1, 4 * RNN))
    p['wih1'] = n(ks[4], (RNN, 4 * RNN))
    p['whh1'] = n(ks[5], (RNN, 4 * RNN))
    p['b1'] = n(ks[6], (1, 4 * RNN))
    # AttentionModule (torch Conv2d layouts)
    p['feat_conv_w'] = n(ks[7], (ATT, FEAT_CHANS, 3, 3))
    p['feat_conv_b'] = n(ks[8], (ATT,))
    p['state_conv_w'] = n(ks[9], (ATT, RNN, 1, 1))     # Conv2d(rnn, A, 1, bias=False)
    p['proj_w'] = n(ks[10], (1, ATT, 1, 1))            # Conv2d(A, 1, 1, bias=False)
    # output_dense: Linear(2*rnn, V+1), pre-transposed
    p['wout'] = n(ks[11], (2 * RNN, V1))
    p['bout'] = n(ks[12], (1, V1))
    return p


def fuse_params(p):
    """One-time weight preparation (fusion + lane padding), outside the kernel."""
    f32 = jnp.float32
    k = {}
    # embedding folded into LSTMCell-0 input weights; rows lane-padded to NPAD
    w_sym = jnp.dot(p['we'], p['wih0'])                                # (V1, 4*RNN)
    k['w0x'] = jnp.concatenate([w_sym, jnp.zeros((NPAD - V1, 4 * RNN), f32)], axis=0)
    k['w0h'] = p['whh0']
    k['b0'] = p['b0']
    k['w1x'] = p['wih1']
    k['w1h'] = p['whh1']
    k['b1'] = p['b1']
    # feat_conv as im2col weight (A, 9*C), rows ordered (kh, kw, c)
    k['wk'] = jnp.transpose(p['feat_conv_w'], (0, 2, 3, 1)).reshape(ATT, 9 * FEAT_CHANS)
    k['bk'] = p['feat_conv_b'].reshape(ATT, 1)
    k['wst'] = p['state_conv_w'].reshape(ATT, RNN).T                   # (RNN, A)
    k['watt'] = p['proj_w'].reshape(1, ATT).T                          # (A, 1)
    # output dense lane-padded to NPAD; pad columns biased to -1e30 for argmax parity
    wout_pad = jnp.concatenate([p['wout'], jnp.zeros((2 * RNN, NPAD - V1), f32)], axis=1)
    k['wout_h'] = wout_pad[:RNN]                                       # hidden rows
    k['wout_g'] = wout_pad[RNN:]                                       # glimpse rows
    k['bout'] = jnp.concatenate([p['bout'], jnp.full((1, NPAD - V1), NEG, f32)], axis=1)
    return k


# ---------------------------------------------------------------------------
# Wrapper = SARDecoder.forward (inference path, gt=None)
# ---------------------------------------------------------------------------
def _im2col_3x3(x):
    """(B, C, H, W) -> (B, 9C, H*W), rows ordered (kh, kw, c); padding=1."""
    Bn, C, H, W = x.shape
    xp = jnp.pad(x, ((0, 0), (0, 0), (1, 1), (1, 1)))
    taps = [xp[:, :, kh:kh + H, kw:kw + W].reshape(Bn, C, H * W)
            for kh in range(3) for kw in range(3)]
    return jnp.concatenate(taps, axis=1)


def make_sar_decoder_forward(kp, *, use_batch_grid, eup_dtype):
    kernel = functools.partial(sar_decoder_kernel, eup_dtype=eup_dtype)

    def forward(features, holistic):
        # `holistic` is part of the reference signature but unused by its forward.
        del holistic
        Bn, C, H, W = features.shape
        HW = H * W
        feats = features.reshape(Bn, C, HW)          # layout plumbing in the wrapper
        taps = _im2col_3x3(features)                 # (Bn, 9C, HW)

        weights = (kp['wk'], kp['bk'],
                   kp['w0x'], kp['w0h'], kp['b0'],
                   kp['w1x'], kp['w1h'], kp['b1'],
                   kp['wst'], kp['watt'],
                   kp['wout_h'], kp['wout_g'], kp['bout'])
        out_shape = jax.ShapeDtypeStruct((Bn, T_STEPS, NPAD), jnp.float32)

        if use_batch_grid:
            # v7x: one batch row per grid step, sharded across the 2 TensorCores.
            def full_spec(w):
                s = w.shape
                return pl.BlockSpec(s, lambda b, _s=s: (0,) * len(_s))

            in_specs = ([pl.BlockSpec((1, C, HW), lambda b: (b, 0, 0)),
                         pl.BlockSpec((1, 9 * C, HW), lambda b: (b, 0, 0))]
                        + [full_spec(w) for w in weights])
            out = pl.pallas_call(
                kernel,
                out_shape=out_shape,
                grid=(Bn,),
                in_specs=in_specs,
                out_specs=pl.BlockSpec((1, T_STEPS, NPAD), lambda b: (b, 0, 0)),
                compiler_params=pltpu.CompilerParams(
                    dimension_semantics=("parallel",)),
            )(feats, taps, *weights)
        else:
            # v5e / v6e (single TensorCore): one grid-less call, whole working
            # set (<1 MiB) resident in VMEM.
            out = pl.pallas_call(kernel, out_shape=out_shape)(feats, taps, *weights)

        return out[:, :, :V1]                        # (B, max_length+1, vocab+1)

    return forward


if __name__ == "__main__":
    key = jax.random.PRNGKey(0)
    kx, kh, kparam = jax.random.split(key, 3)
    # features: NCHW feature map; holistic: (B, rnn) — accepted but unused (as in the spec)
    features = jax.random.normal(kx, (B, FEAT_CHANS, H_FEAT, W_FEAT), jnp.float32)
    holistic = jax.random.normal(kh, (B, RNN), jnp.float32)
    kp = fuse_params(init_params(kparam))

    # Generation-gated micro-opts (safe defaults if the device kind is unknown):
    #  * bf16 on the EUP transcendentals only on v6e / v7x (v5e has no bf16 VPU/EUP)
    #  * batch-parallel grid only on v7x (2 TensorCores); serial-loop overhead otherwise
    try:
        kind = jax.devices()[0].device_kind.lower()
    except Exception:
        kind = ""
    eup_dtype = jnp.bfloat16 if (("v6" in kind) or ("v7" in kind)) else jnp.float32
    use_batch_grid = "v7" in kind

    fwd = jax.jit(make_sar_decoder_forward(kp, use_batch_grid=use_batch_grid,
                                           eup_dtype=eup_dtype))
    out = fwd(features, holistic)
    jax.block_until_ready(out)

    assert out.shape == (B, T_STEPS, V1)
    assert bool(jnp.all(jnp.isfinite(out)))
    print("KERNEL_OK")
</pallas_src>

<mosaic_0001>
module attributes {stable_mosaic.version = 11 : i64} {
  func.func @sar_decoder_kernel(%arg0: memref<2x32x256xf32, #tpu.memory_space<vmem>>, %arg1: memref<2x288x256xf32, #tpu.memory_space<vmem>>, %arg2: memref<32x288xf32, #tpu.memory_space<vmem>>, %arg3: memref<32x1xf32, #tpu.memory_space<vmem>>, %arg4: memref<128x128xf32, #tpu.memory_space<vmem>>, %arg5: memref<32x128xf32, #tpu.memory_space<vmem>>, %arg6: memref<1x128xf32, #tpu.memory_space<vmem>>, %arg7: memref<32x128xf32, #tpu.memory_space<vmem>>, %arg8: memref<32x128xf32, #tpu.memory_space<vmem>>, %arg9: memref<1x128xf32, #tpu.memory_space<vmem>>, %arg10: memref<32x32xf32, #tpu.memory_space<vmem>>, %arg11: memref<32x1xf32, #tpu.memory_space<vmem>>, %arg12: memref<32x128xf32, #tpu.memory_space<vmem>>, %arg13: memref<32x128xf32, #tpu.memory_space<vmem>>, %arg14: memref<1x128xf32, #tpu.memory_space<vmem>>, %arg15: memref<2x5x128xf32, #tpu.memory_space<vmem>>) attributes {dimension_semantics = [], scalar_prefetch = 0 : i64, scratch_operands = 0 : i64, tpu.core_type = #tpu.core_type<tc>} {
    %c0 = arith.constant 0 : index
    %c0_0 = arith.constant 0 : index
    %c0_1 = arith.constant 0 : index
    %0 = vector.load %arg0[%c0, %c0_0, %c0_1] : memref<2x32x256xf32, #tpu.memory_space<vmem>>, vector<2x32x256xf32>
    %c0_2 = arith.constant 0 : index
    %c0_3 = arith.constant 0 : index
    %1 = vector.load %arg2[%c0_2, %c0_3] : memref<32x288xf32, #tpu.memory_space<vmem>>, vector<32x288xf32>
    %c0_4 = arith.constant 0 : index
    %c0_5 = arith.constant 0 : index
    %2 = vector.load %arg3[%c0_4, %c0_5] : memref<32x1xf32, #tpu.memory_space<vmem>>, vector<32x1xf32>
    %c0_6 = arith.constant 0 : index
    %c0_7 = arith.constant 0 : index
    %c0_8 = arith.constant 0 : index
    %3 = vector.load %arg1[%c0_6, %c0_7, %c0_8] : memref<2x288x256xf32, #tpu.memory_space<vmem>>, vector<1x288x256xf32>
    %4 = vector.shape_cast %3 : vector<1x288x256xf32> to vector<288x256xf32>
    %cst = arith.constant dense<0.000000e+00> : vector<32x256xf32>
    %5 = tpu.matmul %1, %4, %cst {dimension_numbers = #tpu.dot_dimension_numbers<[1], [0], [0], [1], [0, 0, 1, 1], [], []>} : vector<32x288xf32>, vector<288x256xf32>, vector<32x256xf32> -> vector<32x256xf32>
    %6 = vector.broadcast %2 : vector<32x1xf32> to vector<32x256xf32>
    %7 = arith.addf %5, %6 : vector<32x256xf32>
    %c1 = arith.constant 1 : index
    %c0_9 = arith.constant 0 : index
    %c0_10 = arith.constant 0 : index
    %8 = vector.load %arg1[%c1, %c0_9, %c0_10] : memref<2x288x256xf32, #tpu.memory_space<vmem>>, vector<1x288x256xf32>
    %9 = vector.shape_cast %8 : vector<1x288x256xf32> to vector<288x256xf32>
    %cst_11 = arith.constant dense<0.000000e+00> : vector<32x256xf32>
    %10 = tpu.matmul %1, %9, %cst_11 {dimension_numbers = #tpu.dot_dimension_numbers<[1], [0], [0], [1], [0, 0, 1, 1], [], []>} : vector<32x288xf32>, vector<288x256xf32>, vector<32x256xf32> -> vector<32x256xf32>
    %11 = vector.broadcast %2 : vector<32x1xf32> to vector<32x256xf32>
    %12 = arith.addf %10, %11 : vector<32x256xf32>
    %13 = vector.shape_cast %7 : vector<32x256xf32> to vector<1x32x256xf32>
    %14 = vector.shape_cast %12 : vector<32x256xf32> to vector<1x32x256xf32>
    %15 = tpu.concatenate %13, %14 in 0 : vector<1x32x256xf32>, vector<1x32x256xf32> -> vector<2x32x256xf32>
    %c0_12 = arith.constant 0 : index
    %c0_13 = arith.constant 0 : index
    %16 = vector.load %arg4[%c0_12, %c0_13] : memref<128x128xf32, #tpu.memory_space<vmem>>, vector<128x128xf32>
    %c0_14 = arith.constant 0 : index
    %c0_15 = arith.constant 0 : index
    %17 = vector.load %arg5[%c0_14, %c0_15] : memref<32x128xf32, #tpu.memory_space<vmem>>, vector<32x128xf32>
    %c0_16 = arith.constant 0 : index
    %c0_17 = arith.constant 0 : index
    %18 = vector.load %arg7[%c0_16, %c0_17] : memref<32x128xf32, #tpu.memory_space<vmem>>, vector<32x128xf32>
    %c0_18 = arith.constant 0 : index
    %c0_19 = arith.constant 0 : index
    %19 = vector.load %arg8[%c0_18, %c0_19] : memref<32x128xf32, #tpu.memory_space<vmem>>, vector<32x128xf32>
    %c0_20 = arith.constant 0 : index
    %c0_21 = arith.constant 0 : index
    %20 = vector.load %arg10[%c0_20, %c0_21] : memref<32x32xf32, #tpu.memory_space<vmem>>, vector<32x32xf32>
    %c0_22 = arith.constant 0 : index
    %c0_23 = arith.constant 0 : index
    %21 = vector.load %arg12[%c0_22, %c0_23] : memref<32x128xf32, #tpu.memory_space<vmem>>, vector<32x128xf32>
    %c0_24 = arith.constant 0 : index
    %c0_25 = arith.constant 0 : index
    %22 = vector.load %arg13[%c0_24, %c0_25] : memref<32x128xf32, #tpu.memory_space<vmem>>, vector<32x128xf32>
    %c0_26 = arith.constant 0 : index
    %c0_27 = arith.constant 0 : index
    %23 = vector.load %arg6[%c0_26, %c0_27] : memref<1x128xf32, #tpu.memory_space<vmem>>, vector<1x128xf32>
    %24 = vector.shape_cast %23 : vector<1x128xf32> to vector<1x128xf32>
    %25 = vector.broadcast %24 : vector<1x128xf32> to vector<2x128xf32>
    %c0_28 = arith.constant 0 : index
    %c0_29 = arith.constant 0 : index
    %26 = vector.load %arg9[%c0_28, %c0_29] : memref<1x128xf32, #tpu.memory_space<vmem>>, vector<1x128xf32>
    %27 = vector.shape_cast %26 : vector<1x128xf32> to vector<1x128xf32>
    %28 = vector.broadcast %27 : vector<1x128xf32> to vector<2x128xf32>
    %c0_30 = arith.constant 0 : index
    %c0_31 = arith.constant 0 : index
    %29 = vector.load %arg14[%c0_30, %c0_31] : memref<1x128xf32, #tpu.memory_space<vmem>>, vector<1x128xf32>
    %30 = vector.shape_cast %29 : vector<1x128xf32> to vector<1x128xf32>
    %31 = vector.broadcast %30 : vector<1x128xf32> to vector<2x128xf32>
    %c0_32 = arith.constant 0 : index
    %c0_33 = arith.constant 0 : index
    %32 = vector.load %arg11[%c0_32, %c0_33] : memref<32x1xf32, #tpu.memory_space<vmem>>, vector<32x1xf32>
    %33 = vector.shape_cast %32 : vector<32x1xf32> to vector<1x32x1xf32>
    %34 = vector.shape_cast %33 : vector<1x32x1xf32> to vector<1x32x1xf32>
    %35 = vector.broadcast %34 : vector<1x32x1xf32> to vector<2x32x256xf32>
    %36 = tpu.iota {dimensions = array<i32: 1>} : vector<2x128xi32>
    %cst_34 = arith.constant 0.000000e+00 : f32
    %37 = vector.broadcast %cst_34 : f32 to vector<2x128xf32>
    %cst_35 = arith.constant 0.000000e+00 : f32
    %38 = vector.broadcast %cst_35 : f32 to vector<2x32xf32>
    %cst_36 = arith.constant 0.000000e+00 : f32
    %39 = vector.broadcast %cst_36 : f32 to vector<2x32xf32>
    %cst_37 = arith.constant 0.000000e+00 : f32
    %40 = vector.broadcast %cst_37 : f32 to vector<2x32xf32>
    %cst_38 = arith.constant 0.000000e+00 : f32
    %41 = vector.broadcast %cst_38 : f32 to vector<2x32xf32>
    %cst_39 = arith.constant dense<0.000000e+00> : vector<2x128xf32>
    %42 = tpu.matmul %37, %16, %cst_39 {dimension_numbers = #tpu.dot_dimension_numbers<[1], [0], [0], [1], [0, 0, 1, 1], [], []>} : vector<2x128xf32>, vector<128x128xf32>, vector<2x128xf32> -> vector<2x128xf32>
    %cst_40 = arith.constant dense<0.000000e+00> : vector<2x128xf32>
    %43 = tpu.matmul %38, %17, %cst_40 {dimension_numbers = #tpu.dot_dimension_numbers<[1], [0], [0], [1], [0, 0, 1, 1], [], []>} : vector<2x32xf32>, vector<32x128xf32>, vector<2x128xf32> -> vector<2x128xf32>
    %44 = arith.addf %42, %43 : vector<2x128xf32>
    %45 = arith.addf %44, %25 : vector<2x128xf32>
    %46 = vector.extract_strided_slice %45 {offsets = [0, 0], sizes = [2, 32], strides = [1, 1]} : vector<2x128xf32> to vector<2x32xf32>
    %47 = arith.negf %46 : vector<2x32xf32>
    %48 = math.exp %47 : vector<2x32xf32>
    %cst_41 = arith.constant 1.000000e+00 : f32
    %49 = vector.broadcast %cst_41 : f32 to vector<2x32xf32>
    %50 = arith.addf %49, %48 : vector<2x32xf32>
    %51 = arith.divf %49, %50 : vector<2x32xf32>
    %52 = vector.extract_strided_slice %45 {offsets = [0, 32], sizes = [2, 32], strides = [1, 1]} : vector<2x128xf32> to vector<2x32xf32>
    %53 = arith.negf %52 : vector<2x32xf32>
    %54 = math.exp %53 : vector<2x32xf32>
    %cst_42 = arith.constant 1.000000e+00 : f32
    %55 = vector.broadcast %cst_42 : f32 to vector<2x32xf32>
    %56 = arith.addf %55, %54 : vector<2x32xf32>
    %57 = arith.divf %55, %56 : vector<2x32xf32>
    %58 = vector.extract_strided_slice %45 {offsets = [0, 64], sizes = [2, 32], strides = [1, 1]} : vector<2x128xf32> to vector<2x32xf32>
    %59 = math.tanh %58 : vector<2x32xf32>
    %60 = vector.extract_strided_slice %45 {offsets = [0, 96], sizes = [2, 32], strides = [1, 1]} : vector<2x128xf32> to vector<2x32xf32>
    %61 = arith.negf %60 : vector<2x32xf32>
    %62 = math.exp %61 : vector<2x32xf32>
    %cst_43 = arith.constant 1.000000e+00 : f32
    %63 = vector.broadcast %cst_43 : f32 to vector<2x32xf32>
    %64 = arith.addf %63, %62 : vector<2x32xf32>
    %65 = arith.divf %63, %64 : vector<2x32xf32>
    %66 = arith.mulf %57, %39 : vector<2x32xf32>
    %67 = arith.mulf %51, %59 : vector<2x32xf32>
    %68 = arith.addf %66, %67 : vector<2x32xf32>
    %69 = math.tanh %68 : vector<2x32xf32>
    %70 = arith.mulf %65, %69 : vector<2x32xf32>
    %cst_44 = arith.constant dense<0.000000e+00> : vector<2x128xf32>
    %71 = tpu.matmul %70, %18, %cst_44 {dimension_numbers = #tpu.dot_dimension_numbers<[1], [0], [0], [1], [0, 0, 1, 1], [], []>} : vector<2x32xf32>, vector<32x128xf32>, vector<2x128xf32> -> vector<2x128xf32>
    %cst_45 = arith.constant dense<0.000000e+00> : vector<2x128xf32>
    %72 = tpu.matmul %40, %19, %cst_45 {dimension_numbers = #tpu.dot_dimension_numbers<[1], [0], [0], [1], [0, 0, 1, 1], [], []>} : vector<2x32xf32>, vector<32x128xf32>, vector<2x128xf32> -> vector<2x128xf32>
    %73 = arith.addf %71, %72 : vector<2x128xf32>
    %74 = arith.addf %73, %28 : vector<2x128xf32>
    %75 = vector.extract_strided_slice %74 {offsets = [0, 0], sizes = [2, 32], strides = [1, 1]} : vector<2x128xf32> to vector<2x32xf32>
    %76 = arith.negf %75 : vector<2x32xf32>
    %77 = math.exp %76 : vector<2x32xf32>
    %cst_46 = arith.constant 1.000000e+00 : f32
    %78 = vector.broadcast %cst_46 : f32 to vector<2x32xf32>
    %79 = arith.addf %78, %77 : vector<2x32xf32>
    %80 = arith.divf %78, %79 : vector<2x32xf32>
    %81 = vector.extract_strided_slice %74 {offsets = [0, 32], sizes = [2, 32], strides = [1, 1]} : vector<2x128xf32> to vector<2x32xf32>
    %82 = arith.negf %81 : vector<2x32xf32>
    %83 = math.exp %82 : vector<2x32xf32>
    %cst_47 = arith.constant 1.000000e+00 : f32
    %84 = vector.broadcast %cst_47 : f32 to vector<2x32xf32>
    %85 = arith.addf %84, %83 : vector<2x32xf32>
    %86 = arith.divf %84, %85 : vector<2x32xf32>
    %87 = vector.extract_strided_slice %74 {offsets = [0, 64], sizes = [2, 32], strides = [1, 1]} : vector<2x128xf32> to vector<2x32xf32>
    %88 = math.tanh %87 : vector<2x32xf32>
    %89 = vector.extract_strided_slice %74 {offsets = [0, 96], sizes = [2, 32], strides = [1, 1]} : vector<2x128xf32> to vector<2x32xf32>
    %90 = arith.negf %89 : vector<2x32xf32>
    %91 = math.exp %90 : vector<2x32xf32>
    %cst_48 = arith.constant 1.000000e+00 : f32
    %92 = vector.broadcast %cst_48 : f32 to vector<2x32xf32>
    %93 = arith.addf %92, %91 : vector<2x32xf32>
    %94 = arith.divf %92, %93 : vector<2x32xf32>
    %95 = arith.mulf %86, %41 : vector<2x32xf32>
    %96 = arith.mulf %80, %88 : vector<2x32xf32>
    %97 = arith.addf %95, %96 : vector<2x32xf32>
    %98 = math.tanh %97 : vector<2x32xf32>
    %99 = arith.mulf %94, %98 : vector<2x32xf32>
    %cst_49 = arith.constant dense<0.000000e+00> : vector<2x32xf32>
    %100 = tpu.matmul %99, %20, %cst_49 {dimension_numbers = #tpu.dot_dimension_numbers<[1], [0], [0], [1], [0, 0, 1, 1], [], []>} : vector<2x32xf32>, vector<32x32xf32>, vector<2x32xf32> -> vector<2x32xf32>
    %101 = vector.shape_cast %100 : vector<2x32xf32> to vector<2x32x1xf32>
    %102 = vector.broadcast %101 : vector<2x32x1xf32> to vector<2x32x256xf32>
    %103 = arith.addf %15, %102 : vector<2x32x256xf32>
    %104 = math.tanh %103 : vector<2x32x256xf32>
    %105 = arith.mulf %104, %35 : vector<2x32x256xf32>
    %cst_50 = arith.constant dense<0.000000e+00> : vector<2x256xf32>
    %106 = vector.multi_reduction <add>, %105, %cst_50 [1] : vector<2x32x256xf32> to vector<2x256xf32>
    %cst_51 = arith.constant dense<0xFF800000> : vector<2xf32>
    %107 = vector.multi_reduction <maximumf>, %106, %cst_51 [1] : vector<2x256xf32> to vector<2xf32>
    %108 = vector.shape_cast %107 : vector<2xf32> to vector<2x1xf32>
    %109 = vector.broadcast %108 : vector<2x1xf32> to vector<2x256xf32>
    %110 = arith.subf %106, %109 : vector<2x256xf32>
    %111 = math.exp %110 : vector<2x256xf32>
    %cst_52 = arith.constant dense<0.000000e+00> : vector<2xf32>
    %112 = vector.multi_reduction <add>, %111, %cst_52 [1] : vector<2x256xf32> to vector<2xf32>
    %113 = vector.shape_cast %112 : vector<2xf32> to vector<2x1xf32>
    %114 = vector.broadcast %113 : vector<2x1xf32> to vector<2x256xf32>
    %115 = arith.divf %111, %114 : vector<2x256xf32>
    %116 = vector.shape_cast %115 : vector<2x256xf32> to vector<2x1x256xf32>
    %117 = vector.broadcast %116 : vector<2x1x256xf32> to vector<2x32x256xf32>
    %118 = arith.mulf %0, %117 : vector<2x32x256xf32>
    %cst_53 = arith.constant dense<0.000000e+00> : vector<2x32xf32>
    %119 = vector.multi_reduction <add>, %118, %cst_53 [2] : vector<2x32x256xf32> to vector<2x32xf32>
    %cst_54 = arith.constant dense<0.000000e+00> : vector<2x128xf32>
    %120 = tpu.matmul %99, %21, %cst_54 {dimension_numbers = #tpu.dot_dimension_numbers<[1], [0], [0], [1], [0, 0, 1, 1], [], []>} : vector<2x32xf32>, vector<32x128xf32>, vector<2x128xf32> -> vector<2x128xf32>
    %cst_55 = arith.constant dense<0.000000e+00> : vector<2x128xf32>
    %121 = tpu.matmul %119, %22, %cst_55 {dimension_numbers = #tpu.dot_dimension_numbers<[1], [0], [0], [1], [0, 0, 1, 1], [], []>} : vector<2x32xf32>, vector<32x128xf32>, vector<2x128xf32> -> vector<2x128xf32>
    %122 = arith.addf %120, %121 : vector<2x128xf32>
    %123 = arith.addf %122, %31 : vector<2x128xf32>
    %c0_56 = arith.constant 0 : index
    %c0_57 = arith.constant 0 : index
    %c0_58 = arith.constant 0 : index
    %124 = vector.load %arg15[%c0_56, %c0_57, %c0_58] : memref<2x5x128xf32, #tpu.memory_space<vmem>>, vector<2x1x128xf32>
    %125 = vector.shape_cast %124 : vector<2x1x128xf32> to vector<2x128xf32>
    %126 = vector.shape_cast %123 : vector<2x128xf32> to vector<2x1x128xf32>
    tpu.vector_store %arg15[%c0_56, %c0_57, %c0_58], %126 {strides = array<i32>} : memref<2x5x128xf32, #tpu.memory_space<vmem>>, vector<2x1x128xf32>,
    %cst_59 = arith.constant dense<0xFF800000> : vector<2xf32>
    %127 = vector.multi_reduction <maximumf>, %123, %cst_59 [1] : vector<2x128xf32> to vector<2xf32>
    %128 = vector.shape_cast %127 : vector<2xf32> to vector<2x1xf32>
    %129 = vector.broadcast %128 : vector<2x1xf32> to vector<2x128xf32>
    %130 = arith.cmpf oge, %123, %129 : vector<2x128xf32>
    %c128_i32 = arith.constant 128 : i32
    %131 = vector.broadcast %c128_i32 : i32 to vector<2x128xi32>
    %132 = arith.select %130, %36, %131 : vector<2x128xi1>, vector<2x128xi32>
    %cst_60 = arith.constant dense<2147483647> : vector<2xi32>
    %133 = vector.multi_reduction <minsi>, %132, %cst_60 [1] : vector<2x128xi32> to vector<2xi32>
    %134 = vector.shape_cast %133 : vector<2xi32> to vector<2x1xi32>
    %135 = vector.broadcast %134 : vector<2x1xi32> to vector<2x128xi32>
    %136 = arith.cmpi eq, %36, %135 : vector<2x128xi32>
    %137 = arith.extui %136 : vector<2x128xi1> to vector<2x128xi32>
    %138 = arith.sitofp %137 : vector<2x128xi32> to vector<2x128xf32>
    %cst_61 = arith.constant dense<0.000000e+00> : vector<2x128xf32>
    %139 = tpu.matmul %138, %16, %cst_61 {dimension_numbers = #tpu.dot_dimension_numbers<[1], [0], [0], [1], [0, 0, 1, 1], [], []>} : vector<2x128xf32>, vector<128x128xf32>, vector<2x128xf32> -> vector<2x128xf32>
    %cst_62 = arith.constant dense<0.000000e+00> : vector<2x128xf32>
    %140 = tpu.matmul %70, %17, %cst_62 {dimension_numbers = #tpu.dot_dimension_numbers<[1], [0], [0], [1], [0, 0, 1, 1], [], []>} : vector<2x32xf32>, vector<32x128xf32>, vector<2x128xf32> -> vector<2x128xf32>
    %141 = arith.addf %139, %140 : vector<2x128xf32>
    %142 = arith.addf %141, %25 : vector<2x128xf32>
    %143 = vector.extract_strided_slice %142 {offsets = [0, 0], sizes = [2, 32], strides = [1, 1]} : vector<2x128xf32> to vector<2x32xf32>
    %144 = arith.negf %143 : vector<2x32xf32>
    %145 = math.exp %144 : vector<2x32xf32>
    %cst_63 = arith.constant 1.000000e+00 : f32
    %146 = vector.broadcast %cst_63 : f32 to vector<2x32xf32>
    %147 = arith.addf %146, %145 : vector<2x32xf32>
    %148 = arith.divf %146, %147 : vector<2x32xf32>
    %149 = vector.extract_strided_slice %142 {offsets = [0, 32], sizes = [2, 32], strides = [1, 1]} : vector<2x128xf32> to vector<2x32xf32>
    %150 = arith.negf %149 : vector<2x32xf32>
    %151 = math.exp %150 : vector<2x32xf32>
    %cst_64 = arith.constant 1.000000e+00 : f32
    %152 = vector.broadcast %cst_64 : f32 to vector<2x32xf32>
    %153 = arith.addf %152, %151 : vector<2x32xf32>
    %154 = arith.divf %152, %153 : vector<2x32xf32>
    %155 = vector.extract_strided_slice %142 {offsets = [0, 64], sizes = [2, 32], strides = [1, 1]} : vector<2x128xf32> to vector<2x32xf32>
    %156 = math.tanh %155 : vector<2x32xf32>
    %157 = vector.extract_strided_slice %142 {offsets = [0, 96], sizes = [2, 32], strides = [1, 1]} : vector<2x128xf32> to vector<2x32xf32>
    %158 = arith.negf %157 : vector<2x32xf32>
    %159 = math.exp %158 : vector<2x32xf32>
    %cst_65 = arith.constant 1.000000e+00 : f32
    %160 = vector.broadcast %cst_65 : f32 to vector<2x32xf32>
    %161 = arith.addf %160, %159 : vector<2x32xf32>
    %162 = arith.divf %160, %161 : vector<2x32xf32>
    %163 = arith.mulf %154, %68 : vector<2x32xf32>
    %164 = arith.mulf %148, %156 : vector<2x32xf32>
    %165 = arith.addf %163, %164 : vector<2x32xf32>
    %166 = math.tanh %165 : vector<2x32xf32>
    %167 = arith.mulf %162, %166 : vector<2x32xf32>
    %cst_66 = arith.constant dense<0.000000e+00> : vector<2x128xf32>
    %168 = tpu.matmul %167, %18, %cst_66 {dimension_numbers = #tpu.dot_dimension_numbers<[1], [0], [0], [1], [0, 0, 1, 1], [], []>} : vector<2x32xf32>, vector<32x128xf32>, vector<2x128xf32> -> vector<2x128xf32>
    %cst_67 = arith.constant dense<0.000000e+00> : vector<2x128xf32>
    %169 = tpu.matmul %99, %19, %cst_67 {dimension_numbers = #tpu.dot_dimension_numbers<[1], [0], [0], [1], [0, 0, 1, 1], [], []>} : vector<2x32xf32>, vector<32x128xf32>, vector<2x128xf32> -> vector<2x128xf32>
    %170 = arith.addf %168, %169 : vector<2x128xf32>
    %171 = arith.addf %170, %28 : vector<2x128xf32>
    %172 = vector.extract_strided_slice %171 {offsets = [0, 0], sizes = [2, 32], strides = [1, 1]} : vector<2x128xf32> to vector<2x32xf32>
    %173 = arith.negf %172 : vector<2x32xf32>
    %174 = math.exp %173 : vector<2x32xf32>
    %cst_68 = arith.constant 1.000000e+00 : f32
    %175 = vector.broadcast %cst_68 : f32 to vector<2x32xf32>
    %176 = arith.addf %175, %174 : vector<2x32xf32>
    %177 = arith.divf %175, %176 : vector<2x32xf32>
    %178 = vector.extract_strided_slice %171 {offsets = [0, 32], sizes = [2, 32], strides = [1, 1]} : vector<2x128xf32> to vector<2x32xf32>
    %179 = arith.negf %178 : vector<2x32xf32>
    %180 = math.exp %179 : vector<2x32xf32>
    %cst_69 = arith.constant 1.000000e+00 : f32
    %181 = vector.broadcast %cst_69 : f32 to vector<2x32xf32>
    %182 = arith.addf %181, %180 : vector<2x32xf32>
    %183 = arith.divf %181, %182 : vector<2x32xf32>
    %184 = vector.extract_strided_slice %171 {offsets = [0, 64], sizes = [2, 32], strides = [1, 1]} : vector<2x128xf32> to vector<2x32xf32>
    %185 = math.tanh %184 : vector<2x32xf32>
    %186 = vector.extract_strided_slice %171 {offsets = [0, 96], sizes = [2, 32], strides = [1, 1]} : vector<2x128xf32> to vector<2x32xf32>
    %187 = arith.negf %186 : vector<2x32xf32>
    %188 = math.exp %187 : vector<2x32xf32>
    %cst_70 = arith.constant 1.000000e+00 : f32
    %189 = vector.broadcast %cst_70 : f32 to vector<2x32xf32>
    %190 = arith.addf %189, %188 : vector<2x32xf32>
    %191 = arith.divf %189, %190 : vector<2x32xf32>
    %192 = arith.mulf %183, %97 : vector<2x32xf32>
    %193 = arith.mulf %177, %185 : vector<2x32xf32>
    %194 = arith.addf %192, %193 : vector<2x32xf32>
    %195 = math.tanh %194 : vector<2x32xf32>
    %196 = arith.mulf %191, %195 : vector<2x32xf32>
    %cst_71 = arith.constant dense<0.000000e+00> : vector<2x32xf32>
    %197 = tpu.matmul %196, %20, %cst_71 {dimension_numbers = #tpu.dot_dimension_numbers<[1], [0], [0], [1], [0, 0, 1, 1], [], []>} : vector<2x32xf32>, vector<32x32xf32>, vector<2x32xf32> -> vector<2x32xf32>
    %198 = vector.shape_cast %197 : vector<2x32xf32> to vector<2x32x1xf32>
    %199 = vector.broadcast %198 : vector<2x32x1xf32> to vector<2x32x256xf32>
    %200 = arith.addf %15, %199 : vector<2x32x256xf32>
    %201 = math.tanh %200 : vector<2x32x256xf32>
    %202 = arith.mulf %201, %35 : vector<2x32x256xf32>
    %cst_72 = arith.constant dense<0.000000e+00> : vector<2x256xf32>
    %203 = vector.multi_reduction <add>, %202, %cst_72 [1] : vector<2x32x256xf32> to vector<2x256xf32>
    %cst_73 = arith.constant dense<0xFF800000> : vector<2xf32>
    %204 = vector.multi_reduction <maximumf>, %203, %cst_73 [1] : vector<2x256xf32> to vector<2xf32>
    %205 = vector.shape_cast %204 : vector<2xf32> to vector<2x1xf32>
    %206 = vector.broadcast %205 : vector<2x1xf32> to vector<2x256xf32>
    %207 = arith.subf %203, %206 : vector<2x256xf32>
    %208 = math.exp %207 : vector<2x256xf32>
    %cst_74 = arith.constant dense<0.000000e+00> : vector<2xf32>
    %209 = vector.multi_reduction <add>, %208, %cst_74 [1] : vector<2x256xf32> to vector<2xf32>
    %210 = vector.shape_cast %209 : vector<2xf32> to vector<2x1xf32>
    %211 = vector.broadcast %210 : vector<2x1xf32> to vector<2x256xf32>
    %212 = arith.divf %208, %211 : vector<2x256xf32>
    %213 = vector.shape_cast %212 : vector<2x256xf32> to vector<2x1x256xf32>
    %214 = vector.broadcast %213 : vector<2x1x256xf32> to vector<2x32x256xf32>
    %215 = arith.mulf %0, %214 : vector<2x32x256xf32>
    %cst_75 = arith.constant dense<0.000000e+00> : vector<2x32xf32>
    %216 = vector.multi_reduction <add>, %215, %cst_75 [2] : vector<2x32x256xf32> to vector<2x32xf32>
    %cst_76 = arith.constant dense<0.000000e+00> : vector<2x128xf32>
    %217 = tpu.matmul %196, %21, %cst_76 {dimension_numbers = #tpu.dot_dimension_numbers<[1], [0], [0], [1], [0, 0, 1, 1], [], []>} : vector<2x32xf32>, vector<32x128xf32>, vector<2x128xf32> -> vector<2x128xf32>
    %cst_77 = arith.constant dense<0.000000e+00> : vector<2x128xf32>
    %218 = tpu.matmul %216, %22, %cst_77 {dimension_numbers = #tpu.dot_dimension_numbers<[1], [0], [0], [1], [0, 0, 1, 1], [], []>} : vector<2x32xf32>, vector<32x128xf32>, vector<2x128xf32> -> vector<2x128xf32>
    %219 = arith.addf %217, %218 : vector<2x128xf32>
    %220 = arith.addf %219, %31 : vector<2x128xf32>
    %c0_78 = arith.constant 0 : index
    %c1_79 = arith.constant 1 : index
    %c0_80 = arith.constant 0 : index
    %221 = vector.load %arg15[%c0_78, %c1_79, %c0_80] : memref<2x5x128xf32, #tpu.memory_space<vmem>>, vector<2x1x128xf32>
    %222 = vector.shape_cast %221 : vector<2x1x128xf32> to vector<2x128xf32>
    %223 = vector.shape_cast %220 : vector<2x128xf32> to vector<2x1x128xf32>
    tpu.vector_store %arg15[%c0_78, %c1_79, %c0_80], %223 {strides = array<i32>} : memref<2x5x128xf32, #tpu.memory_space<vmem>>, vector<2x1x128xf32>,
    %cst_81 = arith.constant dense<0xFF800000> : vector<2xf32>
    %224 = vector.multi_reduction <maximumf>, %220, %cst_81 [1] : vector<2x128xf32> to vector<2xf32>
    %225 = vector.shape_cast %224 : vector<2xf32> to vector<2x1xf32>
    %226 = vector.broadcast %225 : vector<2x1xf32> to vector<2x128xf32>
    %227 = arith.cmpf oge, %220, %226 : vector<2x128xf32>
    %c128_i32_82 = arith.constant 128 : i32
    %228 = vector.broadcast %c128_i32_82 : i32 to vector<2x128xi32>
    %229 = arith.select %227, %36, %228 : vector<2x128xi1>, vector<2x128xi32>
    %cst_83 = arith.constant dense<2147483647> : vector<2xi32>
    %230 = vector.multi_reduction <minsi>, %229, %cst_83 [1] : vector<2x128xi32> to vector<2xi32>
    %231 = vector.shape_cast %230 : vector<2xi32> to vector<2x1xi32>
    %232 = vector.broadcast %231 : vector<2x1xi32> to vector<2x128xi32>
    %233 = arith.cmpi eq, %36, %232 : vector<2x128xi32>
    %234 = arith.extui %233 : vector<2x128xi1> to vector<2x128xi32>
    %235 = arith.sitofp %234 : vector<2x128xi32> to vector<2x128xf32>
    %cst_84 = arith.constant dense<0.000000e+00> : vector<2x128xf32>
    %236 = tpu.matmul %235, %16, %cst_84 {dimension_numbers = #tpu.dot_dimension_numbers<[1], [0], [0], [1], [0, 0, 1, 1], [], []>} : vector<2x128xf32>, vector<128x128xf32>, vector<2x128xf32> -> vector<2x128xf32>
    %cst_85 = arith.constant dense<0.000000e+00> : vector<2x128xf32>
    %237 = tpu.matmul %167, %17, %cst_85 {dimension_numbers = #tpu.dot_dimension_numbers<[1], [0], [0], [1], [0, 0, 1, 1], [], []>} : vector<2x32xf32>, vector<32x128xf32>, vector<2x128xf32> -> vector<2x128xf32>
    %238 = arith.addf %236, %237 : vector<2x128xf32>
    %239 = arith.addf %238, %25 : vector<2x128xf32>
    %240 = vector.extract_strided_slice %239 {offsets = [0, 0], sizes = [2, 32], strides = [1, 1]} : vector<2x128xf32> to vector<2x32xf32>
    %241 = arith.negf %240 : vector<2x32xf32>
    %242 = math.exp %241 : vector<2x32xf32>
    %cst_86 = arith.constant 1.000000e+00 : f32
    %243 = vector.broadcast %cst_86 : f32 to vector<2x32xf32>
    %244 = arith.addf %243, %242 : vector<2x32xf32>
    %245 = arith.divf %243, %244 : vector<2x32xf32>
    %246 = vector.extract_strided_slice %239 {offsets = [0, 32], sizes = [2, 32], strides = [1, 1]} : vector<2x128xf32> to vector<2x32xf32>
    %247 = arith.negf %246 : vector<2x32xf32>
    %248 = math.exp %247 : vector<2x32xf32>
    %cst_87 = arith.constant 1.000000e+00 : f32
    %249 = vector.broadcast %cst_87 : f32 to vector<2x32xf32>
    %250 = arith.addf %249, %248 : vector<2x32xf32>
    %251 = arith.divf %249, %250 : vector<2x32xf32>
    %252 = vector.extract_strided_slice %239 {offsets = [0, 64], sizes = [2, 32], strides = [1, 1]} : vector<2x128xf32> to vector<2x32xf32>
    %253 = math.tanh %252 : vector<2x32xf32>
    %254 = vector.extract_strided_slice %239 {offsets = [0, 96], sizes = [2, 32], strides = [1, 1]} : vector<2x128xf32> to vector<2x32xf32>
    %255 = arith.negf %254 : vector<2x32xf32>
    %256 = math.exp %255 : vector<2x32xf32>
    %cst_88 = arith.constant 1.000000e+00 : f32
    %257 = vector.broadcast %cst_88 : f32 to vector<2x32xf32>
    %258 = arith.addf %257, %256 : vector<2x32xf32>
    %259 = arith.divf %257, %258 : vector<2x32xf32>
    %260 = arith.mulf %251, %165 : vector<2x32xf32>
    %261 = arith.mulf %245, %253 : vector<2x32xf32>
    %262 = arith.addf %260, %261 : vector<2x32xf32>
    %263 = math.tanh %262 : vector<2x32xf32>
    %264 = arith.mulf %259, %263 : vector<2x32xf32>
    %cst_89 = arith.constant dense<0.000000e+00> : vector<2x128xf32>
    %265 = tpu.matmul %264, %18, %cst_89 {dimension_numbers = #tpu.dot_dimension_numbers<[1], [0], [0], [1], [0, 0, 1, 1], [], []>} : vector<2x32xf32>, vector<32x128xf32>, vector<2x128xf32> -> vector<2x128xf32>
    %cst_90 = arith.constant dense<0.000000e+00> : vector<2x128xf32>
    %266 = tpu.matmul %196, %19, %cst_90 {dimension_numbers = #tpu.dot_dimension_numbers<[1], [0], [0], [1], [0, 0, 1, 1], [], []>} : vector<2x32xf32>, vector<32x128xf32>, vector<2x128xf32> -> vector<2x128xf32>
    %267 = arith.addf %265, %266 : vector<2x128xf32>
    %268 = arith.addf %267, %28 : vector<2x128xf32>
    %269 = vector.extract_strided_slice %268 {offsets = [0, 0], sizes = [2, 32], strides = [1, 1]} : vector<2x128xf32> to vector<2x32xf32>
    %270 = arith.negf %269 : vector<2x32xf32>
    %271 = math.exp %270 : vector<2x32xf32>
    %cst_91 = arith.constant 1.000000e+00 : f32
    %272 = vector.broadcast %cst_91 : f32 to vector<2x32xf32>
    %273 = arith.addf %272, %271 : vector<2x32xf32>
    %274 = arith.divf %272, %273 : vector<2x32xf32>
    %275 = vector.extract_strided_slice %268 {offsets = [0, 32], sizes = [2, 32], strides = [1, 1]} : vector<2x128xf32> to vector<2x32xf32>
    %276 = arith.negf %275 : vector<2x32xf32>
    %277 = math.exp %276 : vector<2x32xf32>
    %cst_92 = arith.constant 1.000000e+00 : f32
    %278 = vector.broadcast %cst_92 : f32 to vector<2x32xf32>
    %279 = arith.addf %278, %277 : vector<2x32xf32>
    %280 = arith.divf %278, %279 : vector<2x32xf32>
    %281 = vector.extract_strided_slice %268 {offsets = [0, 64], sizes = [2, 32], strides = [1, 1]} : vector<2x128xf32> to vector<2x32xf32>
    %282 = math.tanh %281 : vector<2x32xf32>
    %283 = vector.extract_strided_slice %268 {offsets = [0, 96], sizes = [2, 32], strides = [1, 1]} : vector<2x128xf32> to vector<2x32xf32>
    %284 = arith.negf %283 : vector<2x32xf32>
    %285 = math.exp %284 : vector<2x32xf32>
    %cst_93 = arith.constant 1.000000e+00 : f32
    %286 = vector.broadcast %cst_93 : f32 to vector<2x32xf32>
    %287 = arith.addf %286, %285 : vector<2x32xf32>
    %288 = arith.divf %286, %287 : vector<2x32xf32>
    %289 = arith.mulf %280, %194 : vector<2x32xf32>
    %290 = arith.mulf %274, %282 : vector<2x32xf32>
    %291 = arith.addf %289, %290 : vector<2x32xf32>
    %292 = math.tanh %291 : vector<2x32xf32>
    %293 = arith.mulf %288, %292 : vector<2x32xf32>
    %cst_94 = arith.constant dense<0.000000e+00> : vector<2x32xf32>
    %294 = tpu.matmul %293, %20, %cst_94 {dimension_numbers = #tpu.dot_dimension_numbers<[1], [0], [0], [1], [0, 0, 1, 1], [], []>} : vector<2x32xf32>, vector<32x32xf32>, vector<2x32xf32> -> vector<2x32xf32>
    %295 = vector.shape_cast %294 : vector<2x32xf32> to vector<2x32x1xf32>
    %296 = vector.broadcast %295 : vector<2x32x1xf32> to vector<2x32x256xf32>
    %297 = arith.addf %15, %296 : vector<2x32x256xf32>
    %298 = math.tanh %297 : vector<2x32x256xf32>
    %299 = arith.mulf %298, %35 : vector<2x32x256xf32>
    %cst_95 = arith.constant dense<0.000000e+00> : vector<2x256xf32>
    %300 = vector.multi_reduction <add>, %299, %cst_95 [1] : vector<2x32x256xf32> to vector<2x256xf32>
    %cst_96 = arith.constant dense<0xFF800000> : vector<2xf32>
    %301 = vector.multi_reduction <maximumf>, %300, %cst_96 [1] : vector<2x256xf32> to vector<2xf32>
    %302 = vector.shape_cast %301 : vector<2xf32> to vector<2x1xf32>
    %303 = vector.broadcast %302 : vector<2x1xf32> to vector<2x256xf32>
    %304 = arith.subf %300, %303 : vector<2x256xf32>
    %305 = math.exp %304 : vector<2x256xf32>
    %cst_97 = arith.constant dense<0.000000e+00> : vector<2xf32>
    %306 = vector.multi_reduction <add>, %305, %cst_97 [1] : vector<2x256xf32> to vector<2xf32>
    %307 = vector.shape_cast %306 : vector<2xf32> to vector<2x1xf32>
    %308 = vector.broadcast %307 : vector<2x1xf32> to vector<2x256xf32>
    %309 = arith.divf %305, %308 : vector<2x256xf32>
    %310 = vector.shape_cast %309 : vector<2x256xf32> to vector<2x1x256xf32>
    %311 = vector.broadcast %310 : vector<2x1x256xf32> to vector<2x32x256xf32>
    %312 = arith.mulf %0, %311 : vector<2x32x256xf32>
    %cst_98 = arith.constant dense<0.000000e+00> : vector<2x32xf32>
    %313 = vector.multi_reduction <add>, %312, %cst_98 [2] : vector<2x32x256xf32> to vector<2x32xf32>
    %cst_99 = arith.constant dense<0.000000e+00> : vector<2x128xf32>
    %314 = tpu.matmul %293, %21, %cst_99 {dimension_numbers = #tpu.dot_dimension_numbers<[1], [0], [0], [1], [0, 0, 1, 1], [], []>} : vector<2x32xf32>, vector<32x128xf32>, vector<2x128xf32> -> vector<2x128xf32>
    %cst_100 = arith.constant dense<0.000000e+00> : vector<2x128xf32>
    %315 = tpu.matmul %313, %22, %cst_100 {dimension_numbers = #tpu.dot_dimension_numbers<[1], [0], [0], [1], [0, 0, 1, 1], [], []>} : vector<2x32xf32>, vector<32x128xf32>, vector<2x128xf32> -> vector<2x128xf32>
    %316 = arith.addf %314, %315 : vector<2x128xf32>
    %317 = arith.addf %316, %31 : vector<2x128xf32>
    %c0_101 = arith.constant 0 : index
    %c2 = arith.constant 2 : index
    %c0_102 = arith.constant 0 : index
    %318 = vector.load %arg15[%c0_101, %c2, %c0_102] : memref<2x5x128xf32, #tpu.memory_space<vmem>>, vector<2x1x128xf32>
    %319 = vector.shape_cast %318 : vector<2x1x128xf32> to vector<2x128xf32>
    %320 = vector.shape_cast %317 : vector<2x128xf32> to vector<2x1x128xf32>
    tpu.vector_store %arg15[%c0_101, %c2, %c0_102], %320 {strides = array<i32>} : memref<2x5x128xf32, #tpu.memory_space<vmem>>, vector<2x1x128xf32>,
    %cst_103 = arith.constant dense<0xFF800000> : vector<2xf32>
    %321 = vector.multi_reduction <maximumf>, %317, %cst_103 [1] : vector<2x128xf32> to vector<2xf32>
    %322 = vector.shape_cast %321 : vector<2xf32> to vector<2x1xf32>
    %323 = vector.broadcast %322 : vector<2x1xf32> to vector<2x128xf32>
    %324 = arith.cmpf oge, %317, %323 : vector<2x128xf32>
    %c128_i32_104 = arith.constant 128 : i32
    %325 = vector.broadcast %c128_i32_104 : i32 to vector<2x128xi32>
    %326 = arith.select %324, %36, %325 : vector<2x128xi1>, vector<2x128xi32>
    %cst_105 = arith.constant dense<2147483647> : vector<2xi32>
    %327 = vector.multi_reduction <minsi>, %326, %cst_105 [1] : vector<2x128xi32> to vector<2xi32>
    %328 = vector.shape_cast %327 : vector<2xi32> to vector<2x1xi32>
    %329 = vector.broadcast %328 : vector<2x1xi32> to vector<2x128xi32>
    %330 = arith.cmpi eq, %36, %329 : vector<2x128xi32>
    %331 = arith.extui %330 : vector<2x128xi1> to vector<2x128xi32>
    %332 = arith.sitofp %331 : vector<2x128xi32> to vector<2x128xf32>
    %cst_106 = arith.constant dense<0.000000e+00> : vector<2x128xf32>
    %333 = tpu.matmul %332, %16, %cst_106 {dimension_numbers = #tpu.dot_dimension_numbers<[1], [0], [0], [1], [0, 0, 1, 1], [], []>} : vector<2x128xf32>, vector<128x128xf32>, vector<2x128xf32> -> vector<2x128xf32>
    %cst_107 = arith.constant dense<0.000000e+00> : vector<2x128xf32>
    %334 = tpu.matmul %264, %17, %cst_107 {dimension_numbers = #tpu.dot_dimension_numbers<[1], [0], [0], [1], [0, 0, 1, 1], [], []>} : vector<2x32xf32>, vector<32x128xf32>, vector<2x128xf32> -> vector<2x128xf32>
    %335 = arith.addf %333, %334 : vector<2x128xf32>
    %336 = arith.addf %335, %25 : vector<2x128xf32>
    %337 = vector.extract_strided_slice %336 {offsets = [0, 0], sizes = [2, 32], strides = [1, 1]} : vector<2x128xf32> to vector<2x32xf32>
    %338 = arith.negf %337 : vector<2x32xf32>
    %339 = math.exp %338 : vector<2x32xf32>
    %cst_108 = arith.constant 1.000000e+00 : f32
    %340 = vector.broadcast %cst_108 : f32 to vector<2x32xf32>
    %341 = arith.addf %340, %339 : vector<2x32xf32>
    %342 = arith.divf %340, %341 : vector<2x32xf32>
    %343 = vector.extract_strided_slice %336 {offsets = [0, 32], sizes = [2, 32], strides = [1, 1]} : vector<2x128xf32> to vector<2x32xf32>
    %344 = arith.negf %343 : vector<2x32xf32>
    %345 = math.exp %344 : vector<2x32xf32>
    %cst_109 = arith.constant 1.000000e+00 : f32
    %346 = vector.broadcast %cst_109 : f32 to vector<2x32xf32>
    %347 = arith.addf %346, %345 : vector<2x32xf32>
    %348 = arith.divf %346, %347 : vector<2x32xf32>
    %349 = vector.extract_strided_slice %336 {offsets = [0, 64], sizes = [2, 32], strides = [1, 1]} : vector<2x128xf32> to vector<2x32xf32>
    %350 = math.tanh %349 : vector<2x32xf32>
    %351 = vector.extract_strided_slice %336 {offsets = [0, 96], sizes = [2, 32], strides = [1, 1]} : vector<2x128xf32> to vector<2x32xf32>
    %352 = arith.negf %351 : vector<2x32xf32>
    %353 = math.exp %352 : vector<2x32xf32>
    %cst_110 = arith.constant 1.000000e+00 : f32
    %354 = vector.broadcast %cst_110 : f32 to vector<2x32xf32>
    %355 = arith.addf %354, %353 : vector<2x32xf32>
    %356 = arith.divf %354, %355 : vector<2x32xf32>
    %357 = arith.mulf %348, %262 : vector<2x32xf32>
    %358 = arith.mulf %342, %350 : vector<2x32xf32>
    %359 = arith.addf %357, %358 : vector<2x32xf32>
    %360 = math.tanh %359 : vector<2x32xf32>
    %361 = arith.mulf %356, %360 : vector<2x32xf32>
    %cst_111 = arith.constant dense<0.000000e+00> : vector<2x128xf32>
    %362 = tpu.matmul %361, %18, %cst_111 {dimension_numbers = #tpu.dot_dimension_numbers<[1], [0], [0], [1], [0, 0, 1, 1], [], []>} : vector<2x32xf32>, vector<32x128xf32>, vector<2x128xf32> -> vector<2x128xf32>
    %cst_112 = arith.constant dense<0.000000e+00> : vector<2x128xf32>
    %363 = tpu.matmul %293, %19, %cst_112 {dimension_numbers = #tpu.dot_dimension_numbers<[1], [0], [0], [1], [0, 0, 1, 1], [], []>} : vector<2x32xf32>, vector<32x128xf32>, vector<2x128xf32> -> vector<2x128xf32>
    %364 = arith.addf %362, %363 : vector<2x128xf32>
    %365 = arith.addf %364, %28 : vector<2x128xf32>
    %366 = vector.extract_strided_slice %365 {offsets = [0, 0], sizes = [2, 32], strides = [1, 1]} : vector<2x128xf32> to vector<2x32xf32>
    %367 = arith.negf %366 : vector<2x32xf32>
    %368 = math.exp %367 : vector<2x32xf32>
    %cst_113 = arith.constant 1.000000e+00 : f32
    %369 = vector.broadcast %cst_113 : f32 to vector<2x32xf32>
    %370 = arith.addf %369, %368 : vector<2x32xf32>
    %371 = arith.divf %369, %370 : vector<2x32xf32>
    %372 = vector.extract_strided_slice %365 {offsets = [0, 32], sizes = [2, 32], strides = [1, 1]} : vector<2x128xf32> to vector<2x32xf32>
    %373 = arith.negf %372 : vector<2x32xf32>
    %374 = math.exp %373 : vector<2x32xf32>
    %cst_114 = arith.constant 1.000000e+00 : f32
    %375 = vector.broadcast %cst_114 : f32 to vector<2x32xf32>
    %376 = arith.addf %375, %374 : vector<2x32xf32>
    %377 = arith.divf %375, %376 : vector<2x32xf32>
    %378 = vector.extract_strided_slice %365 {offsets = [0, 64], sizes = [2, 32], strides = [1, 1]} : vector<2x128xf32> to vector<2x32xf32>
    %379 = math.tanh %378 : vector<2x32xf32>
    %380 = vector.extract_strided_slice %365 {offsets = [0, 96], sizes = [2, 32], strides = [1, 1]} : vector<2x128xf32> to vector<2x32xf32>
    %381 = arith.negf %380 : vector<2x32xf32>
    %382 = math.exp %381 : vector<2x32xf32>
    %cst_115 = arith.constant 1.000000e+00 : f32
    %383 = vector.broadcast %cst_115 : f32 to vector<2x32xf32>
    %384 = arith.addf %383, %382 : vector<2x32xf32>
    %385 = arith.divf %383, %384 : vector<2x32xf32>
    %386 = arith.mulf %377, %291 : vector<2x32xf32>
    %387 = arith.mulf %371, %379 : vector<2x32xf32>
    %388 = arith.addf %386, %387 : vector<2x32xf32>
    %389 = math.tanh %388 : vector<2x32xf32>
    %390 = arith.mulf %385, %389 : vector<2x32xf32>
    %cst_116 = arith.constant dense<0.000000e+00> : vector<2x32xf32>
    %391 = tpu.matmul %390, %20, %cst_116 {dimension_numbers = #tpu.dot_dimension_numbers<[1], [0], [0], [1], [0, 0, 1, 1], [], []>} : vector<2x32xf32>, vector<32x32xf32>, vector<2x32xf32> -> vector<2x32xf32>
    %392 = vector.shape_cast %391 : vector<2x32xf32> to vector<2x32x1xf32>
    %393 = vector.broadcast %392 : vector<2x32x1xf32> to vector<2x32x256xf32>
    %394 = arith.addf %15, %393 : vector<2x32x256xf32>
    %395 = math.tanh %394 : vector<2x32x256xf32>
    %396 = arith.mulf %395, %35 : vector<2x32x256xf32>
    %cst_117 = arith.constant dense<0.000000e+00> : vector<2x256xf32>
    %397 = vector.multi_reduction <add>, %396, %cst_117 [1] : vector<2x32x256xf32> to vector<2x256xf32>
    %cst_118 = arith.constant dense<0xFF800000> : vector<2xf32>
    %398 = vector.multi_reduction <maximumf>, %397, %cst_118 [1] : vector<2x256xf32> to vector<2xf32>
    %399 = vector.shape_cast %398 : vector<2xf32> to vector<2x1xf32>
    %400 = vector.broadcast %399 : vector<2x1xf32> to vector<2x256xf32>
    %401 = arith.subf %397, %400 : vector<2x256xf32>
    %402 = math.exp %401 : vector<2x256xf32>
    %cst_119 = arith.constant dense<0.000000e+00> : vector<2xf32>
    %403 = vector.multi_reduction <add>, %402, %cst_119 [1] : vector<2x256xf32> to vector<2xf32>
    %404 = vector.shape_cast %403 : vector<2xf32> to vector<2x1xf32>
    %405 = vector.broadcast %404 : vector<2x1xf32> to vector<2x256xf32>
    %406 = arith.divf %402, %405 : vector<2x256xf32>
    %407 = vector.shape_cast %406 : vector<2x256xf32> to vector<2x1x256xf32>
    %408 = vector.broadcast %407 : vector<2x1x256xf32> to vector<2x32x256xf32>
    %409 = arith.mulf %0, %408 : vector<2x32x256xf32>
    %cst_120 = arith.constant dense<0.000000e+00> : vector<2x32xf32>
    %410 = vector.multi_reduction <add>, %409, %cst_120 [2] : vector<2x32x256xf32> to vector<2x32xf32>
    %cst_121 = arith.constant dense<0.000000e+00> : vector<2x128xf32>
    %411 = tpu.matmul %390, %21, %cst_121 {dimension_numbers = #tpu.dot_dimension_numbers<[1], [0], [0], [1], [0, 0, 1, 1], [], []>} : vector<2x32xf32>, vector<32x128xf32>, vector<2x128xf32> -> vector<2x128xf32>
    %cst_122 = arith.constant dense<0.000000e+00> : vector<2x128xf32>
    %412 = tpu.matmul %410, %22, %cst_122 {dimension_numbers = #tpu.dot_dimension_numbers<[1], [0], [0], [1], [0, 0, 1, 1], [], []>} : vector<2x32xf32>, vector<32x128xf32>, vector<2x128xf32> -> vector<2x128xf32>
    %413 = arith.addf %411, %412 : vector<2x128xf32>
    %414 = arith.addf %413, %31 : vector<2x128xf32>
    %c0_123 = arith.constant 0 : index
    %c3 = arith.constant 3 : index
    %c0_124 = arith.constant 0 : index
    %415 = vector.load %arg15[%c0_123, %c3, %c0_124] : memref<2x5x128xf32, #tpu.memory_space<vmem>>, vector<2x1x128xf32>
    %416 = vector.shape_cast %415 : vector<2x1x128xf32> to vector<2x128xf32>
    %417 = vector.shape_cast %414 : vector<2x128xf32> to vector<2x1x128xf32>
    tpu.vector_store %arg15[%c0_123, %c3, %c0_124], %417 {strides = array<i32>} : memref<2x5x128xf32, #tpu.memory_space<vmem>>, vector<2x1x128xf32>,
    %cst_125 = arith.constant dense<0xFF800000> : vector<2xf32>
    %418 = vector.multi_reduction <maximumf>, %414, %cst_125 [1] : vector<2x128xf32> to vector<2xf32>
    %419 = vector.shape_cast %418 : vector<2xf32> to vector<2x1xf32>
    %420 = vector.broadcast %419 : vector<2x1xf32> to vector<2x128xf32>
    %421 = arith.cmpf oge, %414, %420 : vector<2x128xf32>
    %c128_i32_126 = arith.constant 128 : i32
    %422 = vector.broadcast %c128_i32_126 : i32 to vector<2x128xi32>
    %423 = arith.select %421, %36, %422 : vector<2x128xi1>, vector<2x128xi32>
    %cst_127 = arith.constant dense<2147483647> : vector<2xi32>
    %424 = vector.multi_reduction <minsi>, %423, %cst_127 [1] : vector<2x128xi32> to vector<2xi32>
    %425 = vector.shape_cast %424 : vector<2xi32> to vector<2x1xi32>
    %426 = vector.broadcast %425 : vector<2x1xi32> to vector<2x128xi32>
    %427 = arith.cmpi eq, %36, %426 : vector<2x128xi32>
    %428 = arith.extui %427 : vector<2x128xi1> to vector<2x128xi32>
    %429 = arith.sitofp %428 : vector<2x128xi32> to vector<2x128xf32>
    %cst_128 = arith.constant dense<0.000000e+00> : vector<2x128xf32>
    %430 = tpu.matmul %429, %16, %cst_128 {dimension_numbers = #tpu.dot_dimension_numbers<[1], [0], [0], [1], [0, 0, 1, 1], [], []>} : vector<2x128xf32>, vector<128x128xf32>, vector<2x128xf32> -> vector<2x128xf32>
    %cst_129 = arith.constant dense<0.000000e+00> : vector<2x128xf32>
    %431 = tpu.matmul %361, %17, %cst_129 {dimension_numbers = #tpu.dot_dimension_numbers<[1], [0], [0], [1], [0, 0, 1, 1], [], []>} : vector<2x32xf32>, vector<32x128xf32>, vector<2x128xf32> -> vector<2x128xf32>
    %432 = arith.addf %430, %431 : vector<2x128xf32>
    %433 = arith.addf %432, %25 : vector<2x128xf32>
    %434 = vector.extract_strided_slice %433 {offsets = [0, 0], sizes = [2, 32], strides = [1, 1]} : vector<2x128xf32> to vector<2x32xf32>
    %435 = arith.negf %434 : vector<2x32xf32>
    %436 = math.exp %435 : vector<2x32xf32>
    %cst_130 = arith.constant 1.000000e+00 : f32
    %437 = vector.broadcast %cst_130 : f32 to vector<2x32xf32>
    %438 = arith.addf %437, %436 : vector<2x32xf32>
    %439 = arith.divf %437, %438 : vector<2x32xf32>
    %440 = vector.extract_strided_slice %433 {offsets = [0, 32], sizes = [2, 32], strides = [1, 1]} : vector<2x128xf32> to vector<2x32xf32>
    %441 = arith.negf %440 : vector<2x32xf32>
    %442 = math.exp %441 : vector<2x32xf32>
    %cst_131 = arith.constant 1.000000e+00 : f32
    %443 = vector.broadcast %cst_131 : f32 to vector<2x32xf32>
    %444 = arith.addf %443, %442 : vector<2x32xf32>
    %445 = arith.divf %443, %444 : vector<2x32xf32>
    %446 = vector.extract_strided_slice %433 {offsets = [0, 64], sizes = [2, 32], strides = [1, 1]} : vector<2x128xf32> to vector<2x32xf32>
    %447 = math.tanh %446 : vector<2x32xf32>
    %448 = vector.extract_strided_slice %433 {offsets = [0, 96], sizes = [2, 32], strides = [1, 1]} : vector<2x128xf32> to vector<2x32xf32>
    %449 = arith.negf %448 : vector<2x32xf32>
    %450 = math.exp %449 : vector<2x32xf32>
    %cst_132 = arith.constant 1.000000e+00 : f32
    %451 = vector.broadcast %cst_132 : f32 to vector<2x32xf32>
    %452 = arith.addf %451, %450 : vector<2x32xf32>
    %453 = arith.divf %451, %452 : vector<2x32xf32>
    %454 = arith.mulf %445, %359 : vector<2x32xf32>
    %455 = arith.mulf %439, %447 : vector<2x32xf32>
    %456 = arith.addf %454, %455 : vector<2x32xf32>
    %457 = math.tanh %456 : vector<2x32xf32>
    %458 = arith.mulf %453, %457 : vector<2x32xf32>
    %cst_133 = arith.constant dense<0.000000e+00> : vector<2x128xf32>
    %459 = tpu.matmul %458, %18, %cst_133 {dimension_numbers = #tpu.dot_dimension_numbers<[1], [0], [0], [1], [0, 0, 1, 1], [], []>} : vector<2x32xf32>, vector<32x128xf32>, vector<2x128xf32> -> vector<2x128xf32>
    %cst_134 = arith.constant dense<0.000000e+00> : vector<2x128xf32>
    %460 = tpu.matmul %390, %19, %cst_134 {dimension_numbers = #tpu.dot_dimension_numbers<[1], [0], [0], [1], [0, 0, 1, 1], [], []>} : vector<2x32xf32>, vector<32x128xf32>, vector<2x128xf32> -> vector<2x128xf32>
    %461 = arith.addf %459, %460 : vector<2x128xf32>
    %462 = arith.addf %461, %28 : vector<2x128xf32>
    %463 = vector.extract_strided_slice %462 {offsets = [0, 0], sizes = [2, 32], strides = [1, 1]} : vector<2x128xf32> to vector<2x32xf32>
    %464 = arith.negf %463 : vector<2x32xf32>
    %465 = math.exp %464 : vector<2x32xf32>
    %cst_135 = arith.constant 1.000000e+00 : f32
    %466 = vector.broadcast %cst_135 : f32 to vector<2x32xf32>
    %467 = arith.addf %466, %465 : vector<2x32xf32>
    %468 = arith.divf %466, %467 : vector<2x32xf32>
    %469 = vector.extract_strided_slice %462 {offsets = [0, 32], sizes = [2, 32], strides = [1, 1]} : vector<2x128xf32> to vector<2x32xf32>
    %470 = arith.negf %469 : vector<2x32xf32>
    %471 = math.exp %470 : vector<2x32xf32>
    %cst_136 = arith.constant 1.000000e+00 : f32
    %472 = vector.broadcast %cst_136 : f32 to vector<2x32xf32>
    %473 = arith.addf %472, %471 : vector<2x32xf32>
    %474 = arith.divf %472, %473 : vector<2x32xf32>
    %475 = vector.extract_strided_slice %462 {offsets = [0, 64], sizes = [2, 32], strides = [1, 1]} : vector<2x128xf32> to vector<2x32xf32>
    %476 = math.tanh %475 : vector<2x32xf32>
    %477 = vector.extract_strided_slice %462 {offsets = [0, 96], sizes = [2, 32], strides = [1, 1]} : vector<2x128xf32> to vector<2x32xf32>
    %478 = arith.negf %477 : vector<2x32xf32>
    %479 = math.exp %478 : vector<2x32xf32>
    %cst_137 = arith.constant 1.000000e+00 : f32
    %480 = vector.broadcast %cst_137 : f32 to vector<2x32xf32>
    %481 = arith.addf %480, %479 : vector<2x32xf32>
    %482 = arith.divf %480, %481 : vector<2x32xf32>
    %483 = arith.mulf %474, %388 : vector<2x32xf32>
    %484 = arith.mulf %468, %476 : vector<2x32xf32>
    %485 = arith.addf %483, %484 : vector<2x32xf32>
    %486 = math.tanh %485 : vector<2x32xf32>
    %487 = arith.mulf %482, %486 : vector<2x32xf32>
    %cst_138 = arith.constant dense<0.000000e+00> : vector<2x32xf32>
    %488 = tpu.matmul %487, %20, %cst_138 {dimension_numbers = #tpu.dot_dimension_numbers<[1], [0], [0], [1], [0, 0, 1, 1], [], []>} : vector<2x32xf32>, vector<32x32xf32>, vector<2x32xf32> -> vector<2x32xf32>
    %489 = vector.shape_cast %488 : vector<2x32xf32> to vector<2x32x1xf32>
    %490 = vector.broadcast %489 : vector<2x32x1xf32> to vector<2x32x256xf32>
    %491 = arith.addf %15, %490 : vector<2x32x256xf32>
    %492 = math.tanh %491 : vector<2x32x256xf32>
    %493 = arith.mulf %492, %35 : vector<2x32x256xf32>
    %cst_139 = arith.constant dense<0.000000e+00> : vector<2x256xf32>
    %494 = vector.multi_reduction <add>, %493, %cst_139 [1] : vector<2x32x256xf32> to vector<2x256xf32>
    %cst_140 = arith.constant dense<0xFF800000> : vector<2xf32>
    %495 = vector.multi_reduction <maximumf>, %494, %cst_140 [1] : vector<2x256xf32> to vector<2xf32>
    %496 = vector.shape_cast %495 : vector<2xf32> to vector<2x1xf32>
    %497 = vector.broadcast %496 : vector<2x1xf32> to vector<2x256xf32>
    %498 = arith.subf %494, %497 : vector<2x256xf32>
    %499 = math.exp %498 : vector<2x256xf32>
    %cst_141 = arith.constant dense<0.000000e+00> : vector<2xf32>
    %500 = vector.multi_reduction <add>, %499, %cst_141 [1] : vector<2x256xf32> to vector<2xf32>
    %501 = vector.shape_cast %500 : vector<2xf32> to vector<2x1xf32>
    %502 = vector.broadcast %501 : vector<2x1xf32> to vector<2x256xf32>
    %503 = arith.divf %499, %502 : vector<2x256xf32>
    %504 = vector.shape_cast %503 : vector<2x256xf32> to vector<2x1x256xf32>
    %505 = vector.broadcast %504 : vector<2x1x256xf32> to vector<2x32x256xf32>
    %506 = arith.mulf %0, %505 : vector<2x32x256xf32>
    %cst_142 = arith.constant dense<0.000000e+00> : vector<2x32xf32>
    %507 = vector.multi_reduction <add>, %506, %cst_142 [2] : vector<2x32x256xf32> to vector<2x32xf32>
    %cst_143 = arith.constant dense<0.000000e+00> : vector<2x128xf32>
    %508 = tpu.matmul %487, %21, %cst_143 {dimension_numbers = #tpu.dot_dimension_numbers<[1], [0], [0], [1], [0, 0, 1, 1], [], []>} : vector<2x32xf32>, vector<32x128xf32>, vector<2x128xf32> -> vector<2x128xf32>
    %cst_144 = arith.constant dense<0.000000e+00> : vector<2x128xf32>
    %509 = tpu.matmul %507, %22, %cst_144 {dimension_numbers = #tpu.dot_dimension_numbers<[1], [0], [0], [1], [0, 0, 1, 1], [], []>} : vector<2x32xf32>, vector<32x128xf32>, vector<2x128xf32> -> vector<2x128xf32>
    %510 = arith.addf %508, %509 : vector<2x128xf32>
    %511 = arith.addf %510, %31 : vector<2x128xf32>
    %c0_145 = arith.constant 0 : index
    %c4 = arith.constant 4 : index
    %c0_146 = arith.constant 0 : index
    %512 = vector.load %arg15[%c0_145, %c4, %c0_146] : memref<2x5x128xf32, #tpu.memory_space<vmem>>, vector<2x1x128xf32>
    %513 = vector.shape_cast %512 : vector<2x1x128xf32> to vector<2x128xf32>
    %514 = vector.shape_cast %511 : vector<2x128xf32> to vector<2x1x128xf32>
    tpu.vector_store %arg15[%c0_145, %c4, %c0_146], %514 {strides = array<i32>} : memref<2x5x128xf32, #tpu.memory_space<vmem>>, vector<2x1x128xf32>,
    return
  }
}

</mosaic_0001>

<bundles_post_ra>
// kernel: forward.1
= control target key start
LH: loop header
LB: loop body
LE: loop exit
PB: predicated region body
PF: predicated region fallthrough
CT: control target
= control target key end

     0   :  { %vm174_vm0 = vcmask 261120   ;;  %vm6810_vm1 = vmmov 0   ;;  %s6811_s19 = smov 64   ;;  %s6812_s20 = smov 32   ;;  %vm1242_vm2 = vcmask 1041409   ;;  %vm1247_vm3 = vcmask 1041408   ;;  %s8790_s1 = inlined_call_operand.vmem [shape: f32[2,288,256], index: 1, kind: input, shape index: {}]   ;;  %s8791_s2 = inlined_call_operand.vmem [shape: f32[32,288], index: 2, kind: input, shape index: {}]   ;;  %s8792_s4 = inlined_call_operand.vmem [shape: f32[128,128], index: 4, kind: input, shape index: {}]   ;;  %s8793_s5 = inlined_call_operand.vmem [shape: f32[32,128], index: 5, kind: input, shape index: {}]   ;;  %s8794_s6 = inlined_call_operand.vmem [shape: f32[1,128], index: 6, kind: input, shape index: {}]   ;;  %s8795_s8 = inlined_call_operand.vmem [shape: f32[32,128], index: 8, kind: input, shape index: {}]   ;;  %s8796_s7 = inlined_call_operand.vmem [shape: f32[32,128], index: 7, kind: input, shape index: {}]   ;;  %s8797_s9 = inlined_call_operand.vmem [shape: f32[1,128], index: 9, kind: input, shape index: {}]   ;;  %s8798_s3 = inlined_call_operand.vmem [shape: f32[32,1], index: 3, kind: input, shape index: {}]   ;;  %s8799_s10 = inlined_call_operand.vmem [shape: f32[32,32], index: 10, kind: input, shape index: {}]   ;;  %s8800_s11 = inlined_call_operand.vmem [shape: f32[32,1], index: 11, kind: input, shape index: {}]   ;;  %s8801_s12 = inlined_call_operand.vmem [shape: f32[32,128], index: 12, kind: input, shape index: {}]   ;;  %s8802_s0 = inlined_call_operand.vmem [shape: f32[2,32,256], index: 0, kind: input, shape index: {}]   ;;  %s8803_s13 = inlined_call_operand.vmem [shape: f32[32,128], index: 13, kind: input, shape index: {}]   ;;  %s8804_s14 = inlined_call_operand.vmem [shape: f32[1,128], index: 14, kind: input, shape index: {}]   ;;  %s8805_s15 = inlined_call_operand.vmem [shape: f32[2,5,128], index: 15, kind: output, shape index: {}]  }
   0x1   :  { %v83_v0 = vld [vmem:[%s8790_s1 + $0x8] sm:$0xff]  ;;  %v85_v1 = vld [vmem:[%s8790_s1 + $0x18] sm:$0xff]  ;;  %v82_v5 = vld [vmem:[%s8790_s1] sm:$0xff]  ;;  %vm1367_vm4 = vcmask 130112   ;;  %vm1374_vm5 = vcmask 195712   ;;  %vm1381_vm6 = vcmask 261312  }
   0x2   :  { %v5110_v2 = vld [vmem:[%s8790_s1 + $0x248] sm:$0xff]  ;;  %v5984_v3 = vpack.c.bf16 %v85_v1, %v83_v0  ;;  %v5112_v4 = vld [vmem:[%s8790_s1 + $0x258] sm:$0xff]  ;;  %v84_v6 = vld [vmem:[%s8790_s1 + $0x10] sm:$0xff] }
   0x3   :  { %v6056_v7 = vpack.c.bf16 %v5112_v4, %v5110_v2  ;;  %v5986_v8 = vpack.c.bf16 %v84_v6, %v82_v5  ;;  %v5109_v9 = vld [vmem:[%s8790_s1 + $0x240] sm:$0xff]  ;;  %v5111_v10 = vld [vmem:[%s8790_s1 + $0x250] sm:$0xff]  ;;  %v87_v11 = vld [vmem:[%s8790_s1 + $0x28] sm:$0xff] }
   0x4   :  { %5985 = vmatprep.subr.bf16.mxu0 %v5984_v3  ;;  %v6058_v12 = vpack.c.bf16 %v5111_v10, %v5109_v9  ;;  %v89_v13 = vld [vmem:[%s8790_s1 + $0x38] sm:$0xff]  ;;  %v5114_v14 = vld [vmem:[%s8790_s1 + $0x268] sm:$0xff]  ;;  %v86_v18 = vld [vmem:[%s8790_s1 + $0x20] sm:$0xff] }
   0x5   :  { %v5116_v15 = vld [vmem:[%s8790_s1 + $0x278] sm:$0xff]  ;;  %6057 = vmatprep.subr.bf16.mxu1 %v6056_v7  ;;  %5987 = vmatpush1.bf16.msra.mxu0 %v5986_v8  ;;  %v5988_v16 = vpack.c.bf16 %v89_v13, %v87_v11  ;;  %v88_v19 = vld [vmem:[%s8790_s1 + $0x30] sm:$0xff]  ;;  %v5113_v20 = vld [vmem:[%s8790_s1 + $0x260] sm:$0xff] }
   0x6   :  { %v6060_v17 = vpack.c.bf16 %v5116_v15, %v5114_v14  ;;  %6059 = vmatpush1.bf16.msra.mxu1 %v6058_v12  ;;  %v5990_v21 = vpack.c.bf16 %v88_v19, %v86_v18  ;;  %v5115_v22 = vld [vmem:[%s8790_s1 + $0x270] sm:$0xff]  ;;  %v91_v23 = vld [vmem:[%s8790_s1 + $0x48] sm:$0xff]  ;;  %v93_v24 = vld [vmem:[%s8790_s1 + $0x58] sm:$0xff] }
   0x7   :  { %5989 = vmatprep.subr.bf16.mxu0 %v5988_v16  ;;  %v6062_v25 = vpack.c.bf16 %v5115_v22, %v5113_v20  ;;  %v5992_v26 = vpack.c.bf16 %v93_v24, %v91_v23  ;;  %v5118_v27 = vld [vmem:[%s8790_s1 + $0x288] sm:$0xff]  ;;  %v5120_v28 = vld [vmem:[%s8790_s1 + $0x298] sm:$0xff]  ;;  %v90_v29 = vld [vmem:[%s8790_s1 + $0x40] sm:$0xff] }
   0x8   :  { %6061 = vmatprep.subr.bf16.mxu1 %v6060_v17  ;;  %v6064_v30 = vpack.c.bf16 %v5120_v28, %v5118_v27  ;;  %v92_v31 = vld [vmem:[%s8790_s1 + $0x50] sm:$0xff]  ;;  %v5117_v32 = vld [vmem:[%s8790_s1 + $0x280] sm:$0xff]  ;;  %v95_v35 = vld [vmem:[%s8790_s1 + $0x68] sm:$0xff] }
   0x9   :  { %v5119_v33 = vld [vmem:[%s8790_s1 + $0x290] sm:$0xff]  ;;  %5991 = vmatpush1.bf16.msra.mxu0 %v5990_v21  ;;  %v5994_v34 = vpack.c.bf16 %v92_v31, %v90_v29  ;;  %v97_v36 = vld [vmem:[%s8790_s1 + $0x78] sm:$0xff]  ;;  %v5122_v37 = vld [vmem:[%s8790_s1 + $0x2a8] sm:$0xff] }
   0xa   :  { %6063 = vmatpush1.bf16.msra.mxu1 %v6062_v25  ;;  %5993 = vmatprep.subr.bf16.mxu0 %v5992_v26  ;;  %v6066_v38 = vpack.c.bf16 %v5119_v33, %v5117_v32  ;;  %v5996_v39 = vpack.c.bf16 %v97_v36, %v95_v35  ;;  %v5124_v40 = vld [vmem:[%s8790_s1 + $0x2b8] sm:$0xff]  ;;  %v94_v41 = vld [vmem:[%s8790_s1 + $0x60] sm:$0xff]  ;;  %v96_v42 = vld [vmem:[%s8790_s1 + $0x70] sm:$0xff] }
   0xb   :  { %6065 = vmatprep.subr.bf16.mxu1 %v6064_v30  ;;  %v6068_v43 = vpack.c.bf16 %v5124_v40, %v5122_v37  ;;  %v5121_v44 = vld [vmem:[%s8790_s1 + $0x2a0] sm:$0xff]  ;;  %v5123_v45 = vld [vmem:[%s8790_s1 + $0x2b0] sm:$0xff]  ;;  %v99_v46 = vld [vmem:[%s8790_s1 + $0x88] sm:$0xff]  ;;  %v5998_v50 = vpack.c.bf16 %v96_v42, %v94_v41 }
   0xc   :  { %v101_v47 = vld [vmem:[%s8790_s1 + $0x98] sm:$0xff]  ;;  %v5126_v48 = vld [vmem:[%s8790_s1 + $0x2c8] sm:$0xff]  ;;  %v6070_v51 = vpack.c.bf16 %v5123_v45, %v5121_v44  ;;  %v98_v53 = vld [vmem:[%s8790_s1 + $0x80] sm:$0xff] }
   0xd   :  { %v5128_v49 = vld [vmem:[%s8790_s1 + $0x2d8] sm:$0xff]  ;;  %5995 = vmatpush1.bf16.msra.mxu0 %v5994_v34  ;;  %v6000_v52 = vpack.c.bf16 %v101_v47, %v99_v46  ;;  %v100_v54 = vld [vmem:[%s8790_s1 + $0x90] sm:$0xff]  ;;  %v5125_v55 = vld [vmem:[%s8790_s1 + $0x2c0] sm:$0xff] }
   0xe   :  { %6067 = vmatpush1.bf16.msra.mxu1 %v6066_v38  ;;  %5997 = vmatprep.subr.bf16.mxu0 %v5996_v39  ;;  %v6072_v56 = vpack.c.bf16 %v5128_v49, %v5126_v48  ;;  %v5127_v57 = vld [vmem:[%s8790_s1 + $0x2d0] sm:$0xff]  ;;  %v103_v58 = vld [vmem:[%s8790_s1 + $0xa8] sm:$0xff]  ;;  %v105_v59 = vld [vmem:[%s8790_s1 + $0xb8] sm:$0xff]  ;;  %v6002_v62 = vpack.c.bf16 %v100_v54, %v98_v53 }
   0xf   :  { %6069 = vmatprep.subr.bf16.mxu1 %v6068_v43  ;;  %v5130_v60 = vld [vmem:[%s8790_s1 + $0x2e8] sm:$0xff]  ;;  %v5132_v61 = vld [vmem:[%s8790_s1 + $0x2f8] sm:$0xff]  ;;  %v6074_v63 = vpack.c.bf16 %v5127_v57, %v5125_v55  ;;  %v6004_v0 = vpack.c.bf16 %v105_v59, %v103_v58  ;;  %v102_v1 = vld [vmem:[%s8790_s1 + $0xa0] sm:$0xff] }
  0x10   :  { %v104_v2 = vld [vmem:[%s8790_s1 + $0xb0] sm:$0xff]  ;;  %v5129_v3 = vld [vmem:[%s8790_s1 + $0x2e0] sm:$0xff]  ;;  %v6076_v4 = vpack.c.bf16 %v5132_v61, %v5130_v60  ;;  %v107_v6 = vld [vmem:[%s8790_s1 + $0xc8] sm:$0xff] }
  0x11   :  { %5999 = vmatpush1.bf16.msra.mxu0 %v5998_v50  ;;  %v5131_v5 = vld [vmem:[%s8790_s1 + $0x2f0] sm:$0xff]  ;;  %v109_v7 = vld [vmem:[%s8790_s1 + $0xd8] sm:$0xff]  ;;  %v5134_v8 = vld [vmem:[%s8790_s1 + $0x308] sm:$0xff]  ;;  %v6006_v10 = vpack.c.bf16 %v104_v2, %v102_v1 }
  0x12   :  { %6071 = vmatpush1.bf16.msra.mxu1 %v6070_v51  ;;  %6001 = vmatprep.subr.bf16.mxu0 %v6000_v52  ;;  %v5136_v9 = vld [vmem:[%s8790_s1 + $0x318] sm:$0xff]  ;;  %v6078_v11 = vpack.c.bf16 %v5131_v5, %v5129_v3  ;;  %v6008_v12 = vpack.c.bf16 %v109_v7, %v107_v6  ;;  %v106_v13 = vld [vmem:[%s8790_s1 + $0xc0] sm:$0xff]  ;;  %v108_v14 = vld [vmem:[%s8790_s1 + $0xd0] sm:$0xff] }
  0x13   :  { %6073 = vmatprep.subr.bf16.mxu1 %v6072_v56  ;;  %v5133_v15 = vld [vmem:[%s8790_s1 + $0x300] sm:$0xff]  ;;  %v6080_v16 = vpack.c.bf16 %v5136_v9, %v5134_v8  ;;  %v5135_v17 = vld [vmem:[%s8790_s1 + $0x310] sm:$0xff]  ;;  %v111_v18 = vld [vmem:[%s8790_s1 + $0xe8] sm:$0xff]  ;;  %v6010_v22 = vpack.c.bf16 %v108_v14, %v106_v13 }
  0x14   :  { %v113_v19 = vld [vmem:[%s8790_s1 + $0xf8] sm:$0xff]  ;;  %v5138_v20 = vld [vmem:[%s8790_s1 + $0x328] sm:$0xff]  ;;  %v6082_v23 = vpack.c.bf16 %v5135_v17, %v5133_v15  ;;  %v110_v25 = vld [vmem:[%s8790_s1 + $0xe0] sm:$0xff] }
  0x15   :  { %6003 = vmatpush1.bf16.msra.mxu0 %v6002_v62  ;;  %v5140_v21 = vld [vmem:[%s8790_s1 + $0x338] sm:$0xff]  ;;  %v6012_v24 = vpack.c.bf16 %v113_v19, %v111_v18  ;;  %v112_v26 = vld [vmem:[%s8790_s1 + $0xf0] sm:$0xff]  ;;  %v5137_v27 = vld [vmem:[%s8790_s1 + $0x320] sm:$0xff] }
  0x16   :  { %6075 = vmatpush1.bf16.msra.mxu1 %v6074_v63  ;;  %6005 = vmatprep.subr.bf16.mxu0 %v6004_v0  ;;  %v6084_v28 = vpack.c.bf16 %v5140_v21, %v5138_v20  ;;  %v5139_v29 = vld [vmem:[%s8790_s1 + $0x330] sm:$0xff]  ;;  %v115_v30 = vld [vmem:[%s8790_s1 + $0x108] sm:$0xff]  ;;  %v117_v31 = vld [vmem:[%s8790_s1 + $0x118] sm:$0xff]  ;;  %v6014_v34 = vpack.c.bf16 %v112_v26, %v110_v25 }
  0x17   :  { %6077 = vmatprep.subr.bf16.mxu1 %v6076_v4  ;;  %v5142_v32 = vld [vmem:[%s8790_s1 + $0x348] sm:$0xff]  ;;  %v5144_v33 = vld [vmem:[%s8790_s1 + $0x358] sm:$0xff]  ;;  %v6086_v35 = vpack.c.bf16 %v5139_v29, %v5137_v27  ;;  %v6016_v36 = vpack.c.bf16 %v117_v31, %v115_v30  ;;  %v114_v37 = vld [vmem:[%s8790_s1 + $0x100] sm:$0xff] }
  0x18   :  { %v116_v38 = vld [vmem:[%s8790_s1 + $0x110] sm:$0xff]  ;;  %v5141_v39 = vld [vmem:[%s8790_s1 + $0x340] sm:$0xff]  ;;  %v6088_v40 = vpack.c.bf16 %v5144_v33, %v5142_v32  ;;  %v119_v42 = vld [vmem:[%s8790_s1 + $0x128] sm:$0xff] }
  0x19   :  { %6007 = vmatpush1.bf16.msra.mxu0 %v6006_v10  ;;  %v5143_v41 = vld [vmem:[%s8790_s1 + $0x350] sm:$0xff]  ;;  %v121_v43 = vld [vmem:[%s8790_s1 + $0x138] sm:$0xff]  ;;  %v5146_v44 = vld [vmem:[%s8790_s1 + $0x368] sm:$0xff]  ;;  %v6018_v46 = vpack.c.bf16 %v116_v38, %v114_v37 }
  0x1a   :  { %6079 = vmatpush1.bf16.msra.mxu1 %v6078_v11  ;;  %6009 = vmatprep.subr.bf16.mxu0 %v6008_v12  ;;  %v5148_v45 = vld [vmem:[%s8790_s1 + $0x378] sm:$0xff]  ;;  %v6090_v47 = vpack.c.bf16 %v5143_v41, %v5141_v39  ;;  %v6020_v48 = vpack.c.bf16 %v121_v43, %v119_v42  ;;  %v118_v49 = vld [vmem:[%s8790_s1 + $0x120] sm:$0xff]  ;;  %v120_v50 = vld [vmem:[%s8790_s1 + $0x130] sm:$0xff] }
  0x1b   :  { %6081 = vmatprep.subr.bf16.mxu1 %v6080_v16  ;;  %v5145_v51 = vld [vmem:[%s8790_s1 + $0x360] sm:$0xff]  ;;  %v6092_v52 = vpack.c.bf16 %v5148_v45, %v5146_v44  ;;  %v5147_v53 = vld [vmem:[%s8790_s1 + $0x370] sm:$0xff]  ;;  %v123_v54 = vld [vmem:[%s8790_s1 + $0x148] sm:$0xff]  ;;  %v6022_v58 = vpack.c.bf16 %v120_v50, %v118_v49 }
  0x1c   :  { %v125_v55 = vld [vmem:[%s8790_s1 + $0x158] sm:$0xff]  ;;  %v5150_v56 = vld [vmem:[%s8790_s1 + $0x388] sm:$0xff]  ;;  %v6094_v59 = vpack.c.bf16 %v5147_v53, %v5145_v51  ;;  %v122_v61 = vld [vmem:[%s8790_s1 + $0x140] sm:$0xff] }
  0x1d   :  { %6011 = vmatpush1.bf16.msra.mxu0 %v6010_v22  ;;  %v5152_v57 = vld [vmem:[%s8790_s1 + $0x398] sm:$0xff]  ;;  %v6024_v60 = vpack.c.bf16 %v125_v55, %v123_v54  ;;  %v124_v62 = vld [vmem:[%s8790_s1 + $0x150] sm:$0xff]  ;;  %v5149_v63 = vld [vmem:[%s8790_s1 + $0x380] sm:$0xff] }
  0x1e   :  { %6083 = vmatpush1.bf16.msra.mxu1 %v6082_v23  ;;  %6013 = vmatprep.subr.bf16.mxu0 %v6012_v24  ;;  %v6096_v0 = vpack.c.bf16 %v5152_v57, %v5150_v56  ;;  %v5151_v1 = vld [vmem:[%s8790_s1 + $0x390] sm:$0xff]  ;;  %v127_v2 = vld [vmem:[%s8790_s1 + $0x168] sm:$0xff]  ;;  %v129_v3 = vld [vmem:[%s8790_s1 + $0x178] sm:$0xff]  ;;  %v6026_v6 = vpack.c.bf16 %v124_v62, %v122_v61 }
  0x1f   :  { %6085 = vmatprep.subr.bf16.mxu1 %v6084_v28  ;;  %v5154_v4 = vld [vmem:[%s8790_s1 + $0x3a8] sm:$0xff]  ;;  %v5156_v5 = vld [vmem:[%s8790_s1 + $0x3b8] sm:$0xff]  ;;  %v126_v7 = vld [vmem:[%s8790_s1 + $0x160] sm:$0xff]  ;;  %v6098_v8 = vpack.c.bf16 %v5151_v1, %v5149_v63  ;;  %v6028_v9 = vpack.c.bf16 %v129_v3, %v127_v2 }
  0x20   :  { %v128_v10 = vld [vmem:[%s8790_s1 + $0x170] sm:$0xff]  ;;  %v5153_v11 = vld [vmem:[%s8790_s1 + $0x3a0] sm:$0xff]  ;;  %v6100_v13 = vpack.c.bf16 %v5156_v5, %v5154_v4  ;;  %v131_v14 = vld [vmem:[%s8790_s1 + $0x188] sm:$0xff] }
  0x21   :  { %6015 = vmatpush1.bf16.msra.mxu0 %v6014_v34  ;;  %v5155_v12 = vld [vmem:[%s8790_s1 + $0x3b0] sm:$0xff]  ;;  %v133_v15 = vld [vmem:[%s8790_s1 + $0x198] sm:$0xff]  ;;  %v67_v16 = vld [vmem:[%s8791_s2 + $0x8] sm:$0xff]  ;;  %v6030_v19 = vpack.c.bf16 %v128_v10, %v126_v7 }
  0x22   :  { %6087 = vmatpush1.bf16.msra.mxu1 %v6086_v35  ;;  %6017 = vmatprep.subr.bf16.mxu0 %v6016_v36  ;;  %v5158_v17 = vld [vmem:[%s8790_s1 + $0x3c8] sm:$0xff]  ;;  %v5160_v18 = vld [vmem:[%s8790_s1 + $0x3d8] sm:$0xff]  ;;  %v6102_v20 = vpack.c.bf16 %v5155_v12, %v5153_v11  ;;  %v6032_v21 = vpack.c.bf16 %v133_v15, %v131_v14  ;;  %v130_v22 = vld [vmem:[%s8790_s1 + $0x180] sm:$0xff] }
  0x23   :  { %6089 = vmatprep.subr.bf16.mxu1 %v6088_v40  ;;  %251 = vmatprep.mubr.f32.mxu0 %v67_v16  ;;  %v132_v23 = vld [vmem:[%s8790_s1 + $0x190] sm:$0xff]  ;;  %v5157_v24 = vld [vmem:[%s8790_s1 + $0x3c0] sm:$0xff]  ;;  %v6104_v25 = vpack.c.bf16 %v5160_v18, %v5158_v17  ;;  %v135_v27 = vld [vmem:[%s8790_s1 + $0x1a8] sm:$0xff] }
  0x24   :  { %502 = vmatprep.mubr.f32.mxu1 %v67_v16  ;;  %v5159_v26 = vld [vmem:[%s8790_s1 + $0x3d0] sm:$0xff]  ;;  %v137_v28 = vld [vmem:[%s8790_s1 + $0x1b8] sm:$0xff]  ;;  %v5162_v29 = vld [vmem:[%s8790_s1 + $0x3e8] sm:$0xff]  ;;  %v6034_v31 = vpack.c.bf16 %v132_v23, %v130_v22 }
  0x25   :  { %6019 = vmatpush1.bf16.msra.mxu0 %v6018_v46  ;;  %v5164_v30 = vld [vmem:[%s8790_s1 + $0x3f8] sm:$0xff]  ;;  %v6106_v32 = vpack.c.bf16 %v5159_v26, %v5157_v24  ;;  %v6036_v33 = vpack.c.bf16 %v137_v28, %v135_v27  ;;  %v134_v34 = vld [vmem:[%s8790_s1 + $0x1a0] sm:$0xff]  ;;  %v136_v35 = vld [vmem:[%s8790_s1 + $0x1b0] sm:$0xff] }
  0x26   :  { %6091 = vmatpush1.bf16.msra.mxu1 %v6090_v47  ;;  %6021 = vmatprep.subr.bf16.mxu0 %v6020_v48  ;;  %v5161_v36 = vld [vmem:[%s8790_s1 + $0x3e0] sm:$0xff]  ;;  %v6108_v37 = vpack.c.bf16 %v5164_v30, %v5162_v29  ;;  %v5163_v38 = vld [vmem:[%s8790_s1 + $0x3f0] sm:$0xff]  ;;  %v139_v39 = vld [vmem:[%s8790_s1 + $0x1c8] sm:$0xff]  ;;  %v6038_v43 = vpack.c.bf16 %v136_v35, %v134_v34 }
  0x27   :  { %6093 = vmatprep.subr.bf16.mxu1 %v6092_v52  ;;  %v141_v40 = vld [vmem:[%s8790_s1 + $0x1d8] sm:$0xff]  ;;  %v5166_v41 = vld [vmem:[%s8790_s1 + $0x408] sm:$0xff]  ;;  %v6110_v44 = vpack.c.bf16 %v5163_v38, %v5161_v36  ;;  %v138_v46 = vld [vmem:[%s8790_s1 + $0x1c0] sm:$0xff] }
  0x28   :  { %v5168_v42 = vld [vmem:[%s8790_s1 + $0x418] sm:$0xff]  ;;  %v6040_v45 = vpack.c.bf16 %v141_v40, %v139_v39  ;;  %v140_v47 = vld [vmem:[%s8790_s1 + $0x1d0] sm:$0xff]  ;;  %v5165_v48 = vld [vmem:[%s8790_s1 + $0x400] sm:$0xff] }
  0x29   :  { %6023 = vmatpush1.bf16.msra.mxu0 %v6022_v58  ;;  %v6112_v49 = vpack.c.bf16 %v5168_v42, %v5166_v41  ;;  %v5167_v50 = vld [vmem:[%s8790_s1 + $0x410] sm:$0xff]  ;;  %v143_v51 = vld [vmem:[%s8790_s1 + $0x1e8] sm:$0xff]  ;;  %v145_v52 = vld [vmem:[%s8790_s1 + $0x1f8] sm:$0xff]  ;;  %v6042_v55 = vpack.c.bf16 %v140_v47, %v138_v46 }
  0x2a   :  { %6095 = vmatpush1.bf16.msra.mxu1 %v6094_v59  ;;  %6025 = vmatprep.subr.bf16.mxu0 %v6024_v60  ;;  %v5170_v53 = vld [vmem:[%s8790_s1 + $0x428] sm:$0xff]  ;;  %v5172_v54 = vld [vmem:[%s8790_s1 + $0x438] sm:$0xff]  ;;  %v6114_v56 = vpack.c.bf16 %v5167_v50, %v5165_v48  ;;  %v6044_v57 = vpack.c.bf16 %v145_v52, %v143_v51  ;;  %v142_v58 = vld [vmem:[%s8790_s1 + $0x1e0] sm:$0xff] }
  0x2b   :  { %6097 = vmatprep.subr.bf16.mxu1 %v6096_v0  ;;  %v144_v59 = vld [vmem:[%s8790_s1 + $0x1f0] sm:$0xff]  ;;  %v5169_v60 = vld [vmem:[%s8790_s1 + $0x420] sm:$0xff]  ;;  %v6116_v61 = vpack.c.bf16 %v5172_v54, %v5170_v53  ;;  %v147_v63 = vld [vmem:[%s8790_s1 + $0x208] sm:$0xff] }
  0x2c   :  { %v5171_v62 = vld [vmem:[%s8790_s1 + $0x430] sm:$0xff]  ;;  %v149_v0 = vld [vmem:[%s8790_s1 + $0x218] sm:$0xff]  ;;  %v5174_v1 = vld [vmem:[%s8790_s1 + $0x448] sm:$0xff]  ;;  %v6046_v3 = vpack.c.bf16 %v144_v59, %v142_v58 }
  0x2d   :  { %6027 = vmatpush1.bf16.msra.mxu0 %v6026_v6  ;;  %v5176_v2 = vld [vmem:[%s8790_s1 + $0x458] sm:$0xff]  ;;  %v6118_v4 = vpack.c.bf16 %v5171_v62, %v5169_v60  ;;  %v6048_v5 = vpack.c.bf16 %v149_v0, %v147_v63  ;;  %v5173_v7 = vld [vmem:[%s8790_s1 + $0x440] sm:$0xff]  ;;  %v148_v12 = vld [vmem:[%s8790_s1 + $0x210] sm:$0xff] }
  0x2e   :  { %6099 = vmatpush1.bf16.msra.mxu1 %v6098_v8  ;;  %6029 = vmatprep.subr.bf16.mxu0 %v6028_v9  ;;  %v6120_v6 = vpack.c.bf16 %v5176_v2, %v5174_v1  ;;  %v5175_v8 = vld [vmem:[%s8790_s1 + $0x450] sm:$0xff]  ;;  %v5178_v9 = vld [vmem:[%s8790_s1 + $0x468] sm:$0xff]  ;;  %v5180_v10 = vld [vmem:[%s8790_s1 + $0x478] sm:$0xff] }
  0x2f   :  { %6101 = vmatprep.subr.bf16.mxu1 %v6100_v13  ;;  %v146_v11 = vld [vmem:[%s8790_s1 + $0x200] sm:$0xff]  ;;  %v151_v14 = vld [vmem:[%s8790_s1 + $0x228] sm:$0xff]  ;;  %v153_v15 = vld [vmem:[%s8790_s1 + $0x238] sm:$0xff]  ;;  %v6122_v16 = vpack.c.bf16 %v5175_v8, %v5173_v7  ;;  %v6124_v18 = vpack.c.bf16 %v5180_v10, %v5178_v9 }
  0x30   :  { %v66_v13 = vld [vmem:[%s8791_s2] sm:$0xff]  ;;  %v6052_v22 = vpack.c.bf16 %v153_v15, %v151_v14  ;;  %v152_v24 = vld [vmem:[%s8790_s1 + $0x230] sm:$0xff]  ;;  %v73_v26 = vld [vmem:[%s8791_s2 + $0x38] sm:$0xff] }
  0x31   :  { %6031 = vmatpush1.bf16.msra.mxu0 %v6030_v19  ;;  %v70_v17 = vld [vmem:[%s8791_s2 + $0x20] sm:$0xff]  ;;  %v6050_v19 = vpack.c.bf16 %v148_v12, %v146_v11  ;;  %v72_v29 = vld [vmem:[%s8791_s2 + $0x30] sm:$0xff]  ;;  %v617_v34 = vld [vmem:[%s8792_s4 + $0x8] sm:$0xff] }
  0x32   :  { %6103 = vmatpush1.bf16.msra.mxu1 %v6102_v20  ;;  %6033 = vmatprep.subr.bf16.mxu0 %v6032_v21  ;;  %v5177_v20 = vld [vmem:[%s8790_s1 + $0x460] sm:$0xff]  ;;  %v5179_v21 = vld [vmem:[%s8790_s1 + $0x470] sm:$0xff]  ;;  %v633_v36 = vld [vmem:[%s8793_s5 + $0x8] sm:$0xff] }
  0x33   :  { %6105 = vmatprep.subr.bf16.mxu1 %v6104_v25  ;;  %v150_v23 = vld [vmem:[%s8790_s1 + $0x220] sm:$0xff]  ;;  %v69_v25 = vld [vmem:[%s8791_s2 + $0x18] sm:$0xff]  ;;  %v6126_v27 = vpack.c.bf16 %v5179_v21, %v5177_v20  ;;  %v76_v30 = vld [vmem:[%s8791_s2 + $0x50] sm:$0xff] }
  0x34   :  { %v6054_v28 = vpack.c.bf16 %v152_v24, %v150_v23  ;;  %v632_v35 = vld [vmem:[%s8793_s5] sm:$0xff]  ;;  %v68_v38 = vld [vmem:[%s8791_s2 + $0x10] sm:$0xff]  ;;  %v619_v41 = vld [vmem:[%s8792_s4 + $0x18] sm:$0xff] }
  0x35   :  { %6035 = vmatpush1.bf16.msra.mxu0 %v6034_v31  ;;  %v8809_v31 = vmov 0.0|0.0   ;;  %v618_v40 = vld [vmem:[%s8792_s4 + $0x10] sm:$0xff]  ;;  %v7379_v42 = vpack.c.bf16 %v633_v36, %v632_v35  ;;  %v620_v47 = vld [vmem:[%s8792_s4 + $0x20] sm:$0xff]  ;;  %v621_v48 = vld [vmem:[%s8792_s4 + $0x28] sm:$0xff] }
  0x36   :  { %6107 = vmatpush1.bf16.msra.mxu1 %v6106_v32  ;;  %6037 = vmatprep.subr.bf16.mxu0 %v6036_v33  ;;  %v75_v32 = vld [vmem:[%s8791_s2 + $0x48] sm:$0xff]  ;;  %v616_v33 = vld [vmem:[%s8792_s4] sm:$0xff]  ;;  %v7395_v46 = vpack.c.bf16 %v619_v41, %v618_v40  ;;  %v7416_v51 = vpack.c.bf16 %v621_v48, %v620_v47  ;;  %v622_v52 = vld [vmem:[%s8792_s4 + $0x30] sm:$0xff] }
  0x37   :  { %6109 = vmatprep.subr.bf16.mxu1 %v6108_v37  ;;  %v8806_v37 = vmov 0.0   ;;  %v7371_v39 = vpack.c.bf16 %v617_v34, %v616_v33  ;;  %v74_v50 = vld [vmem:[%s8791_s2 + $0x40] sm:$0xff]  ;;  %v623_v53 = vld [vmem:[%s8792_s4 + $0x38] sm:$0xff]  ;;  %v626_v59 = vld [vmem:[%s8792_s4 + $0x50] sm:$0xff] }
  0x38   :  { %8896 = vst [vmem:[#allocation2_spill] sm:$0xff] %v7395_v46  ;;  %8897 = vst [vmem:[#allocation3_spill] sm:$0xff] %v7416_v51  ;;  %v77_v54 = vld [vmem:[%s8791_s2 + $0x58] sm:$0xff]  ;;  %v628_v62 = vld [vmem:[%s8792_s4 + $0x60] sm:$0xff] }
  0x39   :  { %6039 = vmatpush1.bf16.msra.mxu0 %v6038_v43  ;;  %v634_v43 = vld [vmem:[%s8793_s5 + $0x10] sm:$0xff]  ;;  %v627_v60 = vld [vmem:[%s8792_s4 + $0x58] sm:$0xff]  ;;  %v629_v63 = vld [vmem:[%s8792_s4 + $0x68] sm:$0xff] }
  0x3a   :  { %6111 = vmatpush1.bf16.msra.mxu1 %v6110_v44  ;;  %6041 = vmatprep.subr.bf16.mxu0 %v6040_v45  ;;  %v635_v44 = vld [vmem:[%s8793_s5 + $0x18] sm:$0xff]  ;;  %v71_v45 = vld [vmem:[%s8791_s2 + $0x28] sm:$0xff]  ;;  %v7474_v0 = vpack.c.bf16 %v629_v63, %v628_v62  ;;  %v630_v1 = vld [vmem:[%s8792_s4 + $0x70] sm:$0xff] }
  0x3b   :  { %6113 = vmatprep.subr.bf16.mxu1 %v6112_v49  ;;  %v7405_v49 = vpack.c.bf16 %v635_v44, %v634_v43  ;;  %v631_v2 = vld [vmem:[%s8792_s4 + $0x78] sm:$0xff]  ;;  %v640_v40 = vld [vmem:[%s8795_s8] sm:$0xff]  ;;  %v641_v41 = vld [vmem:[%s8795_s8 + $0x8] sm:$0xff] }
  0x3c   :  { %8901 = vst [vmem:[#allocation7_spill] sm:$0xff] %v7474_v0  ;;  %v642_v43 = vld [vmem:[%s8795_s8 + $0x10] sm:$0xff]  ;;  %v7544_v44 = vpack.c.bf16 %v641_v41, %v640_v40  ;;  %v636_v48 = vld [vmem:[%s8796_s7] sm:$0xff] }
  0x3d   :  { %6043 = vmatpush1.bf16.msra.mxu0 %v6042_v55  ;;  %v7435_v55 = vpack.c.bf16 %v623_v53, %v622_v52  ;;  %v638_v53 = vld [vmem:[%s8796_s7 + $0x10] sm:$0xff]  ;;  %v78_v41 = vld [vmem:[%s8798_s3] sm:$0xff] }
  0x3e   :  { %6115 = vmatpush1.bf16.msra.mxu1 %v6114_v56  ;;  %6045 = vmatprep.subr.bf16.mxu0 %v6044_v57  ;;  %v624_v56 = vld [vmem:[%s8792_s4 + $0x40] sm:$0xff]  ;;  %v625_v57 = vld [vmem:[%s8792_s4 + $0x48] sm:$0xff] }
  0x3f   :  { %6117 = vmatprep.subr.bf16.mxu1 %v6116_v61  ;;  %8898 = vst [vmem:[#allocation4_spill] sm:$0xff] %v7435_v55  ;;  %v7449_v58 = vpack.c.bf16 %v625_v57, %v624_v56  ;;  %v7464_v61 = vpack.c.bf16 %v627_v60, %v626_v59 }
  0x41   :  { %6047 = vmatpush1.bf16.msra.mxu0 %v6046_v3  ;;  %8899 = vst [vmem:[#allocation5_spill] sm:$0xff] %v7449_v58  ;;  %8900 = vst [vmem:[#allocation6_spill] sm:$0xff] %v7464_v61  ;;  %v7484_v3 = vpack.c.bf16 %v631_v2, %v630_v1  ;;  %v7589_v2 = vld [vmem:[%s8797_s9] ss:$0 sm:$0xff] }
  0x42   :  { %6119 = vmatpush1.bf16.msra.mxu1 %v6118_v4  ;;  %6049 = vmatprep.subr.bf16.mxu0 %v6048_v5 }
  0x43   :  { %6121 = vmatprep.subr.bf16.mxu1 %v6120_v6  ;;  %8902 = vst [vmem:[#allocation8_spill] sm:$0xff] %v7484_v3 }
  0x44   :  { %252 = vmatmul.mubr.f32.vlgmr.msra.gmra.mrb[0].mxu0 %v66_v13 }
  0x45   :  { %503 = vmatmul.mubr.f32.vlgmr.msra.gmra.mrb[0].mxu1 %v66_v13  ;;  %257 = vmatprep.mubr.f32.mxu0 %v70_v17 }
  0x46   :  { %6123 = vmatpush1.bf16.msra.mxu1 %v6122_v16  ;;  %508 = vmatprep.mubr.f32.mxu1 %v70_v17 }
  0x47   :  { %6125 = vmatprep.subr.bf16.mxu1 %v6124_v18  ;;  %6051 = vmatpush1.bf16.msra.mxu0 %v6050_v19 }
  0x48   :  { %258 = vmatmul.mubr.f32.gmra.mrb[2].mxu0 %v69_v25  ;;  %6053 = vmatprep.subr.bf16.mxu0 %v6052_v22  ;;  %v7527_v22 = vld [vmem:[%s8794_s6] ss:$0 sm:$0xff] }
  0x49   :  { %509 = vmatmul.mubr.f32.gmra.mrb[2].mxu1 %v69_v25  ;;  %263 = vmatprep.mubr.f32.mxu0 %v73_v26 }
  0x4a   :  { %514 = vmatprep.mubr.f32.mxu1 %v73_v26  ;;  %6127 = vmatpush1.bf16.msra.mxu1 %v6126_v27 }
  0x4b   :  { %6055 = vmatpush1.bf16.msra.mxu0 %v6054_v28  ;;  %6134 = vmatprep.subr.bf16.mxu1 %v8809_v31 }
  0x4c   :  { %264 = vmatmul.mubr.f32.gmra.mrb[4].mxu0 %v72_v29  ;;  %6128 = vmatprep.subr.bf16.mxu0 %v8809_v31 }
  0x4d   :  { %515 = vmatmul.mubr.f32.gmra.mrb[4].mxu1 %v72_v29  ;;  %269 = vmatprep.mubr.f32.mxu0 %v76_v30 }
  0x4e   :  { %520 = vmatprep.mubr.f32.mxu1 %v76_v30 }
  0x50   :  { %270 = vmatmul.mubr.f32.gmra.mrb[6].mxu0 %v75_v32 }
  0x51   :  { %521 = vmatmul.mubr.f32.gmra.mrb[6].mxu1 %v75_v32  ;;  %340 = vmatprep.mubr.f32.mxu0 %v8806_v37 }
  0x52   :  { %591 = vmatprep.mubr.f32.mxu1 %v8806_v37 }
  0x54   :  { %5105 = vmatmul.mubr.msk.f32.vlgmr.msra.gmra.mrb[0].mxu0 %vm174_vm0, %v68_v38 }
  0x55   :  { %5181 = vmatmul.mubr.msk.f32.vlgmr.msra.gmra.mrb[0].mxu1 %vm174_vm0, %v68_v38  ;;  %346 = vmatprep.mubr.f32.mxu0 %v8806_v37 }
  0x56   :  { %6136 = vmatpush3.bf16.msra.mxu1 %v7371_v39  ;;  %597 = vmatprep.mubr.f32.mxu1 %v8806_v37 }
  0x57   :  { %6137 = vmatprep.subr.bf16.mxu1 %v8809_v31  ;;  %6130 = vmatpush3.bf16.msra.mxu0 %v7379_v42 }
  0x58   :  { %5106 = vmatmul.mubr.msk.f32.gmra.mrb[2].mxu0 %vm174_vm0, %v71_v45  ;;  %6131 = vmatprep.subr.bf16.mxu0 %v8809_v31 }
  0x59   :  { %5182 = vmatmul.mubr.msk.f32.gmra.mrb[2].mxu1 %vm174_vm0, %v71_v45  ;;  %352 = vmatprep.mubr.f32.mxu0 %v8806_v37  ;;  %v643_v45 = vld [vmem:[%s8795_s8 + $0x18] sm:$0xff] }
  0x5a   :  { %6139 = vmatpush3.bf16.msra.mxu1 %v7395_v46  ;;  %603 = vmatprep.mubr.f32.mxu1 %v8806_v37  ;;  %v7550_v47 = vpack.c.bf16 %v643_v45, %v642_v43  ;;  %v81_v43 = vld [vmem:[%s8798_s3 + $0x18] sm:$0xff]  ;;  %v644_v45 = vld [vmem:[%s8799_s10] sm:$0xff] }
  0x5b   :  { %6140 = vmatprep.subr.bf16.mxu1 %v8809_v31  ;;  %6133 = vmatpush3.bf16.msra.mxu0 %v7405_v49 }
  0x5c   :  { %5107 = vmatmul.mubr.msk.f32.gmra.mrb[4].mxu0 %vm174_vm0, %v74_v50  ;;  %6158 = vmatprep.subr.bf16.mxu0 %v8809_v31 }
  0x5d   :  { %5183 = vmatmul.mubr.msk.f32.gmra.mrb[4].mxu1 %vm174_vm0, %v74_v50  ;;  %358 = vmatprep.mubr.f32.mxu0 %v8806_v37  ;;  %v637_v50 = vld [vmem:[%s8796_s7 + $0x8] sm:$0xff] }
  0x5e   :  { %6142 = vmatpush3.bf16.msra.mxu1 %v7416_v51  ;;  %609 = vmatprep.mubr.f32.mxu1 %v8806_v37  ;;  %v7560_v52 = vpack.c.bf16 %v637_v50, %v636_v48  ;;  %v645_v48 = vld [vmem:[%s8799_s10 + $0x8] sm:$0xff]  ;;  %v646_v50 = vld [vmem:[%s8799_s10 + $0x10] sm:$0xff] }
  0x5f   :  { %6143 = vmatprep.subr.bf16.mxu1 %v8809_v31 }
  0x60   :  { %5108 = vmatmul.mubr.msk.f32.gmra.mrb[6].mxu0 %vm174_vm0, %v77_v54 }
  0x61   :  { %5184 = vmatmul.mubr.msk.f32.gmra.mrb[6].mxu1 %vm174_vm0, %v77_v54  ;;  %5487 = vmatprep.mubr.msk.f32.mxu0 %vm6810_vm1, %v8806_v37  ;;  %v639_v54 = vld [vmem:[%s8796_s7 + $0x18] sm:$0xff] }
  0x62   :  { %6145 = vmatpush3.bf16.msra.mxu1 %v7435_v55  ;;  %5522 = vmatprep.mubr.msk.f32.mxu1 %vm6810_vm1, %v8806_v37  ;;  %v7572_v57 = vpack.c.bf16 %v639_v54, %v638_v53  ;;  %v7613_v53 = vpack.c.bf16 %v645_v48, %v644_v45  ;;  %v647_v54 = vld [vmem:[%s8799_s10 + $0x18] sm:$0xff]  ;;  %v678_v48 = vld [vmem:[%s8800_s11 + $0x8] sm:$0xff] }
  0x63   :  { %6146 = vmatprep.subr.bf16.mxu1 %v8809_v31 }
  0x64   :  { %5488 = vmatmul.mubr.f32.vlgmr.msra.gmra.mrb[8].mxu0 %v8806_v37 }
  0x65   :  { %5533 = vmatprep.mubr.msk.f32.mxu0 %vm6810_vm1, %v8806_v37  ;;  %6160 = vmatpush3.bf16.msra.mxu0 %v7544_v44 }
  0x66   :  { %6148 = vmatpush3.bf16.msra.mxu1 %v7449_v58  ;;  %6161 = vmatprep.subr.bf16.mxu0 %v8809_v31 }
  0x67   :  { %6149 = vmatprep.subr.bf16.mxu1 %v8809_v31 }
  0x69   :  { %6163 = vmatpush3.bf16.msra.mxu0 %v7550_v47 }
  0x6a   :  { %6151 = vmatpush3.bf16.msra.mxu1 %v7464_v61  ;;  %6164 = vmatprep.subr.bf16.mxu0 %v8809_v31 }
  0x6b   :  { %6152 = vmatprep.subr.bf16.mxu1 %v8809_v31 }
  0x6c   :  { %5534 = vmatmul.mubr.f32.vlgmr.msra.gmra.mrb[10].mxu0 %v8806_v37 }
  0x6d   :  { %6166 = vmatpush3.bf16.msra.mxu0 %v7560_v52  ;;  %5544 = vmatprep.mubr.msk.f32.mxu0 %vm6810_vm1, %v8806_v37 }
  0x6e   :  { %6154 = vmatpush3.bf16.msra.mxu1 %v7474_v0  ;;  %6167 = vmatprep.subr.bf16.mxu0 %v8809_v31 }
  0x6f   :  { %6155 = vmatprep.subr.bf16.mxu1 %v8809_v31 }
  0x71   :  { %6169 = vmatpush3.bf16.msra.mxu0 %v7572_v57 }
  0x72   :  { %6157 = vmatpush3.bf16.msra.mxu1 %v7484_v3  ;;  %6170 = vmatprep.subr.bf16.mxu0 %v8809_v31 }
  0x73   :  { %6176 = vmatprep.subr.bf16.mxu1 %v8809_v31 }
  0x75   :  { %5523 = vmatmul.mubr.f32.vlgmr.msra.gmra.mrb[8].mxu1 %v8806_v37 }
  0x76   :  { %5566 = vmatprep.mubr.msk.f32.mxu1 %vm6810_vm1, %v8806_v37 }
 0x127   :  { %v7492_v4 = vpop.f32.mrb[0].mxu0 }
 0x128   :  { %v7494_v5 = vpop.f32.mrb[0].mxu1  ;;  %v7496_v6 = vpop.f32.mrb[1].mxu0 }
 0x129   :  { %v7498_v7 = vpop.f32.mrb[1].mxu1 }
 0x12b   :  { %v7500_v8 = vpop.f32.mrb[2].mxu0 }
 0x12c   :  { %v7502_v9 = vpop.f32.mrb[2].mxu1  ;;  %v7504_v10 = vpop.f32.mrb[3].mxu0 }
 0x12d   :  { %v7506_v11 = vpop.f32.mrb[3].mxu1 }
 0x12f   :  { %v7508_v12 = vpop.f32.mrb[4].mxu0 }
 0x130   :  { %v7510_v13 = vpop.f32.mrb[4].mxu1  ;;  %v7512_v14 = vpop.f32.mrb[5].mxu0 }
 0x131   :  { %v7514_v15 = vpop.f32.mrb[5].mxu1 }
 0x133   :  { %v7516_v16 = vpop.f32.mrb[6].mxu0 }
 0x134   :  { %v7518_v17 = vpop.f32.mrb[6].mxu1  ;;  %v7520_v18 = vpop.f32.mrb[7].mxu0 }
 0x135   :  { %v7522_v19 = vpop.f32.mrb[7].mxu1 }
 0x137   :  { %v772_v20 = vpop.f32.mrb[8].mxu0 }
 0x138   :  { %v5489_v21 = vpop.f32.mrb[9].mxu0 }
 0x13f   :  { %v937_v62 = vpop.f32.mrb[10].mxu0 }
 0x140   :  { %v5535_v63 = vpop.f32.mrb[11].mxu0 }
 0x141   :  { %v80_v63 = vld [vmem:[%s8798_s3 + $0x10] sm:$0xff] }
 0x148   :  { %v842_v23 = vpop.f32.mrb[8].mxu1 }
 0x149   :  { %v843_v24 = vadd.f32 %v842_v23, %v772_v20  ;;  %v5524_v25 = vpop.f32.mrb[9].mxu1 }
 0x14b   :  { %v846_v26 = vadd.f32 %v7527_v22, %v843_v24 }
 0x14d   :  { %6470 = vtanh.f32 %v846_v26  ;;  %v5188_v28 = vmul.f32 -1.442695, %v846_v26 }
 0x14f   :  { %6472 = vpow2.f32 %v5188_v28 }
 0x157   :  { %v6471_v27 = vpop.eup %6470 }
 0x158   :  { %856 = vrot.lane.b32.xlu0 %v6471_v27, %s6811_s19 }
 0x159   :  { %v6473_v29 = vpop.eup %6472 }
 0x15a   :  { %v850_v30 = vadd.f32 1.0, %v6473_v29 }
 0x15c   :  { %6474 = vrcp.f32 %v850_v30 }
 0x166   :  { %v6475_v32 = vpop.eup %6474 }
 0x167   :  { %v854_v35 = vmul.f32 0.0, %v6475_v32 }
 0x1ca   :  { %v857_v33 = vpop.permute.xlu0 %856 }
 0x1cb   :  { %v859_v34 = vmul.f32 %v6475_v32, %v857_v33  ;;  %v6813_v33 = vmov 0  }
 0x1cc   :  { %6468 = vset.pattern.permute.xlu0 %v6813_v33  ;;  %6469 = vset.pattern.permute.xlu1 %v6813_v33 }
 0x1cd   :  { %861 = vrot.lane.b32.xlu0 %v859_v34, %s6812_s20 }
 0x23f   :  { %v862_v36 = vpop.permute.xlu0 %861 }
 0x240   :  { %v7532_v38 = vadd.f32 %v862_v36, %v854_v35 }
 0x242   :  { %6476 = vtanh.f32 %v7532_v38 }
 0x24c   :  { %v6477_v56 = vpop.eup %6476 }
 0x24d   :  { %867 = vrot.lane.b32.xlu1 %v6477_v56, %s6811_s19  ;;  %v7619_v56 = vpack.c.bf16 %v647_v54, %v646_v50  ;;  %v679_v50 = vld [vmem:[%s8800_s11 + $0x10] sm:$0xff]  ;;  %v680_v54 = vld [vmem:[%s8800_s11 + $0x18] sm:$0xff] }
 0x24f   :  { %8903 = vst [vmem:[#allocation9_spill] sm:$0xff] %v7619_v56 }
 0x2bf   :  { %v868_v59 = vpop.permute.xlu1 %867 }
 0x2c0   :  { %v870_v60 = vmul.f32 %v6475_v32, %v868_v59 }
 0x2c2   :  { %942 = vrot.lane.b32.xlu1 %v870_v60, %s6812_s20 }
 0x334   :  { %v7580_v1 = vpop.permute.xlu1 %942 }
 0x335   :  { %5545 = vmatmul.mubr.msk.f32.vlgmr.msra.gmra.mrb[12].mxu0 %vm174_vm0, %v7580_v1 }
 0x336   :  { %5555 = vmatprep.mubr.msk.f32.mxu0 %vm6810_vm1, %v8806_v37  ;;  %6172 = vmatpush3.bf16.msra.mxu0 %v7613_v53 }
 0x337   :  { %6173 = vmatprep.subr.bf16.mxu0 %v8809_v31 }
 0x33a   :  { %6175 = vmatpush3.bf16.msra.mxu0 %v7619_v56 }
 0x33b   :  { %6182 = vmatprep.subr.bf16.mxu0 %v8809_v31 }
 0x408   :  { %v1012_v20 = vpop.f32.mrb[12].mxu0 }
 0x409   :  { %v1013_v21 = vadd.f32 %v1012_v20, %v937_v62  ;;  %v5546_v23 = vpop.f32.mrb[13].mxu0  ;;  %v79_v62 = vld [vmem:[%s8798_s3 + $0x8] sm:$0xff]  ;;  %v677_v20 = vld [vmem:[%s8800_s11] sm:$0xff] }
 0x40a   :  { %v649_v23 = vld [vmem:[%s8801_s12 + $0x8] sm:$0xff] }
 0x40b   :  { %v1016_v24 = vadd.f32 %v7589_v2, %v1013_v21  ;;  %v648_v21 = vld [vmem:[%s8801_s12] sm:$0xff] }
 0x40d   :  { %6478 = vtanh.f32 %v1016_v24  ;;  %v5190_v26 = vmul.f32 -1.442695, %v1016_v24  ;;  %v7640_v24 = vpack.c.bf16 %v649_v23, %v648_v21 }
 0x40f   :  { %6480 = vpow2.f32 %v5190_v26  ;;  %v651_v26 = vld [vmem:[%s8801_s12 + $0x18] sm:$0xff] }
 0x417   :  { %v6479_v25 = vpop.eup %6478 }
 0x418   :  { %1026 = vrot.lane.b32.xlu0 %v6479_v25, %s6811_s19  ;;  %v650_v25 = vld [vmem:[%s8801_s12 + $0x10] sm:$0xff] }
 0x419   :  { %v6481_v27 = vpop.eup %6480 }
 0x41a   :  { %v1020_v28 = vadd.f32 1.0, %v6481_v27 }
 0x41c   :  { %6482 = vrcp.f32 %v1020_v28  ;;  %v7653_v28 = vpack.c.bf16 %v651_v26, %v650_v25 }
 0x426   :  { %v6483_v29 = vpop.eup %6482 }
 0x427   :  { %v1024_v34 = vmul.f32 0.0, %v6483_v29 }
 0x48a   :  { %v1027_v30 = vpop.permute.xlu0 %1026 }
 0x48b   :  { %v1029_v32 = vmul.f32 %v6483_v29, %v1027_v30 }
 0x48d   :  { %1031 = vrot.lane.b32.xlu1 %v1029_v32, %s6812_s20 }
 0x4ff   :  { %v1032_v35 = vpop.permute.xlu1 %1031 }
 0x500   :  { %v7594_v36 = vadd.f32 %v1032_v35, %v1024_v34 }
 0x502   :  { %6484 = vtanh.f32 %v7594_v36 }
 0x50c   :  { %v6485_v40 = vpop.eup %6484 }
 0x50d   :  { %1037 = vrot.lane.b32.xlu0 %v6485_v40, %s6811_s19 }
 0x511   :  { %156 = vperm.xlu0 %6468, %v78_v41  }
 0x515   :  { %171 = vperm.xlu0 %6468, %v81_v43  }
 0x57f   :  { %v1038_v59 = vpop.permute.xlu0 %1037 }
 0x580   :  { %v1040_v60 = vmul.f32 %v6483_v29, %v1038_v59  ;;  %v8808_v29 = vlaneseq }
 0x582   :  { %1042 = vrot.lane.b32.xlu1 %v1040_v60, %s6812_s20  ;;  %v7681_v30 = vshrl.u32 %v8808_v29, 7 }
 0x584   :  { %v7684_v32 = vsub.s32 0, %v7681_v30  ;;  %v7688_v35 = vsub.s32 1, %v7681_v30 }
 0x586   :  { %161 = vperm.xlu1 %6469, %v79_v62   ;;  %8904 = vst [vmem:[#allocation10_spill] sm:$0xff] %v7688_v35 }
 0x58a   :  { %166 = vperm.xlu1 %6469, %v80_v63  }
 0x58e   :  { %683 = vperm.xlu1 %6469, %v677_v20  }
 0x590   :  { %v157_v60 = vpop.permute.xlu0 %156 }
 0x591   :  { %v7731_v29 = vadd.f32 %v7498_v7, %v157_v60 }
 0x593   :  { %8913 = vst [vmem:[#allocation19_spill] sm:$0xff] %v7731_v29 }
 0x594   :  { %v172_v20 = vpop.permute.xlu0 %171 }
 0x5f4   :  { %v7648_v27 = vpop.permute.xlu1 %1042 }
 0x5f5   :  { %5556 = vmatmul.mubr.msk.f32.vlgmr.msra.gmra.mrb[14].mxu0 %vm174_vm0, %v7648_v27 }
 0x5f6   :  { %6184 = vmatpush3.bf16.msra.mxu0 %v7640_v24  ;;  %5577 = vmatprep.mubr.msk.f32.mxu0 %vm6810_vm1, %v8806_v37 }
 0x5f7   :  { %6185 = vmatprep.subr.bf16.mxu0 %v8809_v31 }
 0x5fa   :  { %6187 = vmatpush3.bf16.msra.mxu0 %v7653_v28 }
 0x5fb   :  { %6194 = vmatprep.subr.bf16.mxu0 %v8809_v31 }
 0x5fd   :  { %5578 = vmatmul.mubr.msk.f32.vlgmr.msra.gmra.mrb[16].mxu0 %vm174_vm0, %v7648_v27 }
 0x5fe   :  { %6196 = vmatpush3.bf16.msra.mxu0 %v7371_v39  ;;  %5623 = vmatprep.mubr.msk.f32.mxu0 %vm6810_vm1, %v8806_v37 }
 0x5ff   :  { %6197 = vmatprep.subr.bf16.mxu0 %v8809_v31 }
 0x602   :  { %6199 = vmatpush3.bf16.msra.mxu0 %v7395_v46 }
 0x603   :  { %6200 = vmatprep.subr.bf16.mxu0 %v8809_v31 }
 0x605   :  { %v162_v59 = vpop.permute.xlu1 %161 }
 0x606   :  { %6202 = vmatpush3.bf16.msra.mxu0 %v7416_v51  ;;  %v7705_v25 = vadd.f32 %v7500_v8, %v162_v59  ;;  %v7708_v26 = vadd.f32 %v7504_v10, %v162_v59  ;;  %v7723_v10 = vadd.f32 %v7506_v11, %v162_v59 }
 0x607   :  { %6203 = vmatprep.subr.bf16.mxu0 %v8809_v31 }
 0x608   :  { %8906 = vst [vmem:[#allocation12_spill] sm:$0xff] %v7705_v25  ;;  %8907 = vst [vmem:[#allocation13_spill] sm:$0xff] %v7708_v26 }
 0x609   :  { %v167_v62 = vpop.permute.xlu1 %166  ;;  %8911 = vst [vmem:[#allocation17_spill] sm:$0xff] %v7723_v10 }
 0x60a   :  { %6205 = vmatpush3.bf16.msra.mxu0 %v7435_v55 }
 0x60b   :  { %6206 = vmatprep.subr.bf16.mxu0 %v8809_v31 }
 0x60d   :  { %v7702_v63 = vpop.permute.xlu1 %683 }
 0x60e   :  { %6208 = vmatpush3.bf16.msra.mxu0 %v7449_v58  ;;  %8905 = vst [vmem:[#allocation11_spill] sm:$0xff] %v7702_v63 }
 0x60f   :  { %6209 = vmatprep.subr.bf16.mxu0 %v8809_v31 }
 0x612   :  { %6211 = vmatpush3.bf16.msra.mxu0 %v7464_v61 }
 0x613   :  { %6212 = vmatprep.subr.bf16.mxu0 %v8809_v31 }
 0x616   :  { %6214 = vmatpush3.bf16.msra.mxu0 %v7474_v0 }
 0x617   :  { %6215 = vmatprep.subr.bf16.mxu0 %v8809_v31 }
 0x61a   :  { %6217 = vmatpush3.bf16.msra.mxu0 %v7484_v3 }
 0x61b   :  { %6242 = vmatprep.subr.bf16.mxu0 %v8809_v31  ;;  %v7735_v31 = vadd.f32 %v7510_v13, %v167_v62 }
 0x61d   :  { %8914 = vst [vmem:[#allocation20_spill] sm:$0xff] %v7735_v31 }
 0x6c8   :  { %v1112_v33 = vpop.f32.mrb[14].mxu0 }
 0x6c9   :  { %v1119_v34 = vrot.slane %v1112_v33, %v7684_v32  ;;  %v5557_v40 = vpop.f32.mrb[15].mxu0  ;;  %v1138_v41 = vrot.slane %v1112_v33, %v7688_v35  ;;  %v7711_v33 = vadd.f32 %v7492_v4, %v157_v60 }
 0x6cb   :  { %1125 = vbcast.lane.b32.xlu0 %v1119_v34, 264  ;;  %1121 = vbcast.lane.b32.xlu1 %v1119_v34, 256  ;;  %8908 = vst [vmem:[#allocation14_spill] sm:$0xff] %v7711_v33 }
 0x6cf   :  { %1144 = vbcast.lane.b32.xlu0 %v1138_v41, 264  ;;  %1140 = vbcast.lane.b32.xlu1 %v1138_v41, 256 }
 0x6d0   :  { %v7691_v43 = vpop.f32.mrb[16].mxu0 }
 0x6d1   :  { %v5579_v45 = vpop.f32.mrb[17].mxu0 }
 0x6d2   :  { %v7715_v45 = vadd.f32 %v7496_v6, %v157_v60 }
 0x6d3   :  { %1148 = vbcast.lane.b32.xlu0 %v1138_v41, 272  ;;  %1129 = vbcast.lane.b32.xlu1 %v1119_v34, 272 }
 0x6d4   :  { %8909 = vst [vmem:[#allocation15_spill] sm:$0xff] %v7715_v45 }
 0x6d7   :  { %1152 = vbcast.lane.b32.xlu0 %v1138_v41, 280  ;;  %1133 = vbcast.lane.b32.xlu1 %v1119_v34, 280 }
 0x6db   :  { %688 = vperm.xlu0 %6468, %v678_v48   ;;  %693 = vperm.xlu1 %6469, %v679_v50   ;;  %v7719_v50 = vadd.f32 %v7502_v9, %v162_v59 }
 0x6dd   :  { %8910 = vst [vmem:[#allocation16_spill] sm:$0xff] %v7719_v50 }
 0x6df   :  { %698 = vperm.xlu0 %6468, %v680_v54   ;;  %v7727_v54 = vadd.f32 %v7494_v5, %v157_v60  ;;  %v7739_v5 = vadd.f32 %v7514_v15, %v167_v62  ;;  %v7747_v60 = vadd.f32 %v7512_v14, %v167_v62  ;;  %v7759_v14 = vadd.f32 %v7516_v16, %v172_v20 }
 0x6e1   :  { %8912 = vst [vmem:[#allocation18_spill] sm:$0xff] %v7727_v54  ;;  %8915 = vst [vmem:[#allocation21_spill] sm:$0xff] %v7739_v5 }
 0x6e2   :  { %8917 = vst [vmem:[#allocation23_spill] sm:$0xff] %v7747_v60  ;;  %8920 = vst [vmem:[#allocation26_spill] sm:$0xff] %v7759_v14 }
 0x73d   :  { %v1126_v21 = vpop.permute.xlu0 %1125  ;;  %v1122_v23 = vpop.permute.xlu1 %1121 }
 0x73e   :  { %v1156_v34 = vadd.f32 %v7705_v25, %v1126_v21  ;;  %v1157_v48 = vadd.f32 %v7708_v26, %v1126_v21  ;;  %v1154_v8 = vadd.f32 %v7711_v33, %v1122_v23  ;;  %v1155_v4 = vadd.f32 %v7715_v45, %v1122_v23 }
 0x73f   :  { %v7743_v23 = vadd.f32 %v7508_v12, %v167_v62 }
 0x740   :  { %6486 = vtanh.f32 %v1156_v34 }
 0x741   :  { %v1145_v40 = vpop.permute.xlu0 %1144  ;;  %v1141_v41 = vpop.permute.xlu1 %1140  ;;  %6488 = vtanh.f32 %v1157_v48  ;;  %8916 = vst [vmem:[#allocation22_spill] sm:$0xff] %v7743_v23  ;;  %v7763_v48 = vadd.f32 %v7520_v18, %v172_v20 }
 0x742   :  { %v1164_v37 = vadd.f32 %v7719_v50, %v1145_v40  ;;  %v1165_v9 = vadd.f32 %v7723_v10, %v1145_v40  ;;  %6490 = vtanh.f32 %v1154_v8  ;;  %v1162_v11 = vadd.f32 %v7727_v54, %v1141_v41 }
 0x743   :  { %6492 = vtanh.f32 %v1155_v4  ;;  %v1163_v59 = vadd.f32 %v7731_v29, %v1141_v41  ;;  %v7751_v40 = vadd.f32 %v7518_v17, %v172_v20  ;;  %v7755_v41 = vadd.f32 %v7522_v19, %v172_v20  ;;  %8921 = vst [vmem:[#allocation27_spill] sm:$0xff] %v7763_v48 }
 0x744   :  { %6494 = vtanh.f32 %v1164_v37 }
 0x745   :  { %v1149_v6 = vpop.permute.xlu0 %1148  ;;  %v1130_v21 = vpop.permute.xlu1 %1129  ;;  %6496 = vtanh.f32 %v1165_v9  ;;  %8918 = vst [vmem:[#allocation24_spill] sm:$0xff] %v7751_v40  ;;  %8919 = vst [vmem:[#allocation25_spill] sm:$0xff] %v7755_v41 }
 0x746   :  { %v1166_v7 = vadd.f32 %v7735_v31, %v1149_v6  ;;  %v1167_v13 = vadd.f32 %v7739_v5, %v1149_v6  ;;  %6498 = vtanh.f32 %v1162_v11  ;;  %v1158_v15 = vadd.f32 %v7743_v23, %v1130_v21 }
 0x747   :  { %6500 = vtanh.f32 %v1163_v59  ;;  %v1159_v37 = vadd.f32 %v7747_v60, %v1130_v21 }
 0x748   :  { %6502 = vtanh.f32 %v1166_v7 }
 0x749   :  { %v1153_v34 = vpop.permute.xlu0 %1152  ;;  %v1134_v12 = vpop.permute.xlu1 %1133  ;;  %6504 = vtanh.f32 %v1167_v13 }
 0x74a   :  { %v1168_v62 = vadd.f32 %v7751_v40, %v1153_v34  ;;  %v1169_v17 = vadd.f32 %v7755_v41, %v1153_v34  ;;  %v6487_v8 = vpop.eup %6486  ;;  %6506 = vtanh.f32 %v1158_v15  ;;  %v1160_v19 = vadd.f32 %v7759_v14, %v1134_v12 }
 0x74b   :  { %v6489_v4 = vpop.eup %6488  ;;  %6508 = vtanh.f32 %v1159_v37  ;;  %v1161_v6 = vadd.f32 %v7763_v48, %v1134_v12 }
 0x74c   :  { %v6491_v9 = vpop.eup %6490  ;;  %6510 = vtanh.f32 %v1168_v62 }
 0x74d   :  { %v6493_v16 = vpop.eup %6492  ;;  %6512 = vtanh.f32 %v1169_v17  ;;  %v1186_v12 = vmul.f32 %v6491_v9, %v7702_v63 }
 0x74e   :  { %v6495_v21 = vpop.eup %6494  ;;  %6514 = vtanh.f32 %v1160_v19  ;;  %v1187_v62 = vmul.f32 %v6493_v16, %v7702_v63 }
 0x74f   :  { %v6497_v11 = vpop.eup %6496  ;;  %6516 = vtanh.f32 %v1161_v6 }
 0x750   :  { %v6499_v18 = vpop.eup %6498 }
 0x751   :  { %v6501_v20 = vpop.eup %6500  ;;  %v1194_v48 = vmul.f32 %v6499_v18, %v7702_v63 }
 0x752   :  { %v6503_v59 = vpop.eup %6502  ;;  %v1195_v41 = vmul.f32 %v6501_v20, %v7702_v63 }
 0x753   :  { %v6505_v7 = vpop.eup %6504 }
 0x754   :  { %v6507_v13 = vpop.eup %6506 }
 0x755   :  { %v6509_v34 = vpop.eup %6508 }
 0x756   :  { %v6511_v37 = vpop.eup %6510 }
 0x757   :  { %v6513_v6 = vpop.eup %6512 }
 0x758   :  { %v6515_v23 = vpop.eup %6514 }
 0x759   :  { %v6517_v29 = vpop.eup %6516 }
 0x75a   :  { %v7768_v15 = vpop.permute.xlu0 %688  ;;  %v7770_v14 = vpop.permute.xlu1 %693 }
 0x75b   :  { %8922 = vst [vmem:[#allocation28_spill] sm:$0xff] %v7768_v15  ;;  %8923 = vst [vmem:[#allocation29_spill] sm:$0xff] %v7770_v14  ;;  %v1188_v17 = vmul.f32 %v6487_v8, %v7768_v15  ;;  %v1189_v19 = vmul.f32 %v6489_v4, %v7768_v15  ;;  %v1196_v40 = vmul.f32 %v6495_v21, %v7768_v15 }
 0x75c   :  { %v1197_v60 = vmul.f32 %v6497_v11, %v7768_v15  ;;  %v1190_v5 = vmul.f32 %v6507_v13, %v7770_v14  ;;  %v1191_v9 = vmul.f32 %v6509_v34, %v7770_v14  ;;  %v1198_v4 = vmul.f32 %v6503_v59, %v7770_v14 }
 0x75d   :  { %v1202_v31 = vadd.f32 %v1188_v17, %v1186_v12  ;;  %v1211_v16 = vadd.f32 %v1189_v19, %v1187_v62  ;;  %v1199_v18 = vmul.f32 %v6505_v7, %v7770_v14  ;;  %v1220_v54 = vadd.f32 %v1196_v40, %v1194_v48 }
 0x75e   :  { %v7782_v8 = vpop.permute.xlu0 %698  ;;  %v1229_v20 = vadd.f32 %v1197_v60, %v1195_v41 }
 0x75f   :  { %v1192_v21 = vmul.f32 %v6515_v23, %v7782_v8  ;;  %v1193_v11 = vmul.f32 %v6517_v29, %v7782_v8  ;;  %v1200_v63 = vmul.f32 %v6511_v37, %v7782_v8  ;;  %v1201_v13 = vmul.f32 %v6513_v6, %v7782_v8 }
 0x760   :  { %v1203_v34 = vadd.f32 %v1202_v31, %v1190_v5  ;;  %v1212_v12 = vadd.f32 %v1211_v16, %v1191_v9  ;;  %v1221_v62 = vadd.f32 %v1220_v54, %v1198_v4  ;;  %v1230_v17 = vadd.f32 %v1229_v20, %v1199_v18 }
 0x762   :  { %v1204_v19 = vadd.f32 %v1203_v34, %v1192_v21  ;;  %v1213_v15 = vadd.f32 %v1212_v12, %v1193_v11  ;;  %v1222_v10 = vadd.f32 %v1221_v62, %v1200_v63  ;;  %v1231_v59 = vadd.f32 %v1230_v17, %v1201_v13 }
 0x764   :  { %v1205_v50 = vrot.slane %v1204_v19, 4  ;;  %v1214_v7 = vrot.slane %v1213_v15, 4  ;;  %v1223_v40 = vrot.slane %v1222_v10, 4  ;;  %v1232_v60 = vrot.slane %v1231_v59, 4 }
 0x766   :  { %v1206_v41 = vadd.f32 %v1205_v50, %v1204_v19  ;;  %v1215_v23 = vadd.f32 %v1214_v7, %v1213_v15  ;;  %v1224_v48 = vadd.f32 %v1223_v40, %v1222_v10  ;;  %v1233_v29 = vadd.f32 %v1232_v60, %v1231_v59 }
 0x768   :  { %v1207_v14 = vrot.slane %v1206_v41, 2  ;;  %v1216_v37 = vrot.slane %v1215_v23, 2  ;;  %v1225_v45 = vrot.slane %v1224_v48, 2  ;;  %v1234_v6 = vrot.slane %v1233_v29, 2 }
 0x76a   :  { %v1208_v31 = vadd.f32 %v1207_v14, %v1206_v41  ;;  %v1217_v5 = vadd.f32 %v1216_v37, %v1215_v23  ;;  %v1226_v54 = vadd.f32 %v1225_v45, %v1224_v48  ;;  %v1235_v9 = vadd.f32 %v1234_v6, %v1233_v29 }
 0x76c   :  { %v1209_v16 = vrot.slane %v1208_v31, 1  ;;  %v1218_v4 = vrot.slane %v1217_v5, 1  ;;  %v1227_v63 = vrot.slane %v1226_v54, 1  ;;  %v1236_v18 = vrot.slane %v1235_v9, 1 }
 0x76e   :  { %v1210_v20 = vadd.f32 %v1209_v16, %v1208_v31  ;;  %v1219_v21 = vadd.f32 %v1218_v4, %v1217_v5  ;;  %v1228_v50 = vadd.f32 %v1227_v63, %v1226_v54  ;;  %v1237_v15 = vadd.f32 %v1236_v18, %v1235_v9 }
 0x770   :  { %v1243_v10 = vsel %vm1242_vm2, %v1228_v50, %v1210_v20  ;;  %v1244_v11 = vsel %vm1242_vm2, %v1237_v15, %v1219_v21 }
 0x771   :  { %v1248_v13 = vsel %vm1247_vm3, %v1243_v10, -inf  ;;  %v1249_v14 = vsel %vm1247_vm3, %v1244_v11, -inf  ;;  %v7806_v11 = vld [vmem:[%s8802_s0 + $0x18] sm:$0xff] }
 0x772   :  { %v1250_v45 = vmax.f32 %v1248_v13, %v1249_v14  ;;  %v7811_v13 = vld [vmem:[%s8802_s0] sm:$0xff]  ;;  %v7816_v14 = vld [vmem:[%s8802_s0 + $0x8] sm:$0xff] }
 0x774   :  { %1251 = vmax.xlane.f32.xlu1 %v1250_v45 }
 0x801   :  { %v1252_v34 = vpop.xlane.xlu1 %1251 }
 0x802   :  { %v1254_v12 = vrot.slane %v1252_v34, 1  ;;  %v1257_v62 = vsub.f32 %v1210_v20, %v1252_v34  ;;  %v1258_v17 = vsub.f32 %v1219_v21, %v1252_v34  ;;  %v7801_v21 = vld [vmem:[%s8802_s0 + $0x10] sm:$0xff] }
 0x804   :  { %v1259_v19 = vsub.f32 %v1228_v50, %v1254_v12  ;;  %v1260_v59 = vsub.f32 %v1237_v15, %v1254_v12  ;;  %v1261_v7 = vmul.f32 1.442695, %v1257_v62  ;;  %v1263_v41 = vmul.f32 1.442695, %v1258_v17  ;;  %v7823_v17 = vld [vmem:[%s8802_s0 + $0x20] sm:$0xff] }
 0x806   :  { %v1265_v40 = vmul.f32 1.442695, %v1259_v19  ;;  %v1267_v60 = vmul.f32 1.442695, %v1260_v59  ;;  %v7828_v19 = vld [vmem:[%s8802_s0 + $0x28] sm:$0xff] }
 0x808   :  { %6518 = vpow2.f32 %v1265_v40 }
 0x809   :  { %6520 = vpow2.f32 %v1267_v60 }
 0x80a   :  { %6522 = vpow2.f32 %v1261_v7 }
 0x80b   :  { %6524 = vpow2.f32 %v1263_v41  ;;  %v7837_v41 = vld [vmem:[%s8802_s0 + $0x50] sm:$0xff] }
 0x80c   :  { %8924 = vst [vmem:[#allocation30_spill] sm:$0xff] %v7837_v41 }
 0x812   :  { %v6519_v23 = vpop.eup %6518 }
 0x813   :  { %v6521_v48 = vpop.eup %6520  ;;  %v1273_v29 = vrot.slane %v6519_v23, 7 }
 0x814   :  { %v6523_v37 = vpop.eup %6522  ;;  %v1275_v6 = vrot.slane %v6521_v48, 7 }
 0x815   :  { %v6525_v31 = vpop.eup %6524  ;;  %v1274_v5 = vsel %vm1242_vm2, %v1273_v29, %v6523_v37 }
 0x816   :  { %v1276_v54 = vsel %vm1242_vm2, %v1275_v6, %v6525_v31  ;;  %v1279_v9 = vsel %vm1247_vm3, %v1274_v5, 0.0 }
 0x817   :  { %v1280_v16 = vsel %vm1247_vm3, %v1276_v54, 0.0  ;;  %v7851_v54 = vld [vmem:[%s8802_s0 + $0x60] sm:$0xff] }
 0x818   :  { %v1281_v4 = vadd.f32 %v1280_v16, %v1279_v9  ;;  %8926 = vst [vmem:[#allocation32_spill] sm:$0xff] %v7851_v54 }
 0x81a   :  { %1282 = vadd.xlane.f32.xlu0 %v1281_v4  ;;  %v7858_v4 = vld [vmem:[%s8802_s0 + $0x68] sm:$0xff] }
 0x81b   :  { %8927 = vst [vmem:[#allocation33_spill] sm:$0xff] %v7858_v4 }
 0x8a7   :  { %v1283_v63 = vpop.xlane.xlu0 %1282 }
 0x8a8   :  { %v1285_v18 = vrot.slane %v1283_v63, 1  ;;  %6526 = vrcp.f32 %v1283_v63  ;;  %v7863_v63 = vld [vmem:[%s8802_s0 + $0x40] sm:$0xff] }
 0x8aa   :  { %6528 = vrcp.f32 %v1285_v18  ;;  %v7868_v18 = vld [vmem:[%s8802_s0 + $0x48] sm:$0xff] }
 0x8b2   :  { %v6527_v20 = vpop.eup %6526 }
 0x8b3   :  { %v1289_v50 = vmul.f32 %v6527_v20, %v6523_v37  ;;  %v1290_v15 = vmul.f32 %v6527_v20, %v6525_v31 }
 0x8b4   :  { %v6529_v10 = vpop.eup %6528 }
 0x8b5   :  { %v1297_v45 = vrot.slane %v1289_v50, %v7684_v32  ;;  %v1301_v34 = vrot.slane %v1290_v15, %v7684_v32  ;;  %v1292_v12 = vmul.f32 %v6529_v10, %v6519_v23  ;;  %v1293_v62 = vmul.f32 %v6529_v10, %v6521_v48  ;;  %v7842_v23 = vld [vmem:[%s8802_s0 + $0x58] sm:$0xff] }
 0x8b6   :  { %8925 = vst [vmem:[#allocation31_spill] sm:$0xff] %v7842_v23 }
 0x8b7   :  { %v1312_v59 = vmul.f32 %v1297_v45, %v7801_v21  ;;  %v1313_v7 = vmul.f32 %v1301_v34, %v7806_v11  ;;  %v1310_v40 = vmul.f32 %v1297_v45, %v7811_v13  ;;  %v1311_v60 = vmul.f32 %v1301_v34, %v7816_v14 }
 0x8b8   :  { %v1305_v48 = vrot.slane %v1292_v12, %v7684_v32  ;;  %v1309_v29 = vrot.slane %v1293_v62, %v7684_v32  ;;  %v1314_v37 = vmul.f32 %v1297_v45, %v7823_v17  ;;  %v1315_v6 = vmul.f32 %v1301_v34, %v7828_v19 }
 0x8b9   :  { %v1329_v31 = vadd.f32 %v1313_v7, %v1312_v59  ;;  %v1326_v5 = vadd.f32 %v1311_v60, %v1310_v40  ;;  %v7877_v59 = vld [vmem:[%s8802_s0 + $0x30] sm:$0xff]  ;;  %v7882_v7 = vld [vmem:[%s8802_s0 + $0x38] sm:$0xff] }
 0x8ba   :  { %v1320_v9 = vmul.f32 %v1305_v48, %v7837_v41  ;;  %v1321_v16 = vmul.f32 %v1309_v29, %v7842_v23  ;;  %v1332_v20 = vadd.f32 %v1315_v6, %v1314_v37  ;;  %v1322_v50 = vmul.f32 %v1305_v48, %v7851_v54  ;;  %8928 = vst [vmem:[#allocation34_spill] sm:$0xff] %v7877_v59  ;;  %v7887_v40 = vld [vmem:[%s8802_s0 + $0x70] sm:$0xff]  ;;  %v7892_v60 = vld [vmem:[%s8802_s0 + $0x78] sm:$0xff] }
 0x8bb   :  { %1330 = vadd.xlane.f32.xlu1 %v1329_v31  ;;  %1327 = vadd.xlane.f32.xlu0 %v1326_v5  ;;  %v1323_v10 = vmul.f32 %v1309_v29, %v7858_v4  ;;  %v1318_v12 = vmul.f32 %v1305_v48, %v7863_v63  ;;  %v1319_v62 = vmul.f32 %v1309_v29, %v7868_v18 }
 0x8bc   :  { %v1341_v15 = vadd.f32 %v1321_v16, %v1320_v9  ;;  %8929 = vst [vmem:[#allocation35_spill] sm:$0xff] %v7882_v7  ;;  %8930 = vst [vmem:[#allocation36_spill] sm:$0xff] %v7887_v40  ;;  %v1316_v37 = vmul.f32 %v1297_v45, %v7877_v59  ;;  %v1317_v6 = vmul.f32 %v1301_v34, %v7882_v7  ;;  %v653_v45 = vld [vmem:[%s8803_s13 + $0x8] sm:$0xff] }
 0x8bd   :  { %8931 = vst [vmem:[#allocation37_spill] sm:$0xff] %v7892_v60  ;;  %v1344_v31 = vadd.f32 %v1323_v10, %v1322_v50  ;;  %v1338_v5 = vadd.f32 %v1319_v62, %v1318_v12  ;;  %v1324_v9 = vmul.f32 %v1305_v48, %v7887_v40  ;;  %v1325_v16 = vmul.f32 %v1309_v29, %v7892_v60  ;;  %v654_v29 = vld [vmem:[%s8803_s13 + $0x10] sm:$0xff] }
 0x8be   :  { %v1335_v54 = vadd.f32 %v1317_v6, %v1316_v37  ;;  %v8933_v48 = vmov 0.0|0.0   ;;  %v8935_v50 = vlaneseq }
 0x8bf   :  { %1342 = vadd.xlane.f32.xlu1 %v1341_v15  ;;  %1333 = vadd.xlane.f32.xlu0 %v1332_v20  ;;  %v1347_v4 = vadd.f32 %v1325_v16, %v1324_v9  ;;  %v652_v20 = vld [vmem:[%s8803_s13] sm:$0xff] }
 0x8c0   :  { %v7904_v34 = vpack.c.bf16 %v653_v45, %v652_v20  ;;  %v7919_v15 = vand.u32 127, %v8935_v50 }
 0x8c2   :  { %8932 = vst [vmem:[#allocation38_spill] sm:$0xff] %v7904_v34  ;;  %6178 = vmatpush3.bf16.msra.mxu1 %v7904_v34  ;;  %v1362_v62 = vadd.s32 4294967288, %v7919_v15  ;;  %v1369_v37 = vadd.s32 4294967280, %v7919_v15  ;;  %v7929_v16 = vsub.s32 %v7919_v15, %v7681_v30 }
 0x8c3   :  { %1345 = vadd.xlane.f32.xlu1 %v1344_v31  ;;  %1339 = vadd.xlane.f32.xlu0 %v1338_v5  ;;  %v1376_v5 = vadd.s32 4294967272, %v7919_v15 }
 0x8c4   :  { %6179 = vmatprep.subr.bf16.mxu1 %v8933_v48  ;;  %v7925_v9 = vsub.s32 %v1362_v62, %v7681_v30  ;;  %v7932_v20 = vsub.s32 %v1369_v37, %v7681_v30 }
 0x8c6   :  { %8936 = vst [vmem:[#allocation40_spill] sm:$0xff] %v7932_v20 }
 0x8c7   :  { %1348 = vadd.xlane.f32.xlu1 %v1347_v4  ;;  %1336 = vadd.xlane.f32.xlu0 %v1335_v54  ;;  %v655_v54 = vld [vmem:[%s8803_s13 + $0x18] sm:$0xff] }
 0x8c8   :  { %v7914_v4 = vpack.c.bf16 %v655_v54, %v654_v29  ;;  %v7935_v54 = vsub.s32 %v1376_v5, %v7681_v30 }
 0x8ca   :  { %8934 = vst [vmem:[#allocation39_spill] sm:$0xff] %v7914_v4  ;;  %6181 = vmatpush3.bf16.msra.mxu1 %v7914_v4 }
 0x8cb   :  { %6188 = vmatprep.subr.bf16.mxu1 %v8933_v48 }
 0x948   :  { %v1331_v10 = vpop.xlane.xlu1 %1330  ;;  %v1328_v12 = vpop.xlane.xlu0 %1327 }
 0x949   :  { %v1366_v50 = vrot.slane %v1331_v10, %v7925_v9  ;;  %v1361_v60 = vrot.slane %v1328_v12, %v7929_v16 }
 0x94b   :  { %v1368_v59 = vsel %vm1367_vm4, %v1366_v50, %v1361_v60 }
 0x94c   :  { %v1343_v6 = vpop.xlane.xlu1 %1342  ;;  %v1334_v31 = vpop.xlane.xlu0 %1333 }
 0x94d   :  { %v1390_v40 = vrot.slane %v1343_v6, %v7925_v9  ;;  %v1373_v23 = vrot.slane %v1334_v31, %v7932_v20 }
 0x94f   :  { %v1375_v6 = vsel %vm1374_vm5, %v1373_v23, %v1368_v59  ;;  %v7978_v59 = vld [vmem:[%s8804_s14] ss:$0 sm:$0xff] }
 0x950   :  { %v1346_v45 = vpop.xlane.xlu1 %1345  ;;  %v1340_v29 = vpop.xlane.xlu0 %1339 }
 0x951   :  { %v1386_v62 = vrot.slane %v1340_v29, %v7929_v16  ;;  %v1395_v41 = vrot.slane %v1346_v45, %v7932_v20 }
 0x953   :  { %v1391_v37 = vsel %vm1367_vm4, %v1390_v40, %v1386_v62  ;;  %v8937_v40 = vmov 0.0  }
 0x954   :  { %v1349_v7 = vpop.xlane.xlu1 %1348  ;;  %v1337_v5 = vpop.xlane.xlu0 %1336  ;;  %v1396_v29 = vsel %vm1374_vm5, %v1395_v41, %v1391_v37 }
 0x955   :  { %v1400_v10 = vrot.slane %v1349_v7, %v7935_v54  ;;  %v1380_v12 = vrot.slane %v1337_v5, %v7935_v54 }
 0x957   :  { %v1401_v31 = vsel %vm1381_vm6, %v1400_v10, %v1396_v29  ;;  %v1382_v45 = vsel %vm1381_vm6, %v1380_v12, %v1375_v6 }
 0x958   :  { %v1402_v20 = vsel %vm1242_vm2, %v1401_v31, %v1382_v45 }
 0x959   :  { %5567 = vmatmul.mubr.msk.f32.vlgmr.msra.gmra.mrb[10].mxu1 %vm174_vm0, %v1402_v20 }
 0x95a   :  { %6190 = vmatpush3.bf16.msra.mxu1 %v7379_v42  ;;  %5588 = vmatprep.mubr.msk.f32.mxu1 %vm6810_vm1, %v8937_v40 }
 0x95b   :  { %6191 = vmatprep.subr.bf16.mxu1 %v8933_v48 }
 0x95e   :  { %6193 = vmatpush3.bf16.msra.mxu1 %v7405_v49 }
 0x95f   :  { %6218 = vmatprep.subr.bf16.mxu1 %v8933_v48 }
 0x961   :  { %5589 = vmatmul.mubr.msk.f32.vlgmr.msra.gmra.mrb[12].mxu1 %vm174_vm0, %v7580_v1  ;;  %v6814_v1 = vmov 1966171168  }
 0x962   :  { %6220 = vmatpush3.bf16.msra.mxu1 %v7544_v44  ;;  %5634 = vmatprep.mubr.msk.f32.mxu1 %vm6810_vm1, %v8937_v40  ;;  %v1548_v41 = vunpack.c.l.s4 %v6814_v1 }
 0x963   :  { %6221 = vmatprep.subr.bf16.mxu1 %v8933_v48 }
 0x964   :  { %v1549_v23 = vunpack.c.0.s8 %v1548_v41 }
 0x966   :  { %6223 = vmatpush3.bf16.msra.mxu1 %v7550_v47  ;;  %v7982_v60 = vsub.s32 %v1549_v23, %v7681_v30 }
 0x967   :  { %6224 = vmatprep.subr.bf16.mxu1 %v8933_v48 }
 0x969   :  { %5635 = vmatmul.mubr.msk.f32.vlgmr.msra.gmra.mrb[14].mxu1 %vm174_vm0, %v7648_v27 }
 0x96a   :  { %6226 = vmatpush3.bf16.msra.mxu1 %v7560_v52  ;;  %5645 = vmatprep.mubr.msk.f32.mxu1 %vm6810_vm1, %v8937_v40 }
 0x96b   :  { %6227 = vmatprep.subr.bf16.mxu1 %v8933_v48 }
 0x96e   :  { %6229 = vmatpush3.bf16.msra.mxu1 %v7572_v57 }
 0x96f   :  { %6230 = vmatprep.subr.bf16.mxu1 %v8933_v48 }
 0xa2c   :  { %v1471_v27 = vpop.f32.mrb[10].mxu1 }
 0xa2d   :  { %v1542_v7 = vadd.f32 %v7691_v43, %v1471_v27  ;;  %v5568_v20 = vpop.f32.mrb[11].mxu1 }
 0xa2f   :  { %v1545_v50 = vadd.f32 %v7978_v59, %v1542_v7 }
 0xa31   :  { %v1553_v62 = vrot.slane %v1545_v50, %v7982_v60  ;;  %v1573_v37 = vsel %vm1247_vm3, %v1545_v50, -inf }
 0xa32   :  { %1574 = vmax.xlane.f32.xlu0 %v1573_v37 }
 0xa33   :  { %v1554_v5 = vcombine.high %v1553_v62, %v1553_v62  ;;  %5194 = vst.sshfl [vmem:[%s8805_s15] sm:$0x1 pattern:$0x73625140] %v1553_v62 }
 0xa34   :  { %v1662_v10 = vpop.f32.mrb[12].mxu1 }
 0xa35   :  { %5195 = vst.sshfl [vmem:[%s8805_s15 + $0x8] sm:$0x1 pattern:$0x73625140] %v1554_v5  ;;  %v5590_v30 = vpop.f32.mrb[13].mxu1 }
 0xa3c   :  { %v1827_v43 = vpop.f32.mrb[14].mxu1 }
 0xa3d   :  { %v5636_v12 = vpop.f32.mrb[15].mxu1 }
 0xabf   :  { %v1575_v6 = vpop.xlane.xlu0 %1574 }
 0xac0   :  { %vm1576_vm7 = vcmp.ge.f32.partialorder %v1545_v50, %v1575_v6  ;;  %v8853_v50 = vmov 1.0  }
 0xac1   :  { %v1577_v29 = vsel %vm1576_vm7, %v7919_v15, 128 }
 0xac2   :  { %v1578_v31 = vsel %vm1247_vm3, %v1577_v29, 2147483647 }
 0xac3   :  { %v1580_v45 = vshra.s32 %v1578_v31, 16  ;;  %v1579_v41 = vand.u32 65535, %v1578_v31 }
 0xac5   :  { %v1582_v1 = vcvt.s32.f32 %v1580_v45  ;;  %v1581_v27 = vcvt.s32.f32 %v1579_v41 }
 0xac7   :  { %1583 = vmin.xlane.f32.xlu1 %v1582_v1 }
 0xb54   :  { %v1584_v23 = vpop.xlane.xlu1 %1583 }
 0xb55   :  { %vm1585_vm8 = vcmp.eq.f32.partialorder %v1582_v1, %v1584_v23  ;;  %v1590_v20 = vcvt.f32.s32 %v1584_v23 }
 0xb56   :  { %v1586_v7 = vsel %vm1585_vm8, %v1581_v27, inf }
 0xb57   :  { %1587 = vmin.xlane.f32.xlu0 %v1586_v7  ;;  %v1591_v37 = vshll.u32 %v1590_v20, 16 }
 0xbe4   :  { %v1588_v62 = vpop.xlane.xlu0 %1587 }
 0xbe5   :  { %v1589_v5 = vcvt.f32.s32 %v1588_v62 }
 0xbe7   :  { %v1592_v30 = vadd.s32 %v1591_v37, %v1589_v5 }
 0xbe9   :  { %vm1593_vm9 = vcmp.eq.s32.totalorder %v7919_v15, %v1592_v30 }
 0xbea   :  { %5624 = vmatmul.mubr.msk.f32.vlgmr.msra.gmra.mrb[18].mxu0 %vm1593_vm9, %v8853_v50 }
 0xbeb   :  { %6244 = vmatpush3.bf16.msra.mxu0 %v7640_v24  ;;  %5678 = vmatprep.mubr.msk.f32.mxu0 %vm6810_vm1, %v8937_v40 }
 0xbec   :  { %6245 = vmatprep.subr.bf16.mxu0 %v8933_v48 }
 0xbef   :  { %6247 = vmatpush3.bf16.msra.mxu0 %v7653_v28 }
 0xbf0   :  { %6254 = vmatprep.subr.bf16.mxu0 %v8933_v48 }
 0xcbd   :  { %v1732_v12 = vpop.f32.mrb[18].mxu0 }
 0xcbe   :  { %v1733_v6 = vadd.f32 %v1732_v12, %v1662_v10  ;;  %v5625_v29 = vpop.f32.mrb[19].mxu0 }
 0xcc0   :  { %v1736_v31 = vadd.f32 %v7527_v22, %v1733_v6 }
 0xcc2   :  { %6530 = vtanh.f32 %v1736_v31  ;;  %v5199_v1 = vmul.f32 -1.442695, %v1736_v31 }
 0xcc4   :  { %6532 = vpow2.f32 %v5199_v1 }
 0xccc   :  { %v6531_v45 = vpop.eup %6530 }
 0xccd   :  { %1746 = vrot.lane.b32.xlu1 %v6531_v45, %s6811_s19 }
 0xcce   :  { %v6533_v41 = vpop.eup %6532 }
 0xccf   :  { %v1740_v23 = vadd.f32 1.0, %v6533_v41 }
 0xcd1   :  { %6534 = vrcp.f32 %v1740_v23 }
 0xcdb   :  { %v6535_v27 = vpop.eup %6534 }
 0xcdc   :  { %v1744_v62 = vmul.f32 %v6535_v27, %v7532_v38 }
 0xd3f   :  { %v1747_v7 = vpop.permute.xlu1 %1746 }
 0xd40   :  { %v1749_v20 = vmul.f32 %v6535_v27, %v1747_v7 }
 0xd42   :  { %1751 = vrot.lane.b32.xlu0 %v1749_v20, %s6812_s20 }
 0xdb4   :  { %v1752_v10 = vpop.permute.xlu0 %1751 }
 0xdb5   :  { %v8007_v37 = vadd.f32 %v1752_v10, %v1744_v62 }
 0xdb7   :  { %6536 = vtanh.f32 %v8007_v37 }
 0xdc1   :  { %v6537_v22 = vpop.eup %6536 }
 0xdc2   :  { %1757 = vrot.lane.b32.xlu1 %v6537_v22, %s6811_s19 }
 0xe34   :  { %v1758_v5 = vpop.permute.xlu1 %1757 }
 0xe35   :  { %v1760_v30 = vmul.f32 %v6535_v27, %v1758_v5 }
 0xe37   :  { %1832 = vrot.lane.b32.xlu1 %v1760_v30, %s6812_s20 }
 0xea9   :  { %v8012_v12 = vpop.permute.xlu1 %1832 }
 0xeaa   :  { %5646 = vmatmul.mubr.msk.f32.vlgmr.msra.gmra.mrb[16].mxu1 %vm174_vm0, %v8012_v12 }
 0xeab   :  { %6232 = vmatpush3.bf16.msra.mxu1 %v7613_v53  ;;  %5656 = vmatprep.mubr.msk.f32.mxu1 %vm6810_vm1, %v8937_v40 }
 0xeac   :  { %6233 = vmatprep.subr.bf16.mxu1 %v8933_v48 }
 0xeaf   :  { %6235 = vmatpush3.bf16.msra.mxu1 %v7619_v56 }
 0xeb0   :  { %6236 = vmatprep.subr.bf16.mxu1 %v8933_v48 }
 0xf7d   :  { %v1902_v38 = vpop.f32.mrb[16].mxu1 }
 0xf7e   :  { %v1903_v6 = vadd.f32 %v1902_v38, %v1827_v43  ;;  %v5647_v29 = vpop.f32.mrb[17].mxu1 }
 0xf80   :  { %v1906_v31 = vadd.f32 %v7589_v2, %v1903_v6 }
 0xf82   :  { %6538 = vtanh.f32 %v1906_v31  ;;  %v5202_v1 = vmul.f32 -1.442695, %v1906_v31 }
 0xf84   :  { %6540 = vpow2.f32 %v5202_v1 }
 0xf8c   :  { %v6539_v45 = vpop.eup %6538 }
 0xf8d   :  { %1916 = vrot.lane.b32.xlu0 %v6539_v45, %s6811_s19 }
 0xf8e   :  { %v6541_v41 = vpop.eup %6540 }
 0xf8f   :  { %v1910_v23 = vadd.f32 1.0, %v6541_v41 }
 0xf91   :  { %6542 = vrcp.f32 %v1910_v23 }
 0xf9b   :  { %v6543_v27 = vpop.eup %6542 }
 0xf9c   :  { %v1914_v62 = vmul.f32 %v6543_v27, %v7594_v36 }
 0xfff   :  { %v1917_v7 = vpop.permute.xlu0 %1916 }
0x1000   :  { %v1919_v20 = vmul.f32 %v6543_v27, %v1917_v7 }
0x1002   :  { %1921 = vrot.lane.b32.xlu1 %v1919_v20, %s6812_s20  ;;  %v8938_v20 = vld [vmem:[#allocation15_spill] sm:$0xff] }
0x1074   :  { %v1922_v43 = vpop.permute.xlu1 %1921 }
0x1075   :  { %v8026_v10 = vadd.f32 %v1922_v43, %v1914_v62 }
0x1077   :  { %6544 = vtanh.f32 %v8026_v10 }
0x1081   :  { %v6545_v2 = vpop.eup %6544 }
0x1082   :  { %1927 = vrot.lane.b32.xlu0 %v6545_v2, %s6811_s19 }
0x10f4   :  { %v1928_v22 = vpop.permute.xlu0 %1927 }
0x10f5   :  { %v1930_v5 = vmul.f32 %v6543_v27, %v1928_v22  ;;  %v8939_v22 = vld [vmem:[#allocation16_spill] sm:$0xff] }
0x10f7   :  { %1932 = vrot.lane.b32.xlu1 %v1930_v5, %s6812_s20 }
0x1169   :  { %v8031_v30 = vpop.permute.xlu1 %1932 }
0x116a   :  { %5657 = vmatmul.mubr.msk.f32.vlgmr.msra.gmra.mrb[18].mxu1 %vm174_vm0, %v8031_v30  ;;  %5679 = vmatmul.mubr.msk.f32.vlgmr.msra.gmra.mrb[20].mxu0 %vm174_vm0, %v8031_v30 }
0x116b   :  { %6238 = vmatpush3.bf16.msra.mxu1 %v7904_v34  ;;  %5667 = vmatprep.mubr.msk.f32.mxu1 %vm6810_vm1, %v8937_v40 }
0x116c   :  { %6239 = vmatprep.subr.bf16.mxu1 %v8933_v48  ;;  %6256 = vmatpush3.bf16.msra.mxu0 %v7371_v39 }
0x116d   :  { %6257 = vmatprep.subr.bf16.mxu0 %v8933_v48  ;;  %5724 = vmatprep.mubr.msk.f32.mxu0 %vm6810_vm1, %v8937_v40 }
0x116f   :  { %6241 = vmatpush3.bf16.msra.mxu1 %v7914_v4 }
0x1170   :  { %6248 = vmatprep.subr.bf16.mxu1 %v8933_v48  ;;  %6259 = vmatpush3.bf16.msra.mxu0 %v7395_v46 }
0x1171   :  { %6260 = vmatprep.subr.bf16.mxu0 %v8933_v48 }
0x1174   :  { %6262 = vmatpush3.bf16.msra.mxu0 %v7416_v51 }
0x1175   :  { %6263 = vmatprep.subr.bf16.mxu0 %v8933_v48 }
0x1178   :  { %6265 = vmatpush3.bf16.msra.mxu0 %v7435_v55 }
0x1179   :  { %6266 = vmatprep.subr.bf16.mxu0 %v8933_v48 }
0x117c   :  { %6268 = vmatpush3.bf16.msra.mxu0 %v7449_v58 }
0x117d   :  { %6269 = vmatprep.subr.bf16.mxu0 %v8933_v48 }
0x1180   :  { %6271 = vmatpush3.bf16.msra.mxu0 %v7464_v61 }
0x1181   :  { %6272 = vmatprep.subr.bf16.mxu0 %v8933_v48 }
0x1184   :  { %6274 = vmatpush3.bf16.msra.mxu0 %v7474_v0 }
0x1185   :  { %6275 = vmatprep.subr.bf16.mxu0 %v8933_v48 }
0x1188   :  { %6277 = vmatpush3.bf16.msra.mxu0 %v7484_v3 }
0x1189   :  { %6302 = vmatprep.subr.bf16.mxu0 %v8933_v48 }
0x123d   :  { %v2002_v36 = vpop.f32.mrb[18].mxu1  ;;  %v8061_v38 = vpop.f32.mrb[20].mxu0 }
0x123e   :  { %v2009_v6 = vrot.slane %v2002_v36, %v7684_v32  ;;  %v5658_v29 = vpop.f32.mrb[19].mxu1  ;;  %v5680_v31 = vpop.f32.mrb[21].mxu0  ;;  %v2028_v45 = vrot.slane %v2002_v36, %v7688_v35  ;;  %v8940_v36 = vld [vmem:[#allocation17_spill] sm:$0xff]  ;;  %v8952_v35 = vld [vmem:[#allocation11_spill] sm:$0xff] }
0x1240   :  { %2015 = vbcast.lane.b32.xlu1 %v2009_v6, 264  ;;  %2011 = vbcast.lane.b32.xlu0 %v2009_v6, 256 }
0x1244   :  { %2034 = vbcast.lane.b32.xlu1 %v2028_v45, 264  ;;  %2030 = vbcast.lane.b32.xlu0 %v2028_v45, 256 }
0x1248   :  { %2038 = vbcast.lane.b32.xlu1 %v2028_v45, 272  ;;  %2019 = vbcast.lane.b32.xlu0 %v2009_v6, 272 }
0x124c   :  { %2042 = vbcast.lane.b32.xlu1 %v2028_v45, 280  ;;  %2023 = vbcast.lane.b32.xlu0 %v2009_v6, 280  ;;  %v8941_v6 = vld [vmem:[#allocation18_spill] sm:$0xff]  ;;  %v8942_v45 = vld [vmem:[#allocation19_spill] sm:$0xff] }
0x12b2   :  { %v2016_v1 = vpop.permute.xlu1 %2015  ;;  %v2012_v41 = vpop.permute.xlu0 %2011 }
0x12b3   :  { %v2046_v23 = vadd.f32 %v7705_v25, %v2016_v1  ;;  %v2047_v27 = vadd.f32 %v7708_v26, %v2016_v1  ;;  %v2044_v7 = vadd.f32 %v7711_v33, %v2012_v41  ;;  %v2045_v62 = vadd.f32 %v8938_v20, %v2012_v41  ;;  %v8943_v41 = vld [vmem:[#allocation20_spill] sm:$0xff]  ;;  %v8945_v26 = vld [vmem:[#allocation22_spill] sm:$0xff] }
0x12b5   :  { %6546 = vtanh.f32 %v2046_v23 }
0x12b6   :  { %6548 = vtanh.f32 %v2047_v27  ;;  %v2035_v43 = vpop.permute.xlu1 %2034  ;;  %v2031_v2 = vpop.permute.xlu0 %2030  ;;  %v8944_v27 = vld [vmem:[#allocation21_spill] sm:$0xff] }
0x12b7   :  { %6550 = vtanh.f32 %v2044_v7  ;;  %v2054_v5 = vadd.f32 %v8939_v22, %v2035_v43  ;;  %v2055_v29 = vadd.f32 %v8940_v36, %v2035_v43  ;;  %v2052_v31 = vadd.f32 %v8941_v6, %v2031_v2  ;;  %v8946_v22 = vld [vmem:[#allocation23_spill] sm:$0xff] }
0x12b8   :  { %6552 = vtanh.f32 %v2045_v62  ;;  %v2053_v50 = vadd.f32 %v8942_v45, %v2031_v2  ;;  %v8947_v2 = vld [vmem:[#allocation24_spill] sm:$0xff] }
0x12b9   :  { %6554 = vtanh.f32 %v2054_v5 }
0x12ba   :  { %6556 = vtanh.f32 %v2055_v29  ;;  %v2039_v1 = vpop.permute.xlu1 %2038  ;;  %v2020_v33 = vpop.permute.xlu0 %2019  ;;  %v8948_v29 = vld [vmem:[#allocation25_spill] sm:$0xff] }
0x12bb   :  { %6558 = vtanh.f32 %v2052_v31  ;;  %v2056_v23 = vadd.f32 %v8943_v41, %v2039_v1  ;;  %v2057_v20 = vadd.f32 %v8944_v27, %v2039_v1  ;;  %v2048_v7 = vadd.f32 %v8945_v26, %v2020_v33  ;;  %v8949_v31 = vld [vmem:[#allocation26_spill] sm:$0xff]  ;;  %v8950_v1 = vld [vmem:[#allocation27_spill] sm:$0xff] }
0x12bc   :  { %6560 = vtanh.f32 %v2053_v50  ;;  %v2049_v25 = vadd.f32 %v8946_v22, %v2020_v33  ;;  %v8951_v22 = vld [vmem:[#allocation28_spill] sm:$0xff] }
0x12bd   :  { %6562 = vtanh.f32 %v2056_v23 }
0x12be   :  { %6564 = vtanh.f32 %v2057_v20  ;;  %v2043_v43 = vpop.permute.xlu1 %2042  ;;  %v2024_v62 = vpop.permute.xlu0 %2023 }
0x12bf   :  { %v6547_v6 = vpop.eup %6546  ;;  %6566 = vtanh.f32 %v2048_v7  ;;  %v2058_v5 = vadd.f32 %v8947_v2, %v2043_v43  ;;  %v2059_v45 = vadd.f32 %v8948_v29, %v2043_v43  ;;  %v2050_v36 = vadd.f32 %v8949_v31, %v2024_v62 }
0x12c0   :  { %v6549_v41 = vpop.eup %6548  ;;  %6568 = vtanh.f32 %v2049_v25  ;;  %v2051_v27 = vadd.f32 %v8950_v1, %v2024_v62  ;;  %v8953_v1 = vld [vmem:[#allocation29_spill] sm:$0xff] }
0x12c1   :  { %v6551_v26 = vpop.eup %6550  ;;  %6570 = vtanh.f32 %v2058_v5  ;;  %v2078_v5 = vmul.f32 %v6547_v6, %v8951_v22 }
0x12c2   :  { %v6553_v50 = vpop.eup %6552  ;;  %6572 = vtanh.f32 %v2059_v45  ;;  %v2076_v45 = vmul.f32 %v6551_v26, %v8952_v35 }
0x12c3   :  { %v6555_v33 = vpop.eup %6554  ;;  %6574 = vtanh.f32 %v2050_v36  ;;  %v2077_v0 = vmul.f32 %v6553_v50, %v8952_v35 }
0x12c4   :  { %v6557_v20 = vpop.eup %6556  ;;  %6576 = vtanh.f32 %v2051_v27  ;;  %v2086_v2 = vmul.f32 %v6555_v33, %v8951_v22  ;;  %v2079_v27 = vmul.f32 %v6549_v41, %v8951_v22  ;;  %v2092_v51 = vadd.f32 %v2078_v5, %v2076_v45 }
0x12c5   :  { %v6559_v23 = vpop.eup %6558  ;;  %v2087_v31 = vmul.f32 %v6557_v20, %v8951_v22 }
0x12c6   :  { %v6561_v7 = vpop.eup %6560  ;;  %v2084_v43 = vmul.f32 %v6559_v23, %v8952_v35  ;;  %v2101_v4 = vadd.f32 %v2079_v27, %v2077_v0 }
0x12c7   :  { %v6563_v29 = vpop.eup %6562  ;;  %v2085_v25 = vmul.f32 %v6561_v7, %v8952_v35 }
0x12c8   :  { %v6565_v62 = vpop.eup %6564  ;;  %v2088_v36 = vmul.f32 %v6563_v29, %v8953_v1  ;;  %v2110_v61 = vadd.f32 %v2086_v2, %v2084_v43 }
0x12c9   :  { %v6567_v3 = vpop.eup %6566  ;;  %v2089_v33 = vmul.f32 %v6565_v62, %v8953_v1  ;;  %v2119_v7 = vadd.f32 %v2087_v31, %v2085_v25 }
0x12ca   :  { %v6569_v23 = vpop.eup %6568  ;;  %v2080_v20 = vmul.f32 %v6567_v3, %v8953_v1  ;;  %v2111_v29 = vadd.f32 %v2110_v61, %v2088_v36 }
0x12cb   :  { %v6571_v58 = vpop.eup %6570  ;;  %v2081_v55 = vmul.f32 %v6569_v23, %v8953_v1  ;;  %v2120_v50 = vadd.f32 %v2119_v7, %v2089_v33 }
0x12cc   :  { %v6573_v6 = vpop.eup %6572  ;;  %v2090_v26 = vmul.f32 %v6571_v58, %v7782_v8  ;;  %v2093_v2 = vadd.f32 %v2092_v51, %v2080_v20 }
0x12cd   :  { %v6575_v46 = vpop.eup %6574  ;;  %v2091_v41 = vmul.f32 %v6573_v6, %v7782_v8  ;;  %v2102_v31 = vadd.f32 %v2101_v4, %v2081_v55 }
0x12ce   :  { %v6577_v35 = vpop.eup %6576  ;;  %v2082_v62 = vmul.f32 %v6575_v46, %v7782_v8  ;;  %v2112_v43 = vadd.f32 %v2111_v29, %v2090_v26 }
0x12cf   :  { %v2083_v3 = vmul.f32 %v6577_v35, %v7782_v8  ;;  %v2121_v25 = vadd.f32 %v2120_v50, %v2091_v41 }
0x12d0   :  { %v2094_v23 = vadd.f32 %v2093_v2, %v2082_v62  ;;  %v2113_v1 = vrot.slane %v2112_v43, 4 }
0x12d1   :  { %v2103_v5 = vadd.f32 %v2102_v31, %v2083_v3  ;;  %v2122_v45 = vrot.slane %v2121_v25, 4 }
0x12d2   :  { %v2095_v58 = vrot.slane %v2094_v23, 4  ;;  %v2114_v61 = vadd.f32 %v2113_v1, %v2112_v43 }
0x12d3   :  { %v2104_v36 = vrot.slane %v2103_v5, 4  ;;  %v2123_v0 = vadd.f32 %v2122_v45, %v2121_v25 }
0x12d4   :  { %v2096_v27 = vadd.f32 %v2095_v58, %v2094_v23  ;;  %v2115_v6 = vrot.slane %v2114_v61, 2 }
0x12d5   :  { %v2105_v33 = vadd.f32 %v2104_v36, %v2103_v5  ;;  %v2124_v7 = vrot.slane %v2123_v0, 2 }
0x12d6   :  { %v2097_v22 = vrot.slane %v2096_v27, 2  ;;  %v2116_v46 = vadd.f32 %v2115_v6, %v2114_v61 }
0x12d7   :  { %v2106_v51 = vrot.slane %v2105_v33, 2  ;;  %v2125_v20 = vadd.f32 %v2124_v7, %v2123_v0 }
0x12d8   :  { %v2098_v26 = vadd.f32 %v2097_v22, %v2096_v27  ;;  %v2117_v35 = vrot.slane %v2116_v46, 1 }
0x12d9   :  { %v2107_v55 = vadd.f32 %v2106_v51, %v2105_v33  ;;  %v2126_v4 = vrot.slane %v2125_v20, 1 }
0x12da   :  { %v2099_v29 = vrot.slane %v2098_v26, 1  ;;  %v2118_v41 = vadd.f32 %v2117_v35, %v2116_v46 }
0x12db   :  { %v2108_v50 = vrot.slane %v2107_v55, 1  ;;  %v2127_v62 = vadd.f32 %v2126_v4, %v2125_v20 }
0x12dc   :  { %v2100_v2 = vadd.f32 %v2099_v29, %v2098_v26 }
0x12dd   :  { %v2109_v1 = vadd.f32 %v2108_v50, %v2107_v55 }
0x12de   :  { %v2132_v43 = vsel %vm1242_vm2, %v2118_v41, %v2100_v2 }
0x12df   :  { %v2133_v3 = vsel %vm1242_vm2, %v2127_v62, %v2109_v1  ;;  %v2136_v31 = vsel %vm1247_vm3, %v2132_v43, -inf }
0x12e0   :  { %v2137_v25 = vsel %vm1247_vm3, %v2133_v3, -inf }
0x12e1   :  { %v2138_v23 = vmax.f32 %v2136_v31, %v2137_v25 }
0x12e3   :  { %2139 = vmax.xlane.f32.xlu0 %v2138_v23 }
0x1370   :  { %v2140_v22 = vpop.xlane.xlu0 %2139 }
0x1371   :  { %v2142_v5 = vrot.slane %v2140_v22, 1  ;;  %v2145_v45 = vsub.f32 %v2100_v2, %v2140_v22  ;;  %v2146_v58 = vsub.f32 %v2109_v1, %v2140_v22 }
0x1373   :  { %v2147_v61 = vsub.f32 %v2118_v41, %v2142_v5  ;;  %v2148_v36 = vsub.f32 %v2127_v62, %v2142_v5  ;;  %v2149_v0 = vmul.f32 1.442695, %v2145_v45  ;;  %v2151_v33 = vmul.f32 1.442695, %v2146_v58 }
0x1375   :  { %v2153_v27 = vmul.f32 1.442695, %v2147_v61  ;;  %v2155_v6 = vmul.f32 1.442695, %v2148_v36 }
0x1377   :  { %6578 = vpow2.f32 %v2153_v27 }
0x1378   :  { %6580 = vpow2.f32 %v2155_v6 }
0x1379   :  { %6582 = vpow2.f32 %v2149_v0 }
0x137a   :  { %6584 = vpow2.f32 %v2151_v33 }
0x1381   :  { %v6579_v7 = vpop.eup %6578 }
0x1382   :  { %v6581_v46 = vpop.eup %6580  ;;  %v2161_v51 = vrot.slane %v6579_v7, 7 }
0x1383   :  { %v6583_v20 = vpop.eup %6582  ;;  %v2163_v26 = vrot.slane %v6581_v46, 7 }
0x1384   :  { %v6585_v35 = vpop.eup %6584  ;;  %v2162_v55 = vsel %vm1242_vm2, %v2161_v51, %v6583_v20 }
0x1385   :  { %v2164_v4 = vsel %vm1242_vm2, %v2163_v26, %v6585_v35  ;;  %v2167_v29 = vsel %vm1247_vm3, %v2162_v55, 0.0  ;;  %v8956_v55 = vld [vmem:[#allocation30_spill] sm:$0xff] }
0x1386   :  { %v2168_v41 = vsel %vm1247_vm3, %v2164_v4, 0.0 }
0x1387   :  { %v2169_v50 = vadd.f32 %v2168_v41, %v2167_v29  ;;  %v8957_v29 = vld [vmem:[#allocation31_spill] sm:$0xff] }
0x1389   :  { %2170 = vadd.xlane.f32.xlu1 %v2169_v50  ;;  %v8958_v50 = vld [vmem:[#allocation32_spill] sm:$0xff] }
0x1416   :  { %v2171_v62 = vpop.xlane.xlu1 %2170 }
0x1417   :  { %v2173_v2 = vrot.slane %v2171_v62, 1  ;;  %6586 = vrcp.f32 %v2171_v62  ;;  %v8959_v62 = vld [vmem:[#allocation33_spill] sm:$0xff] }
0x1419   :  { %6588 = vrcp.f32 %v2173_v2 }
0x1421   :  { %v6587_v1 = vpop.eup %6586 }
0x1422   :  { %v2177_v43 = vmul.f32 %v6587_v1, %v6583_v20  ;;  %v2178_v3 = vmul.f32 %v6587_v1, %v6585_v35  ;;  %v8955_v20 = vld [vmem:[#allocation35_spill] sm:$0xff]  ;;  %v8960_v1 = vld [vmem:[#allocation36_spill] sm:$0xff] }
0x1423   :  { %v6589_v31 = vpop.eup %6588 }
0x1424   :  { %v2180_v25 = vmul.f32 %v6589_v31, %v6579_v7  ;;  %v2181_v23 = vmul.f32 %v6589_v31, %v6581_v46  ;;  %v2185_v22 = vrot.slane %v2177_v43, %v7684_v32  ;;  %v2189_v5 = vrot.slane %v2178_v3, %v7684_v32  ;;  %v8961_v3 = vld [vmem:[#allocation37_spill] sm:$0xff] }
0x1426   :  { %v2202_v45 = vmul.f32 %v2185_v22, %v7823_v17  ;;  %v2203_v58 = vmul.f32 %v2189_v5, %v7828_v19  ;;  %v2198_v61 = vmul.f32 %v2185_v22, %v7811_v13  ;;  %v2199_v36 = vmul.f32 %v2189_v5, %v7816_v14  ;;  %v8954_v19 = vld [vmem:[#allocation34_spill] sm:$0xff] }
0x1427   :  { %v2193_v0 = vrot.slane %v2180_v25, %v7684_v32  ;;  %v2197_v27 = vrot.slane %v2181_v23, %v7684_v32  ;;  %v2200_v7 = vmul.f32 %v2185_v22, %v7801_v21  ;;  %v2201_v46 = vmul.f32 %v2189_v5, %v7806_v11 }
0x1428   :  { %v2220_v6 = vadd.f32 %v2203_v58, %v2202_v45  ;;  %v2214_v33 = vadd.f32 %v2199_v36, %v2198_v61  ;;  %v2204_v13 = vmul.f32 %v2185_v22, %v8954_v19  ;;  %v2205_v14 = vmul.f32 %v2189_v5, %v8955_v20 }
0x1429   :  { %v2206_v51 = vmul.f32 %v2193_v0, %v7863_v63  ;;  %v2207_v17 = vmul.f32 %v2197_v27, %v7868_v18  ;;  %v2217_v26 = vadd.f32 %v2201_v46, %v2200_v7  ;;  %v2208_v4 = vmul.f32 %v2193_v0, %v8956_v55  ;;  %v8962_v46 = vld [vmem:[#allocation40_spill] sm:$0xff] }
0x142a   :  { %2221 = vadd.xlane.f32.xlu1 %v2220_v6  ;;  %2215 = vadd.xlane.f32.xlu0 %v2214_v33  ;;  %v2209_v41 = vmul.f32 %v2197_v27, %v8957_v29  ;;  %v2223_v11 = vadd.f32 %v2205_v14, %v2204_v13  ;;  %v2210_v63 = vmul.f32 %v2193_v0, %v8958_v50 }
0x142b   :  { %v2226_v35 = vadd.f32 %v2207_v17, %v2206_v51  ;;  %v2211_v18 = vmul.f32 %v2197_v27, %v8959_v62  ;;  %v2212_v43 = vmul.f32 %v2193_v0, %v8960_v1  ;;  %v2213_v31 = vmul.f32 %v2197_v27, %v8961_v3 }
0x142c   :  { %v2229_v21 = vadd.f32 %v2209_v41, %v2208_v4 }
0x142d   :  { %v2232_v2 = vadd.f32 %v2211_v18, %v2210_v63  ;;  %v2235_v25 = vadd.f32 %v2213_v31, %v2212_v43 }
0x142e   :  { %2218 = vadd.xlane.f32.xlu0 %v2217_v26  ;;  %2227 = vadd.xlane.f32.xlu1 %v2226_v35 }
0x1432   :  { %2230 = vadd.xlane.f32.xlu0 %v2229_v21  ;;  %2224 = vadd.xlane.f32.xlu1 %v2223_v11 }
0x1436   :  { %2233 = vadd.xlane.f32.xlu0 %v2232_v2 }
0x143a   :  { %2236 = vadd.xlane.f32.xlu0 %v2235_v25 }
0x14b7   :  { %v2222_v23 = vpop.xlane.xlu1 %2221  ;;  %v2216_v22 = vpop.xlane.xlu0 %2215 }
0x14b8   :  { %v2249_v33 = vrot.slane %v2216_v22, %v7929_v16  ;;  %v2258_v19 = vrot.slane %v2222_v23, %v8962_v46 }
0x14bb   :  { %v2219_v5 = vpop.xlane.xlu0 %2218  ;;  %v2228_v45 = vpop.xlane.xlu1 %2227 }
0x14bc   :  { %v2253_v61 = vrot.slane %v2219_v5, %v7925_v9  ;;  %v2268_v51 = vrot.slane %v2228_v45, %v7929_v16 }
0x14be   :  { %v2254_v27 = vsel %vm1367_vm4, %v2253_v61, %v2249_v33  ;;  %v8963_v33 = vmov 1.0  }
0x14bf   :  { %v2231_v58 = vpop.xlane.xlu0 %2230  ;;  %v2225_v36 = vpop.xlane.xlu1 %2224  ;;  %v2259_v26 = vsel %vm1374_vm5, %v2258_v19, %v2254_v27 }
0x14c0   :  { %v2272_v7 = vrot.slane %v2231_v58, %v7925_v9  ;;  %v2263_v17 = vrot.slane %v2225_v36, %v7935_v54 }
0x14c2   :  { %v2273_v20 = vsel %vm1367_vm4, %v2272_v7, %v2268_v51  ;;  %v2264_v55 = vsel %vm1381_vm6, %v2263_v17, %v2259_v26  ;;  %v8186_v51 = vld [vmem:[%s8794_s6] ss:$0 sm:$0xff] }
0x14c3   :  { %v2234_v6 = vpop.xlane.xlu0 %2233 }
0x14c4   :  { %v2277_v0 = vrot.slane %v2234_v6, %v8962_v46 }
0x14c6   :  { %v2278_v35 = vsel %vm1374_vm5, %v2277_v0, %v2273_v20 }
0x14c7   :  { %v2237_v13 = vpop.xlane.xlu0 %2236 }
0x14c8   :  { %v2282_v14 = vrot.slane %v2237_v13, %v7935_v54 }
0x14ca   :  { %v2283_v4 = vsel %vm1381_vm6, %v2282_v14, %v2278_v35 }
0x14cb   :  { %v2284_v29 = vsel %vm1242_vm2, %v2283_v4, %v2264_v55 }
0x14cc   :  { %5668 = vmatmul.mubr.msk.f32.vlgmr.msra.gmra.mrb[20].mxu1 %vm174_vm0, %v2284_v29 }
0x14cd   :  { %6250 = vmatpush3.bf16.msra.mxu1 %v7379_v42  ;;  %5689 = vmatprep.mubr.msk.f32.mxu1 %vm6810_vm1, %v8937_v40 }
0x14ce   :  { %6251 = vmatprep.subr.bf16.mxu1 %v8933_v48 }
0x14d1   :  { %6253 = vmatpush3.bf16.msra.mxu1 %v7405_v49 }
0x14d2   :  { %6278 = vmatprep.subr.bf16.mxu1 %v8933_v48 }
0x14d4   :  { %5690 = vmatmul.mubr.msk.f32.vlgmr.msra.gmra.mrb[22].mxu1 %vm174_vm0, %v8012_v12 }
0x14d5   :  { %6280 = vmatpush3.bf16.msra.mxu1 %v7544_v44  ;;  %5735 = vmatprep.mubr.msk.f32.mxu1 %vm6810_vm1, %v8937_v40 }
0x14d6   :  { %6281 = vmatprep.subr.bf16.mxu1 %v8933_v48 }
0x14d9   :  { %6283 = vmatpush3.bf16.msra.mxu1 %v7550_v47 }
0x14da   :  { %6284 = vmatprep.subr.bf16.mxu1 %v8933_v48 }
0x14dc   :  { %5736 = vmatmul.mubr.msk.f32.vlgmr.msra.gmra.mrb[24].mxu1 %vm174_vm0, %v8031_v30 }
0x14dd   :  { %6286 = vmatpush3.bf16.msra.mxu1 %v7560_v52  ;;  %5746 = vmatprep.mubr.msk.f32.mxu1 %vm6810_vm1, %v8937_v40 }
0x14de   :  { %6287 = vmatprep.subr.bf16.mxu1 %v8933_v48 }
0x14e1   :  { %6289 = vmatpush3.bf16.msra.mxu1 %v7572_v57 }
0x14e2   :  { %6290 = vmatprep.subr.bf16.mxu1 %v8933_v48 }
0x159f   :  { %v2353_v12 = vpop.f32.mrb[20].mxu1 }
0x15a0   :  { %v2424_v41 = vadd.f32 %v8061_v38, %v2353_v12  ;;  %v5669_v21 = vpop.f32.mrb[21].mxu1 }
0x15a2   :  { %v2427_v11 = vadd.f32 %v7978_v59, %v2424_v41 }
0x15a4   :  { %v2435_v50 = vrot.slane %v2427_v11, %v7982_v60  ;;  %v2455_v30 = vsel %vm1247_vm3, %v2427_v11, -inf }
0x15a5   :  { %2456 = vmax.xlane.f32.xlu1 %v2455_v30 }
0x15a6   :  { %v2436_v63 = vcombine.high %v2435_v50, %v2435_v50  ;;  %5206 = vst.sshfl [vmem:[%s8805_s15 + $0x1] sm:$0x1 pattern:$0x73625140] %v2435_v50 }
0x15a7   :  { %v2544_v62 = vpop.f32.mrb[22].mxu1 }
0x15a8   :  { %5207 = vst.sshfl [vmem:[%s8805_s15 + $0x9] sm:$0x1 pattern:$0x73625140] %v2436_v63  ;;  %v5691_v18 = vpop.f32.mrb[23].mxu1 }
0x15af   :  { %v2709_v38 = vpop.f32.mrb[24].mxu1 }
0x15b0   :  { %v5737_v2 = vpop.f32.mrb[25].mxu1 }
0x1632   :  { %v2457_v1 = vpop.xlane.xlu1 %2456 }
0x1633   :  { %vm2458_vm10 = vcmp.ge.f32.partialorder %v2427_v11, %v2457_v1 }
0x1634   :  { %v2459_v59 = vsel %vm2458_vm10, %v7919_v15, 128 }
0x1635   :  { %v2460_v43 = vsel %vm1247_vm3, %v2459_v59, 2147483647 }
0x1636   :  { %v2462_v3 = vshra.s32 %v2460_v43, 16  ;;  %v2461_v25 = vand.u32 65535, %v2460_v43 }
0x1638   :  { %v2464_v31 = vcvt.s32.f32 %v2462_v3  ;;  %v2463_v22 = vcvt.s32.f32 %v2461_v25 }
0x163a   :  { %2465 = vmin.xlane.f32.xlu0 %v2464_v31 }
0x16c7   :  { %v2466_v23 = vpop.xlane.xlu0 %2465 }
0x16c8   :  { %vm2467_vm11 = vcmp.eq.f32.partialorder %v2464_v31, %v2466_v23  ;;  %v2472_v45 = vcvt.f32.s32 %v2466_v23 }
0x16c9   :  { %v2468_v5 = vsel %vm2467_vm11, %v2463_v22, inf }
0x16ca   :  { %2469 = vmin.xlane.f32.xlu1 %v2468_v5  ;;  %v2473_v61 = vshll.u32 %v2472_v45, 16 }
0x1757   :  { %v2470_v58 = vpop.xlane.xlu1 %2469 }
0x1758   :  { %v2471_v36 = vcvt.f32.s32 %v2470_v58 }
0x175a   :  { %v2474_v6 = vadd.s32 %v2473_v61, %v2471_v36  ;;  %v8965_v36 = vld [vmem:[#allocation2_spill] sm:$0xff] }
0x175c   :  { %vm2475_vm12 = vcmp.eq.s32.totalorder %v7919_v15, %v2474_v6  ;;  %v8966_v6 = vld [vmem:[#allocation3_spill] sm:$0xff] }
0x175d   :  { %5725 = vmatmul.mubr.msk.f32.vlgmr.msra.gmra.mrb[22].mxu0 %vm2475_vm12, %v8963_v33 }
0x175e   :  { %6304 = vmatpush3.bf16.msra.mxu0 %v7640_v24  ;;  %5779 = vmatprep.mubr.msk.f32.mxu0 %vm6810_vm1, %v8937_v40 }
0x175f   :  { %6305 = vmatprep.subr.bf16.mxu0 %v8933_v48 }
0x1762   :  { %6307 = vmatpush3.bf16.msra.mxu0 %v7653_v28 }
0x1763   :  { %6314 = vmatprep.subr.bf16.mxu0 %v8933_v48 }
0x1830   :  { %v2614_v7 = vpop.f32.mrb[22].mxu0 }
0x1831   :  { %v2615_v0 = vadd.f32 %v2614_v7, %v2544_v62  ;;  %v5726_v27 = vpop.f32.mrb[23].mxu0  ;;  %v8210_v62 = vld [vmem:[%s8797_s9] ss:$0 sm:$0xff]  ;;  %v8967_v7 = vld [vmem:[#allocation4_spill] sm:$0xff] }
0x1832   :  { %v8969_v27 = vld [vmem:[#allocation6_spill] sm:$0xff] }
0x1833   :  { %v2618_v17 = vadd.f32 %v8186_v51, %v2615_v0  ;;  %v8968_v0 = vld [vmem:[#allocation5_spill] sm:$0xff] }
0x1835   :  { %6590 = vtanh.f32 %v2618_v17  ;;  %v5211_v13 = vmul.f32 -1.442695, %v2618_v17  ;;  %v8970_v17 = vld [vmem:[#allocation7_spill] sm:$0xff] }
0x1837   :  { %6592 = vpow2.f32 %v5211_v13 }
0x183f   :  { %v6591_v19 = vpop.eup %6590 }
0x1840   :  { %2628 = vrot.lane.b32.xlu0 %v6591_v19, %s6811_s19  ;;  %v8971_v19 = vld [vmem:[#allocation8_spill] sm:$0xff] }
0x1841   :  { %v6593_v20 = vpop.eup %6592 }
0x1842   :  { %v2622_v14 = vadd.f32 1.0, %v6593_v20 }
0x1844   :  { %6594 = vrcp.f32 %v2622_v14 }
0x184e   :  { %v6595_v26 = vpop.eup %6594 }
0x184f   :  { %v2626_v4 = vmul.f32 %v6595_v26, %v8007_v37 }
0x18b2   :  { %v2629_v35 = vpop.permute.xlu0 %2628 }
0x18b3   :  { %v2631_v55 = vmul.f32 %v6595_v26, %v2629_v35 }
0x18b5   :  { %2633 = vrot.lane.b32.xlu1 %v2631_v55, %s6812_s20  ;;  %v8972_v55 = vld [vmem:[#allocation10_spill] sm:$0xff] }
0x1927   :  { %v2634_v29 = vpop.permute.xlu1 %2633 }
0x1928   :  { %v8192_v12 = vadd.f32 %v2634_v29, %v2626_v4 }
0x192a   :  { %6596 = vtanh.f32 %v8192_v12 }
0x1934   :  { %v6597_v41 = vpop.eup %6596 }
0x1935   :  { %2639 = vrot.lane.b32.xlu1 %v6597_v41, %s6811_s19 }
0x19a7   :  { %v2640_v21 = vpop.permute.xlu1 %2639 }
0x19a8   :  { %v2642_v11 = vmul.f32 %v6595_v26, %v2640_v21  ;;  %v8973_v21 = vld [vmem:[#allocation12_spill] sm:$0xff] }
0x19aa   :  { %2714 = vrot.lane.b32.xlu0 %v2642_v11, %s6812_s20 }
0x1a1c   :  { %v8197_v50 = vpop.permute.xlu0 %2714 }
0x1a1d   :  { %5747 = vmatmul.mubr.msk.f32.vlgmr.msra.gmra.mrb[26].mxu1 %vm174_vm0, %v8197_v50 }
0x1a1e   :  { %6292 = vmatpush3.bf16.msra.mxu1 %v7613_v53  ;;  %5757 = vmatprep.mubr.msk.f32.mxu1 %vm6810_vm1, %v8937_v40 }
0x1a1f   :  { %6293 = vmatprep.subr.bf16.mxu1 %v8933_v48 }
0x1a22   :  { %6295 = vmatpush3.bf16.msra.mxu1 %v7619_v56 }
0x1a23   :  { %6296 = vmatprep.subr.bf16.mxu1 %v8933_v48 }
0x1af0   :  { %v2784_v37 = vpop.f32.mrb[26].mxu1 }
0x1af1   :  { %v2785_v30 = vadd.f32 %v2784_v37, %v2709_v38  ;;  %v5748_v63 = vpop.f32.mrb[27].mxu1  ;;  %v8974_v37 = vld [vmem:[#allocation13_spill] sm:$0xff] }
0x1af2   :  { %v8975_v63 = vld [vmem:[#allocation14_spill] sm:$0xff] }
0x1af3   :  { %v2788_v18 = vadd.f32 %v8210_v62, %v2785_v30 }
0x1af5   :  { %6598 = vtanh.f32 %v2788_v18  ;;  %v5214_v1 = vmul.f32 -1.442695, %v2788_v18 }
0x1af7   :  { %6600 = vpow2.f32 %v5214_v1 }
0x1aff   :  { %v6599_v2 = vpop.eup %6598 }
0x1b00   :  { %2798 = vrot.lane.b32.xlu1 %v6599_v2, %s6811_s19  ;;  %v8976_v2 = vld [vmem:[#allocation15_spill] sm:$0xff] }
0x1b01   :  { %v6601_v59 = vpop.eup %6600 }
0x1b02   :  { %v2792_v43 = vadd.f32 1.0, %v6601_v59 }
0x1b04   :  { %6602 = vrcp.f32 %v2792_v43 }
0x1b0e   :  { %v6603_v3 = vpop.eup %6602 }
0x1b0f   :  { %v2796_v25 = vmul.f32 %v6603_v3, %v8026_v10  ;;  %v8964_v10 = vld [vmem:[#allocation39_spill] sm:$0xff] }
0x1b72   :  { %v2799_v31 = vpop.permute.xlu1 %2798 }
0x1b73   :  { %v2801_v38 = vmul.f32 %v6603_v3, %v2799_v31 }
0x1b75   :  { %2803 = vrot.lane.b32.xlu0 %v2801_v38, %s6812_s20  ;;  %v8978_v38 = vld [vmem:[#allocation17_spill] sm:$0xff] }
0x1be7   :  { %v2804_v23 = vpop.permute.xlu0 %2803 }
0x1be8   :  { %v8216_v22 = vadd.f32 %v2804_v23, %v2796_v25  ;;  %v8979_v23 = vld [vmem:[#allocation18_spill] sm:$0xff] }
0x1bea   :  { %6604 = vtanh.f32 %v8216_v22 }
0x1bf4   :  { %v6605_v5 = vpop.eup %6604 }
0x1bf5   :  { %2809 = vrot.lane.b32.xlu1 %v6605_v5, %s6811_s19 }
0x1c67   :  { %v2810_v45 = vpop.permute.xlu1 %2809 }
0x1c68   :  { %v2812_v58 = vmul.f32 %v6603_v3, %v2810_v45  ;;  %v8977_v3 = vld [vmem:[#allocation16_spill] sm:$0xff]  ;;  %v8980_v45 = vld [vmem:[#allocation19_spill] sm:$0xff] }
0x1c6a   :  { %2814 = vrot.lane.b32.xlu0 %v2812_v58, %s6812_s20 }
0x1cdc   :  { %v8221_v61 = vpop.permute.xlu0 %2814 }
0x1cdd   :  { %5758 = vmatmul.mubr.msk.f32.vlgmr.msra.gmra.mrb[28].mxu1 %vm174_vm0, %v8221_v61  ;;  %5780 = vmatmul.mubr.msk.f32.vlgmr.msra.gmra.mrb[24].mxu0 %vm174_vm0, %v8221_v61 }
0x1cde   :  { %6298 = vmatpush3.bf16.msra.mxu1 %v7904_v34  ;;  %5768 = vmatprep.mubr.msk.f32.mxu1 %vm6810_vm1, %v8937_v40 }
0x1cdf   :  { %6299 = vmatprep.subr.bf16.mxu1 %v8933_v48  ;;  %6316 = vmatpush3.bf16.msra.mxu0 %v7371_v39 }
0x1ce0   :  { %6317 = vmatprep.subr.bf16.mxu0 %v8933_v48  ;;  %5825 = vmatprep.mubr.msk.f32.mxu0 %vm6810_vm1, %v8937_v40 }
0x1ce2   :  { %6301 = vmatpush3.bf16.msra.mxu1 %v8964_v10 }
0x1ce3   :  { %6308 = vmatprep.subr.bf16.mxu1 %v8933_v48  ;;  %6319 = vmatpush3.bf16.msra.mxu0 %v8965_v36 }
0x1ce4   :  { %6320 = vmatprep.subr.bf16.mxu0 %v8933_v48 }
0x1ce7   :  { %6322 = vmatpush3.bf16.msra.mxu0 %v8966_v6 }
0x1ce8   :  { %6323 = vmatprep.subr.bf16.mxu0 %v8933_v48 }
0x1ceb   :  { %6325 = vmatpush3.bf16.msra.mxu0 %v8967_v7 }
0x1cec   :  { %6326 = vmatprep.subr.bf16.mxu0 %v8933_v48 }
0x1cef   :  { %6328 = vmatpush3.bf16.msra.mxu0 %v8968_v0 }
0x1cf0   :  { %6329 = vmatprep.subr.bf16.mxu0 %v8933_v48 }
0x1cf3   :  { %6331 = vmatpush3.bf16.msra.mxu0 %v8969_v27 }
0x1cf4   :  { %6332 = vmatprep.subr.bf16.mxu0 %v8933_v48 }
0x1cf7   :  { %6334 = vmatpush3.bf16.msra.mxu0 %v8970_v17 }
0x1cf8   :  { %6335 = vmatprep.subr.bf16.mxu0 %v8933_v48 }
0x1cfb   :  { %6337 = vmatpush3.bf16.msra.mxu0 %v8971_v19 }
0x1cfc   :  { %6362 = vmatprep.subr.bf16.mxu0 %v8933_v48 }
0x1db0   :  { %v2884_v13 = vpop.f32.mrb[28].mxu1  ;;  %v8251_v20 = vpop.f32.mrb[24].mxu0 }
0x1db1   :  { %v2891_v14 = vrot.slane %v2884_v13, %v7684_v32  ;;  %v5759_v26 = vpop.f32.mrb[29].mxu1  ;;  %v5781_v35 = vpop.f32.mrb[25].mxu0  ;;  %v2910_v4 = vrot.slane %v2884_v13, %v8972_v55 }
0x1db2   :  { %v8981_v26 = vld [vmem:[#allocation20_spill] sm:$0xff] }
0x1db3   :  { %2897 = vbcast.lane.b32.xlu0 %v2891_v14, 264  ;;  %2893 = vbcast.lane.b32.xlu1 %v2891_v14, 256 }
0x1db7   :  { %2916 = vbcast.lane.b32.xlu0 %v2910_v4, 264  ;;  %2912 = vbcast.lane.b32.xlu1 %v2910_v4, 256 }
0x1dbb   :  { %2920 = vbcast.lane.b32.xlu0 %v2910_v4, 272  ;;  %2901 = vbcast.lane.b32.xlu1 %v2891_v14, 272 }
0x1dbf   :  { %2924 = vbcast.lane.b32.xlu0 %v2910_v4, 280  ;;  %2905 = vbcast.lane.b32.xlu1 %v2891_v14, 280  ;;  %v8982_v4 = vld [vmem:[#allocation21_spill] sm:$0xff] }
0x1e25   :  { %v2898_v29 = vpop.permute.xlu0 %2897  ;;  %v2894_v41 = vpop.permute.xlu1 %2893 }
0x1e26   :  { %v2928_v11 = vadd.f32 %v8973_v21, %v2898_v29  ;;  %v2929_v30 = vadd.f32 %v8974_v37, %v2898_v29  ;;  %v2926_v18 = vadd.f32 %v8975_v63, %v2894_v41  ;;  %v2927_v1 = vadd.f32 %v8976_v2, %v2894_v41  ;;  %v8983_v41 = vld [vmem:[#allocation22_spill] sm:$0xff] }
0x1e28   :  { %6606 = vtanh.f32 %v2928_v11 }
0x1e29   :  { %6608 = vtanh.f32 %v2929_v30  ;;  %v2917_v59 = vpop.permute.xlu0 %2916  ;;  %v2913_v43 = vpop.permute.xlu1 %2912  ;;  %v8984_v30 = vld [vmem:[#allocation23_spill] sm:$0xff] }
0x1e2a   :  { %6610 = vtanh.f32 %v2926_v18  ;;  %v2936_v31 = vadd.f32 %v8977_v3, %v2917_v59  ;;  %v2937_v25 = vadd.f32 %v8978_v38, %v2917_v59  ;;  %v2934_v5 = vadd.f32 %v8979_v23, %v2913_v43  ;;  %v8990_v3 = vld [vmem:[#allocation11_spill] sm:$0xff] }
0x1e2b   :  { %6612 = vtanh.f32 %v2927_v1  ;;  %v2935_v58 = vadd.f32 %v8980_v45, %v2913_v43  ;;  %v8985_v43 = vld [vmem:[#allocation24_spill] sm:$0xff] }
0x1e2c   :  { %6614 = vtanh.f32 %v2936_v31 }
0x1e2d   :  { %6616 = vtanh.f32 %v2937_v25  ;;  %v2921_v13 = vpop.permute.xlu0 %2920  ;;  %v2902_v14 = vpop.permute.xlu1 %2901  ;;  %v8986_v25 = vld [vmem:[#allocation25_spill] sm:$0xff] }
0x1e2e   :  { %6618 = vtanh.f32 %v2934_v5  ;;  %v2938_v35 = vadd.f32 %v8981_v26, %v2921_v13  ;;  %v2939_v29 = vadd.f32 %v8982_v4, %v2921_v13  ;;  %v2930_v11 = vadd.f32 %v8983_v41, %v2902_v14  ;;  %v8987_v5 = vld [vmem:[#allocation26_spill] sm:$0xff]  ;;  %v8988_v13 = vld [vmem:[#allocation27_spill] sm:$0xff] }
0x1e2f   :  { %6620 = vtanh.f32 %v2935_v58  ;;  %v2931_v18 = vadd.f32 %v8984_v30, %v2902_v14  ;;  %v8989_v30 = vld [vmem:[#allocation28_spill] sm:$0xff] }
0x1e30   :  { %6622 = vtanh.f32 %v2938_v35 }
0x1e31   :  { %6624 = vtanh.f32 %v2939_v29  ;;  %v2925_v59 = vpop.permute.xlu0 %2924  ;;  %v2906_v1 = vpop.permute.xlu1 %2905 }
0x1e32   :  { %v6607_v23 = vpop.eup %6606  ;;  %6626 = vtanh.f32 %v2930_v11  ;;  %v2940_v31 = vadd.f32 %v8985_v43, %v2925_v59  ;;  %v2941_v45 = vadd.f32 %v8986_v25, %v2925_v59  ;;  %v2932_v38 = vadd.f32 %v8987_v5, %v2906_v1 }
0x1e33   :  { %v6609_v26 = vpop.eup %6608  ;;  %6628 = vtanh.f32 %v2931_v18  ;;  %v2933_v4 = vadd.f32 %v8988_v13, %v2906_v1  ;;  %v8991_v13 = vld [vmem:[#allocation29_spill] sm:$0xff] }
0x1e34   :  { %v6611_v41 = vpop.eup %6610  ;;  %6630 = vtanh.f32 %v2940_v31  ;;  %v2960_v31 = vmul.f32 %v6607_v23, %v8989_v30 }
0x1e35   :  { %v6613_v58 = vpop.eup %6612  ;;  %6632 = vtanh.f32 %v2941_v45  ;;  %v2958_v45 = vmul.f32 %v6611_v41, %v8990_v3 }
0x1e36   :  { %v6615_v14 = vpop.eup %6614  ;;  %6634 = vtanh.f32 %v2932_v38  ;;  %v2959_v63 = vmul.f32 %v6613_v58, %v8990_v3 }
0x1e37   :  { %v6617_v35 = vpop.eup %6616  ;;  %6636 = vtanh.f32 %v2933_v4  ;;  %v2968_v43 = vmul.f32 %v6615_v14, %v8989_v30  ;;  %v2961_v4 = vmul.f32 %v6609_v26, %v8989_v30  ;;  %v2974_v19 = vadd.f32 %v2960_v31, %v2958_v45 }
0x1e38   :  { %v6619_v29 = vpop.eup %6618  ;;  %v2969_v5 = vmul.f32 %v6617_v35, %v8989_v30 }
0x1e39   :  { %v6621_v11 = vpop.eup %6620  ;;  %v2966_v59 = vmul.f32 %v6619_v29, %v8990_v3  ;;  %v2983_v27 = vadd.f32 %v2961_v4, %v2959_v63 }
0x1e3a   :  { %v6623_v25 = vpop.eup %6622  ;;  %v2967_v18 = vmul.f32 %v6621_v11, %v8990_v3 }
0x1e3b   :  { %v6625_v1 = vpop.eup %6624  ;;  %v2970_v38 = vmul.f32 %v6623_v25, %v8991_v13  ;;  %v2992_v37 = vadd.f32 %v2968_v43, %v2966_v59 }
0x1e3c   :  { %v6627_v2 = vpop.eup %6626  ;;  %v2971_v14 = vmul.f32 %v6625_v1, %v8991_v13  ;;  %v3001_v11 = vadd.f32 %v2969_v5, %v2967_v18 }
0x1e3d   :  { %v6629_v29 = vpop.eup %6628  ;;  %v2962_v35 = vmul.f32 %v6627_v2, %v8991_v13  ;;  %v2993_v41 = vadd.f32 %v2992_v37, %v2970_v38 }
0x1e3e   :  { %v6631_v21 = vpop.eup %6630  ;;  %v2963_v55 = vmul.f32 %v6629_v29, %v8991_v13  ;;  %v3002_v26 = vadd.f32 %v3001_v11, %v2971_v14 }
0x1e3f   :  { %v6633_v23 = vpop.eup %6632  ;;  %v2972_v25 = vmul.f32 %v6631_v21, %v7782_v8  ;;  %v2975_v1 = vadd.f32 %v2974_v19, %v2962_v35 }
0x1e40   :  { %v6635_v17 = vpop.eup %6634  ;;  %v2973_v58 = vmul.f32 %v6633_v23, %v7782_v8  ;;  %v2984_v2 = vadd.f32 %v2983_v27, %v2963_v55 }
0x1e41   :  { %v6637_v3 = vpop.eup %6636  ;;  %v2964_v43 = vmul.f32 %v6635_v17, %v7782_v8  ;;  %v2994_v59 = vadd.f32 %v2993_v41, %v2972_v25 }
0x1e42   :  { %v2965_v5 = vmul.f32 %v6637_v3, %v7782_v8  ;;  %v3003_v18 = vadd.f32 %v3002_v26, %v2973_v58 }
0x1e43   :  { %v2976_v29 = vadd.f32 %v2975_v1, %v2964_v43  ;;  %v2995_v13 = vrot.slane %v2994_v59, 4 }
0x1e44   :  { %v2985_v31 = vadd.f32 %v2984_v2, %v2965_v5  ;;  %v3004_v37 = vrot.slane %v3003_v18, 4 }
0x1e45   :  { %v2977_v45 = vrot.slane %v2976_v29, 4  ;;  %v2996_v21 = vadd.f32 %v2995_v13, %v2994_v59 }
0x1e46   :  { %v2986_v38 = vrot.slane %v2985_v31, 4  ;;  %v3005_v63 = vadd.f32 %v3004_v37, %v3003_v18 }
0x1e47   :  { %v2978_v4 = vadd.f32 %v2977_v45, %v2976_v29  ;;  %v2997_v14 = vrot.slane %v2996_v21, 2 }
0x1e48   :  { %v2987_v11 = vadd.f32 %v2986_v38, %v2985_v31  ;;  %v3006_v23 = vrot.slane %v3005_v63, 2 }
0x1e49   :  { %v2979_v19 = vrot.slane %v2978_v4, 2  ;;  %v2998_v35 = vadd.f32 %v2997_v14, %v2996_v21 }
0x1e4a   :  { %v2988_v17 = vrot.slane %v2987_v11, 2  ;;  %v3007_v41 = vadd.f32 %v3006_v23, %v3005_v63 }
0x1e4b   :  { %v2980_v27 = vadd.f32 %v2979_v19, %v2978_v4  ;;  %v2999_v55 = vrot.slane %v2998_v35, 1 }
0x1e4c   :  { %v2989_v3 = vadd.f32 %v2988_v17, %v2987_v11  ;;  %v3008_v25 = vrot.slane %v3007_v41, 1 }
0x1e4d   :  { %v2981_v26 = vrot.slane %v2980_v27, 1  ;;  %v3000_v58 = vadd.f32 %v2999_v55, %v2998_v35 }
0x1e4e   :  { %v2990_v1 = vrot.slane %v2989_v3, 1  ;;  %v3009_v43 = vadd.f32 %v3008_v25, %v3007_v41 }
0x1e4f   :  { %v2982_v2 = vadd.f32 %v2981_v26, %v2980_v27 }
0x1e50   :  { %v2991_v13 = vadd.f32 %v2990_v1, %v2989_v3 }
0x1e51   :  { %v3014_v59 = vsel %vm1242_vm2, %v3000_v58, %v2982_v2 }
0x1e52   :  { %v3015_v5 = vsel %vm1242_vm2, %v3009_v43, %v2991_v13  ;;  %v3018_v18 = vsel %vm1247_vm3, %v3014_v59, -inf }
0x1e53   :  { %v3019_v29 = vsel %vm1247_vm3, %v3015_v5, -inf }
0x1e54   :  { %v3020_v31 = vmax.f32 %v3018_v18, %v3019_v29 }
0x1e56   :  { %3021 = vmax.xlane.f32.xlu1 %v3020_v31 }
0x1ee3   :  { %v3022_v37 = vpop.xlane.xlu1 %3021 }
0x1ee4   :  { %v3024_v45 = vrot.slane %v3022_v37, 1  ;;  %v3027_v21 = vsub.f32 %v2982_v2, %v3022_v37  ;;  %v3028_v38 = vsub.f32 %v2991_v13, %v3022_v37 }
0x1ee6   :  { %v3029_v63 = vsub.f32 %v3000_v58, %v3024_v45  ;;  %v3030_v4 = vsub.f32 %v3009_v43, %v3024_v45  ;;  %v3031_v14 = vmul.f32 1.442695, %v3027_v21  ;;  %v3033_v19 = vmul.f32 1.442695, %v3028_v38  ;;  %v8300_v38 = vld [vmem:[%s8802_s0 + $0x10] sm:$0xff] }
0x1ee8   :  { %v3035_v11 = vmul.f32 1.442695, %v3029_v63  ;;  %v3037_v23 = vmul.f32 1.442695, %v3030_v4  ;;  %v8306_v4 = vld [vmem:[%s8802_s0 + $0x18] sm:$0xff] }
0x1eea   :  { %6638 = vpow2.f32 %v3035_v11  ;;  %v8312_v11 = vld [vmem:[%s8802_s0] sm:$0xff] }
0x1eeb   :  { %6640 = vpow2.f32 %v3037_v23 }
0x1eec   :  { %6642 = vpow2.f32 %v3031_v14 }
0x1eed   :  { %6644 = vpow2.f32 %v3033_v19  ;;  %v8318_v19 = vld [vmem:[%s8802_s0 + $0x8] sm:$0xff] }
0x1ef4   :  { %v6639_v35 = vpop.eup %6638 }
0x1ef5   :  { %v6641_v17 = vpop.eup %6640  ;;  %v3043_v41 = vrot.slane %v6639_v35, 7 }
0x1ef6   :  { %v6643_v27 = vpop.eup %6642  ;;  %v3045_v55 = vrot.slane %v6641_v17, 7 }
0x1ef7   :  { %v6645_v3 = vpop.eup %6644  ;;  %v3044_v25 = vsel %vm1242_vm2, %v3043_v41, %v6643_v27 }
0x1ef8   :  { %v3046_v26 = vsel %vm1242_vm2, %v3045_v55, %v6645_v3  ;;  %v3049_v58 = vsel %vm1247_vm3, %v3044_v25, 0.0 }
0x1ef9   :  { %v3050_v1 = vsel %vm1247_vm3, %v3046_v26, 0.0 }
0x1efa   :  { %v3051_v43 = vadd.f32 %v3050_v1, %v3049_v58  ;;  %v8338_v1 = vld [vmem:[%s8802_s0 + $0x50] sm:$0xff] }
0x1efb   :  { %8992 = vst [vmem:[#allocation34_spill] sm:$0xff] %v8338_v1 }
0x1efc   :  { %3052 = vadd.xlane.f32.xlu0 %v3051_v43 }
0x1f89   :  { %v3053_v2 = vpop.xlane.xlu0 %3052 }
0x1f8a   :  { %v3055_v13 = vrot.slane %v3053_v2, 1  ;;  %6646 = vrcp.f32 %v3053_v2  ;;  %v8344_v2 = vld [vmem:[%s8802_s0 + $0x58] sm:$0xff] }
0x1f8b   :  { %8993 = vst [vmem:[#allocation35_spill] sm:$0xff] %v8344_v2 }
0x1f8c   :  { %6648 = vrcp.f32 %v3055_v13 }
0x1f94   :  { %v6647_v59 = vpop.eup %6646 }
0x1f95   :  { %v3059_v5 = vmul.f32 %v6647_v59, %v6643_v27  ;;  %v3060_v18 = vmul.f32 %v6647_v59, %v6645_v3  ;;  %v8330_v27 = vld [vmem:[%s8802_s0 + $0x28] sm:$0xff] }
0x1f96   :  { %v6649_v29 = vpop.eup %6648 }
0x1f97   :  { %v3062_v31 = vmul.f32 %v6649_v29, %v6639_v35  ;;  %v3063_v37 = vmul.f32 %v6649_v29, %v6641_v17  ;;  %v3067_v45 = vrot.slane %v3059_v5, %v7684_v32  ;;  %v3071_v21 = vrot.slane %v3060_v18, %v7684_v32  ;;  %v8324_v17 = vld [vmem:[%s8802_s0 + $0x20] sm:$0xff] }
0x1f98   :  { %v8350_v5 = vld [vmem:[%s8802_s0 + $0x60] sm:$0xff] }
0x1f99   :  { %v3082_v63 = vmul.f32 %v8300_v38, %v3067_v45  ;;  %v3083_v14 = vmul.f32 %v8306_v4, %v3071_v21  ;;  %v3080_v23 = vmul.f32 %v8312_v11, %v3067_v45  ;;  %v3081_v35 = vmul.f32 %v8318_v19, %v3071_v21  ;;  %8994 = vst [vmem:[#allocation30_spill] sm:$0xff] %v8350_v5 }
0x1f9a   :  { %v3084_v41 = vmul.f32 %v8324_v17, %v3067_v45  ;;  %v3085_v55 = vmul.f32 %v8330_v27, %v3071_v21  ;;  %v3075_v3 = vrot.slane %v3062_v31, %v7684_v32  ;;  %v3079_v25 = vrot.slane %v3063_v37, %v7684_v32  ;;  %v8356_v31 = vld [vmem:[%s8802_s0 + $0x68] sm:$0xff] }
0x1f9b   :  { %v3099_v26 = vadd.f32 %v3083_v14, %v3082_v63  ;;  %v3096_v58 = vadd.f32 %v3081_v35, %v3080_v23  ;;  %8995 = vst [vmem:[#allocation31_spill] sm:$0xff] %v8356_v31  ;;  %v8362_v63 = vld [vmem:[%s8802_s0 + $0x40] sm:$0xff]  ;;  %v8368_v23 = vld [vmem:[%s8802_s0 + $0x48] sm:$0xff] }
0x1f9c   :  { %v3090_v43 = vmul.f32 %v8338_v1, %v3075_v3  ;;  %v3091_v13 = vmul.f32 %v8344_v2, %v3079_v25  ;;  %v3102_v59 = vadd.f32 %v3085_v55, %v3084_v41  ;;  %v3092_v18 = vmul.f32 %v8350_v5, %v3075_v3  ;;  %v8374_v41 = vld [vmem:[%s8802_s0 + $0x30] sm:$0xff] }
0x1f9d   :  { %3100 = vadd.xlane.f32.xlu1 %v3099_v26  ;;  %3097 = vadd.xlane.f32.xlu0 %v3096_v58  ;;  %v3093_v37 = vmul.f32 %v8356_v31, %v3079_v25  ;;  %v3088_v14 = vmul.f32 %v8362_v63, %v3075_v3  ;;  %v3089_v35 = vmul.f32 %v8368_v23, %v3079_v25  ;;  %v8380_v26 = vld [vmem:[%s8802_s0 + $0x38] sm:$0xff] }
0x1f9e   :  { %v3111_v29 = vadd.f32 %v3091_v13, %v3090_v43  ;;  %v3086_v55 = vmul.f32 %v8374_v41, %v3067_v45  ;;  %8996 = vst [vmem:[#allocation32_spill] sm:$0xff] %v8380_v26  ;;  %v3087_v58 = vmul.f32 %v8380_v26, %v3071_v21  ;;  %v8392_v45 = vld [vmem:[%s8802_s0 + $0x78] sm:$0xff] }
0x1f9f   :  { %v3114_v43 = vadd.f32 %v3093_v37, %v3092_v18  ;;  %v3108_v13 = vadd.f32 %v3089_v35, %v3088_v14  ;;  %v3095_v31 = vmul.f32 %v8392_v45, %v3079_v25 }
0x1fa0   :  { %v3105_v21 = vadd.f32 %v3087_v58, %v3086_v55 }
0x1fa1   :  { %3103 = vadd.xlane.f32.xlu0 %v3102_v59  ;;  %3112 = vadd.xlane.f32.xlu1 %v3111_v29  ;;  %v8386_v59 = vld [vmem:[%s8802_s0 + $0x70] sm:$0xff] }
0x1fa2   :  { %8997 = vst [vmem:[#allocation33_spill] sm:$0xff] %v8386_v59  ;;  %v3094_v29 = vmul.f32 %v8386_v59, %v3075_v3 }
0x1fa4   :  { %v3117_v5 = vadd.f32 %v3095_v31, %v3094_v29 }
0x1fa5   :  { %3115 = vadd.xlane.f32.xlu1 %v3114_v43  ;;  %3109 = vadd.xlane.f32.xlu0 %v3108_v13 }
0x1fa9   :  { %3118 = vadd.xlane.f32.xlu1 %v3117_v5  ;;  %3106 = vadd.xlane.f32.xlu0 %v3105_v21 }
0x202a   :  { %v3101_v18 = vpop.xlane.xlu1 %3100  ;;  %v3098_v37 = vpop.xlane.xlu0 %3097 }
0x202b   :  { %v3135_v3 = vrot.slane %v3101_v18, %v7925_v9  ;;  %v3131_v59 = vrot.slane %v3098_v37, %v7929_v16 }
0x202d   :  { %v3136_v13 = vsel %vm1367_vm4, %v3135_v3, %v3131_v59 }
0x202e   :  { %v3104_v14 = vpop.xlane.xlu0 %3103  ;;  %v3113_v35 = vpop.xlane.xlu1 %3112 }
0x202f   :  { %v3154_v26 = vrot.slane %v3113_v35, %v7925_v9  ;;  %v3140_v43 = vrot.slane %v3104_v14, %v8962_v46  ;;  %v8437_v35 = vld [vmem:[%s8804_s14] ss:$0 sm:$0xff] }
0x2031   :  { %v3141_v18 = vsel %vm1374_vm5, %v3140_v43, %v3136_v13 }
0x2032   :  { %v3116_v2 = vpop.xlane.xlu1 %3115  ;;  %v3110_v1 = vpop.xlane.xlu0 %3109 }
0x2033   :  { %v3150_v25 = vrot.slane %v3110_v1, %v7929_v16  ;;  %v3159_v31 = vrot.slane %v3116_v2, %v8962_v46 }
0x2035   :  { %v3155_v5 = vsel %vm1367_vm4, %v3154_v26, %v3150_v25 }
0x2036   :  { %v3119_v55 = vpop.xlane.xlu1 %3118  ;;  %v3107_v58 = vpop.xlane.xlu0 %3106  ;;  %v3160_v37 = vsel %vm1374_vm5, %v3159_v31, %v3155_v5 }
0x2037   :  { %v3164_v29 = vrot.slane %v3119_v55, %v7935_v54  ;;  %v3145_v21 = vrot.slane %v3107_v58, %v7935_v54 }
0x2039   :  { %v3165_v1 = vsel %vm1381_vm6, %v3164_v29, %v3160_v37  ;;  %v3146_v14 = vsel %vm1381_vm6, %v3145_v21, %v3141_v18 }
0x203a   :  { %v3166_v2 = vsel %vm1242_vm2, %v3165_v1, %v3146_v14 }
0x203b   :  { %5769 = vmatmul.mubr.msk.f32.vlgmr.msra.gmra.mrb[30].mxu1 %vm174_vm0, %v3166_v2 }
0x203c   :  { %6310 = vmatpush3.bf16.msra.mxu1 %v7379_v42  ;;  %5790 = vmatprep.mubr.msk.f32.mxu1 %vm6810_vm1, %v8937_v40 }
0x203d   :  { %6311 = vmatprep.subr.bf16.mxu1 %v8933_v48 }
0x2040   :  { %6313 = vmatpush3.bf16.msra.mxu1 %v7405_v49 }
0x2041   :  { %6338 = vmatprep.subr.bf16.mxu1 %v8933_v48 }
0x2043   :  { %5791 = vmatmul.mubr.msk.f32.vlgmr.msra.gmra.mrb[32].mxu1 %vm174_vm0, %v8197_v50 }
0x2044   :  { %6340 = vmatpush3.bf16.msra.mxu1 %v7544_v44  ;;  %5836 = vmatprep.mubr.msk.f32.mxu1 %vm6810_vm1, %v8937_v40 }
0x2045   :  { %6341 = vmatprep.subr.bf16.mxu1 %v8933_v48 }
0x2048   :  { %6343 = vmatpush3.bf16.msra.mxu1 %v7550_v47 }
0x2049   :  { %6344 = vmatprep.subr.bf16.mxu1 %v8933_v48 }
0x204b   :  { %5837 = vmatmul.mubr.msk.f32.vlgmr.msra.gmra.mrb[34].mxu1 %vm174_vm0, %v8221_v61 }
0x204c   :  { %6346 = vmatpush3.bf16.msra.mxu1 %v7560_v52  ;;  %5847 = vmatprep.mubr.msk.f32.mxu1 %vm6810_vm1, %v8937_v40 }
0x204d   :  { %6347 = vmatprep.subr.bf16.mxu1 %v8933_v48 }
0x2050   :  { %6349 = vmatpush3.bf16.msra.mxu1 %v7572_v57 }
0x2051   :  { %6350 = vmatprep.subr.bf16.mxu1 %v8933_v48 }
0x210e   :  { %v3235_v50 = vpop.f32.mrb[30].mxu1 }
0x210f   :  { %v3306_v26 = vadd.f32 %v8251_v20, %v3235_v50  ;;  %v5770_v59 = vpop.f32.mrb[31].mxu1 }
0x2111   :  { %v3309_v61 = vadd.f32 %v8437_v35, %v3306_v26 }
0x2113   :  { %v3317_v3 = vrot.slane %v3309_v61, %v7982_v60  ;;  %v3337_v25 = vsel %vm1247_vm3, %v3309_v61, -inf }
0x2114   :  { %3338 = vmax.xlane.f32.xlu0 %v3337_v25 }
0x2115   :  { %v3318_v43 = vcombine.high %v3317_v3, %v3317_v3  ;;  %5218 = vst.sshfl [vmem:[%s8805_s15 + $0x2] sm:$0x1 pattern:$0x73625140] %v3317_v3 }
0x2116   :  { %v3426_v31 = vpop.f32.mrb[32].mxu1 }
0x2117   :  { %5219 = vst.sshfl [vmem:[%s8805_s15 + $0xa] sm:$0x1 pattern:$0x73625140] %v3318_v43  ;;  %v5792_v20 = vpop.f32.mrb[33].mxu1 }
0x211e   :  { %v3591_v5 = vpop.f32.mrb[34].mxu1 }
0x211f   :  { %v5838_v55 = vpop.f32.mrb[35].mxu1 }
0x21a1   :  { %v3339_v58 = vpop.xlane.xlu0 %3338 }
0x21a2   :  { %vm3340_vm13 = vcmp.ge.f32.partialorder %v3309_v61, %v3339_v58 }
0x21a3   :  { %v3341_v13 = vsel %vm3340_vm13, %v7919_v15, 128 }
0x21a4   :  { %v3342_v29 = vsel %vm1247_vm3, %v3341_v13, 2147483647 }
0x21a5   :  { %v3344_v21 = vshra.s32 %v3342_v29, 16  ;;  %v3343_v37 = vand.u32 65535, %v3342_v29 }
0x21a7   :  { %v3346_v18 = vcvt.s32.f32 %v3344_v21  ;;  %v3345_v14 = vcvt.s32.f32 %v3343_v37 }
0x21a9   :  { %3347 = vmin.xlane.f32.xlu1 %v3346_v18 }
0x2236   :  { %v3348_v1 = vpop.xlane.xlu1 %3347 }
0x2237   :  { %vm3349_vm14 = vcmp.eq.f32.partialorder %v3346_v18, %v3348_v1  ;;  %v3354_v50 = vcvt.f32.s32 %v3348_v1 }
0x2238   :  { %v3350_v2 = vsel %vm3349_vm14, %v3345_v14, inf }
0x2239   :  { %3351 = vmin.xlane.f32.xlu0 %v3350_v2  ;;  %v3355_v59 = vshll.u32 %v3354_v50, 16 }
0x22c6   :  { %v3352_v26 = vpop.xlane.xlu0 %3351 }
0x22c7   :  { %v3353_v3 = vcvt.f32.s32 %v3352_v26 }
0x22c9   :  { %v3356_v25 = vadd.s32 %v3355_v59, %v3353_v3 }
0x22cb   :  { %vm3357_vm15 = vcmp.eq.s32.totalorder %v7919_v15, %v3356_v25 }
0x22cc   :  { %5826 = vmatmul.mubr.msk.f32.vlgmr.msra.gmra.mrb[26].mxu0 %vm3357_vm15, %v8963_v33 }
0x22cd   :  { %6364 = vmatpush3.bf16.msra.mxu0 %v7640_v24  ;;  %5880 = vmatprep.mubr.msk.f32.mxu0 %vm6810_vm1, %v8937_v40 }
0x22ce   :  { %6365 = vmatprep.subr.bf16.mxu0 %v8933_v48 }
0x22d1   :  { %6367 = vmatpush3.bf16.msra.mxu0 %v7653_v28 }
0x22d2   :  { %6374 = vmatprep.subr.bf16.mxu0 %v8933_v48 }
0x239f   :  { %v3496_v61 = vpop.f32.mrb[26].mxu0 }
0x23a0   :  { %v3497_v43 = vadd.f32 %v3496_v61, %v3426_v31  ;;  %v5827_v20 = vpop.f32.mrb[27].mxu0 }
0x23a2   :  { %v3500_v55 = vadd.f32 %v8186_v51, %v3497_v43 }
0x23a4   :  { %6650 = vtanh.f32 %v3500_v55  ;;  %v5223_v13 = vmul.f32 -1.442695, %v3500_v55 }
0x23a6   :  { %6652 = vpow2.f32 %v5223_v13 }
0x23ae   :  { %v6651_v58 = vpop.eup %6650 }
0x23af   :  { %3510 = vrot.lane.b32.xlu1 %v6651_v58, %s6811_s19 }
0x23b0   :  { %v6653_v29 = vpop.eup %6652 }
0x23b1   :  { %v3504_v21 = vadd.f32 1.0, %v6653_v29 }
0x23b3   :  { %6654 = vrcp.f32 %v3504_v21 }
0x23bd   :  { %v6655_v18 = vpop.eup %6654 }
0x23be   :  { %v3508_v14 = vmul.f32 %v6655_v18, %v8192_v12 }
0x2421   :  { %v3511_v37 = vpop.permute.xlu1 %3510 }
0x2422   :  { %v3513_v1 = vmul.f32 %v6655_v18, %v3511_v37 }
0x2424   :  { %3515 = vrot.lane.b32.xlu0 %v3513_v1, %s6812_s20 }
0x2496   :  { %v3516_v31 = vpop.permute.xlu0 %3515 }
0x2497   :  { %v8462_v2 = vadd.f32 %v3516_v31, %v3508_v14 }
0x2499   :  { %6656 = vtanh.f32 %v8462_v2 }
0x24a3   :  { %v6657_v51 = vpop.eup %6656 }
0x24a4   :  { %3521 = vrot.lane.b32.xlu1 %v6657_v51, %s6811_s19 }
0x2516   :  { %v3522_v50 = vpop.permute.xlu1 %3521 }
0x2517   :  { %v3524_v26 = vmul.f32 %v6655_v18, %v3522_v50 }
0x2519   :  { %3596 = vrot.lane.b32.xlu1 %v3524_v26, %s6812_s20  ;;  %v9002_v26 = vld [vmem:[#allocation10_spill] sm:$0xff] }
0x258b   :  { %v8467_v59 = vpop.permute.xlu1 %3596 }
0x258c   :  { %5848 = vmatmul.mubr.msk.f32.vlgmr.msra.gmra.mrb[36].mxu1 %vm174_vm0, %v8467_v59 }
0x258d   :  { %6352 = vmatpush3.bf16.msra.mxu1 %v7613_v53  ;;  %5858 = vmatprep.mubr.msk.f32.mxu1 %vm6810_vm1, %v8937_v40 }
0x258e   :  { %6353 = vmatprep.subr.bf16.mxu1 %v8933_v48 }
0x2591   :  { %6355 = vmatpush3.bf16.msra.mxu1 %v7619_v56 }
0x2592   :  { %6356 = vmatprep.subr.bf16.mxu1 %v8933_v48 }
0x265f   :  { %v3666_v12 = vpop.f32.mrb[36].mxu1 }
0x2660   :  { %v3667_v3 = vadd.f32 %v3666_v12, %v3591_v5  ;;  %v5849_v25 = vpop.f32.mrb[37].mxu1 }
0x2662   :  { %v3670_v61 = vadd.f32 %v8210_v62, %v3667_v3 }
0x2664   :  { %6658 = vtanh.f32 %v3670_v61  ;;  %v5226_v20 = vmul.f32 -1.442695, %v3670_v61  ;;  %v9003_v61 = vld [vmem:[#allocation12_spill] sm:$0xff] }
0x2666   :  { %6660 = vpow2.f32 %v5226_v20  ;;  %v9004_v20 = vld [vmem:[#allocation13_spill] sm:$0xff] }
0x266e   :  { %v6659_v43 = vpop.eup %6658 }
0x266f   :  { %3680 = vrot.lane.b32.xlu0 %v6659_v43, %s6811_s19 }
0x2670   :  { %v6661_v55 = vpop.eup %6660 }
0x2671   :  { %v3674_v58 = vadd.f32 1.0, %v6661_v55 }
0x2673   :  { %6662 = vrcp.f32 %v3674_v58  ;;  %v9005_v58 = vld [vmem:[#allocation14_spill] sm:$0xff] }
0x267d   :  { %v6663_v13 = vpop.eup %6662 }
0x267e   :  { %v3678_v18 = vmul.f32 %v6663_v13, %v8216_v22  ;;  %v9000_v22 = vld [vmem:[#allocation7_spill] sm:$0xff] }
0x26e1   :  { %v3681_v29 = vpop.permute.xlu0 %3680 }
0x26e2   :  { %v3683_v21 = vmul.f32 %v6663_v13, %v3681_v29  ;;  %v9006_v29 = vld [vmem:[#allocation15_spill] sm:$0xff] }
0x26e4   :  { %3685 = vrot.lane.b32.xlu1 %v3683_v21, %s6812_s20 }
0x2756   :  { %v3686_v5 = vpop.permute.xlu1 %3685 }
0x2757   :  { %v8481_v37 = vadd.f32 %v3686_v5, %v3678_v18 }
0x2759   :  { %8998 = vst [vmem:[#allocation36_spill] sm:$0xff] %v8481_v37  ;;  %6664 = vtanh.f32 %v8481_v37 }
0x2763   :  { %v6665_v62 = vpop.eup %6664 }
0x2764   :  { %3691 = vrot.lane.b32.xlu0 %v6665_v62, %s6811_s19  ;;  %v9007_v62 = vld [vmem:[#allocation16_spill] sm:$0xff] }
0x27d6   :  { %v3692_v1 = vpop.permute.xlu0 %3691 }
0x27d7   :  { %v3694_v14 = vmul.f32 %v6663_v13, %v3692_v1 }
0x27d9   :  { %3696 = vrot.lane.b32.xlu1 %v3694_v14, %s6812_s20  ;;  %v9008_v14 = vld [vmem:[#allocation17_spill] sm:$0xff] }
0x284b   :  { %v8486_v31 = vpop.permute.xlu1 %3696 }
0x284c   :  { %5859 = vmatmul.mubr.msk.f32.vlgmr.msra.gmra.mrb[38].mxu1 %vm174_vm0, %v8486_v31  ;;  %5881 = vmatmul.mubr.msk.f32.vlgmr.msra.gmra.mrb[28].mxu0 %vm174_vm0, %v8486_v31 }
0x284d   :  { %6358 = vmatpush3.bf16.msra.mxu1 %v7904_v34  ;;  %5869 = vmatprep.mubr.msk.f32.mxu1 %vm6810_vm1, %v8937_v40 }
0x284e   :  { %6359 = vmatprep.subr.bf16.mxu1 %v8933_v48  ;;  %6376 = vmatpush3.bf16.msra.mxu0 %v7371_v39  ;;  %v8999_v39 = vld [vmem:[#allocation6_spill] sm:$0xff] }
0x284f   :  { %6377 = vmatprep.subr.bf16.mxu0 %v8933_v48  ;;  %5926 = vmatprep.mubr.msk.f32.mxu0 %vm6810_vm1, %v8937_v40 }
0x2851   :  { %6361 = vmatpush3.bf16.msra.mxu1 %v8964_v10 }
0x2852   :  { %6368 = vmatprep.subr.bf16.mxu1 %v8933_v48  ;;  %6379 = vmatpush3.bf16.msra.mxu0 %v8965_v36  ;;  %v9001_v36 = vld [vmem:[#allocation8_spill] sm:$0xff] }
0x2853   :  { %6380 = vmatprep.subr.bf16.mxu0 %v8933_v48 }
0x2856   :  { %6382 = vmatpush3.bf16.msra.mxu0 %v8966_v6 }
0x2857   :  { %6383 = vmatprep.subr.bf16.mxu0 %v8933_v48 }
0x285a   :  { %6385 = vmatpush3.bf16.msra.mxu0 %v8967_v7 }
0x285b   :  { %6386 = vmatprep.subr.bf16.mxu0 %v8933_v48 }
0x285e   :  { %6388 = vmatpush3.bf16.msra.mxu0 %v8968_v0 }
0x285f   :  { %6389 = vmatprep.subr.bf16.mxu0 %v8933_v48 }
0x2862   :  { %6391 = vmatpush3.bf16.msra.mxu0 %v8999_v39 }
0x2863   :  { %6392 = vmatprep.subr.bf16.mxu0 %v8933_v48 }
0x2866   :  { %6394 = vmatpush3.bf16.msra.mxu0 %v9000_v22  ;;  %v9009_v22 = vld [vmem:[#allocation18_spill] sm:$0xff] }
0x2867   :  { %6395 = vmatprep.subr.bf16.mxu0 %v8933_v48 }
0x286a   :  { %6397 = vmatpush3.bf16.msra.mxu0 %v9001_v36 }
0x286b   :  { %6422 = vmatprep.subr.bf16.mxu0 %v8933_v48 }
0x291f   :  { %v3766_v6 = vpop.f32.mrb[38].mxu1  ;;  %v8516_v7 = vpop.f32.mrb[28].mxu0 }
0x2920   :  { %v3773_v51 = vrot.slane %v3766_v6, %v7684_v32  ;;  %v5860_v0 = vpop.f32.mrb[39].mxu1  ;;  %v5882_v50 = vpop.f32.mrb[29].mxu0  ;;  %v3792_v12 = vrot.slane %v3766_v6, %v9002_v26  ;;  %v9010_v6 = vld [vmem:[#allocation19_spill] sm:$0xff] }
0x2922   :  { %3779 = vbcast.lane.b32.xlu1 %v3773_v51, 264  ;;  %3775 = vbcast.lane.b32.xlu0 %v3773_v51, 256 }
0x2926   :  { %3798 = vbcast.lane.b32.xlu1 %v3792_v12, 264  ;;  %3794 = vbcast.lane.b32.xlu0 %v3792_v12, 256 }
0x292a   :  { %3802 = vbcast.lane.b32.xlu1 %v3792_v12, 272  ;;  %3783 = vbcast.lane.b32.xlu0 %v3773_v51, 272 }
0x292e   :  { %3806 = vbcast.lane.b32.xlu1 %v3792_v12, 280  ;;  %3787 = vbcast.lane.b32.xlu0 %v3773_v51, 280  ;;  %v9011_v12 = vld [vmem:[#allocation20_spill] sm:$0xff] }
0x2994   :  { %v3780_v3 = vpop.permute.xlu1 %3779  ;;  %v3776_v25 = vpop.permute.xlu0 %3775 }
0x2995   :  { %v3810_v43 = vadd.f32 %v9003_v61, %v3780_v3  ;;  %v3811_v55 = vadd.f32 %v9004_v20, %v3780_v3  ;;  %v3808_v13 = vadd.f32 %v9005_v58, %v3776_v25  ;;  %v3809_v21 = vadd.f32 %v9006_v29, %v3776_v25  ;;  %v9012_v25 = vld [vmem:[#allocation21_spill] sm:$0xff] }
0x2997   :  { %6666 = vtanh.f32 %v3810_v43 }
0x2998   :  { %6668 = vtanh.f32 %v3811_v55  ;;  %v3799_v18 = vpop.permute.xlu1 %3798  ;;  %v3795_v5 = vpop.permute.xlu0 %3794  ;;  %v9013_v55 = vld [vmem:[#allocation22_spill] sm:$0xff] }
0x2999   :  { %6670 = vtanh.f32 %v3808_v13  ;;  %v3818_v1 = vadd.f32 %v9007_v62, %v3799_v18  ;;  %v3819_v39 = vadd.f32 %v9008_v14, %v3799_v18  ;;  %v3816_v36 = vadd.f32 %v9009_v22, %v3795_v5  ;;  %v9014_v62 = vld [vmem:[#allocation23_spill] sm:$0xff] }
0x299a   :  { %6672 = vtanh.f32 %v3809_v21  ;;  %v3817_v51 = vadd.f32 %v9010_v6, %v3795_v5  ;;  %v9015_v5 = vld [vmem:[#allocation24_spill] sm:$0xff] }
0x299b   :  { %6674 = vtanh.f32 %v3818_v1 }
0x299c   :  { %6676 = vtanh.f32 %v3819_v39  ;;  %v3803_v0 = vpop.permute.xlu1 %3802  ;;  %v3784_v50 = vpop.permute.xlu0 %3783  ;;  %v9016_v39 = vld [vmem:[#allocation25_spill] sm:$0xff] }
0x299d   :  { %6678 = vtanh.f32 %v3816_v36  ;;  %v3820_v3 = vadd.f32 %v9011_v12, %v3803_v0  ;;  %v3821_v43 = vadd.f32 %v9012_v25, %v3803_v0  ;;  %v3812_v13 = vadd.f32 %v9013_v55, %v3784_v50  ;;  %v9017_v36 = vld [vmem:[#allocation26_spill] sm:$0xff]  ;;  %v9018_v0 = vld [vmem:[#allocation27_spill] sm:$0xff] }
0x299e   :  { %6680 = vtanh.f32 %v3817_v51  ;;  %v3813_v29 = vadd.f32 %v9014_v62, %v3784_v50  ;;  %v9019_v62 = vld [vmem:[#allocation11_spill] sm:$0xff] }
0x299f   :  { %6682 = vtanh.f32 %v3820_v3 }
0x29a0   :  { %6684 = vtanh.f32 %v3821_v43  ;;  %v3807_v18 = vpop.permute.xlu1 %3806  ;;  %v3788_v21 = vpop.permute.xlu0 %3787 }
0x29a1   :  { %v6667_v22 = vpop.eup %6666  ;;  %6686 = vtanh.f32 %v3812_v13  ;;  %v3822_v1 = vadd.f32 %v9015_v5, %v3807_v18  ;;  %v3823_v6 = vadd.f32 %v9016_v39, %v3807_v18  ;;  %v3814_v14 = vadd.f32 %v9017_v36, %v3788_v21 }
0x29a2   :  { %v6669_v12 = vpop.eup %6668  ;;  %6688 = vtanh.f32 %v3813_v29  ;;  %v3815_v25 = vadd.f32 %v9018_v0, %v3788_v21  ;;  %v9020_v0 = vld [vmem:[#allocation29_spill] sm:$0xff] }
0x29a3   :  { %v6671_v55 = vpop.eup %6670  ;;  %6690 = vtanh.f32 %v3822_v1  ;;  %v3842_v1 = vmul.f32 %v6667_v22, %v8989_v30 }
0x29a4   :  { %v6673_v51 = vpop.eup %6672  ;;  %6692 = vtanh.f32 %v3823_v6  ;;  %v3840_v6 = vmul.f32 %v6671_v55, %v9019_v62 }
0x29a5   :  { %v6675_v50 = vpop.eup %6674  ;;  %6694 = vtanh.f32 %v3814_v14  ;;  %v3841_v20 = vmul.f32 %v6673_v51, %v9019_v62 }
0x29a6   :  { %v6677_v3 = vpop.eup %6676  ;;  %6696 = vtanh.f32 %v3815_v25  ;;  %v3850_v5 = vmul.f32 %v6675_v50, %v8989_v30  ;;  %v3843_v25 = vmul.f32 %v6669_v12, %v8989_v30  ;;  %v3856_v34 = vadd.f32 %v3842_v1, %v3840_v6 }
0x29a7   :  { %v6679_v43 = vpop.eup %6678  ;;  %v3851_v36 = vmul.f32 %v6677_v3, %v8989_v30 }
0x29a8   :  { %v6681_v13 = vpop.eup %6680  ;;  %v3848_v18 = vmul.f32 %v6679_v43, %v9019_v62  ;;  %v3865_v56 = vadd.f32 %v3843_v25, %v3841_v20 }
0x29a9   :  { %v6683_v39 = vpop.eup %6682  ;;  %v3849_v29 = vmul.f32 %v6681_v13, %v9019_v62 }
0x29aa   :  { %v6685_v21 = vpop.eup %6684  ;;  %v3852_v14 = vmul.f32 %v6683_v39, %v9020_v0  ;;  %v3874_v61 = vadd.f32 %v3850_v5, %v3848_v18 }
0x29ab   :  { %v6687_v58 = vpop.eup %6686  ;;  %v3853_v50 = vmul.f32 %v6685_v21, %v9020_v0  ;;  %v3883_v13 = vadd.f32 %v3851_v36, %v3849_v29 }
0x29ac   :  { %v6689_v43 = vpop.eup %6688  ;;  %v3844_v3 = vmul.f32 %v6687_v58, %v9020_v0  ;;  %v3875_v55 = vadd.f32 %v3874_v61, %v3852_v14 }
0x29ad   :  { %v6691_v26 = vpop.eup %6690  ;;  %v3845_v10 = vmul.f32 %v6689_v43, %v9020_v0  ;;  %v3884_v12 = vadd.f32 %v3883_v13, %v3853_v50 }
0x29ae   :  { %v6693_v22 = vpop.eup %6692  ;;  %v3854_v39 = vmul.f32 %v6691_v26, %v7782_v8  ;;  %v3857_v21 = vadd.f32 %v3856_v34, %v3844_v3 }
0x29af   :  { %v6695_v37 = vpop.eup %6694  ;;  %v3855_v51 = vmul.f32 %v6693_v22, %v7782_v8  ;;  %v3866_v58 = vadd.f32 %v3865_v56, %v3845_v10 }
0x29b0   :  { %v6697_v62 = vpop.eup %6696  ;;  %v3876_v30 = vadd.f32 %v3875_v55, %v3854_v39  ;;  %v3846_v5 = vmul.f32 %v6695_v37, %v7782_v8 }
0x29b1   :  { %v3885_v18 = vadd.f32 %v3884_v12, %v3855_v51  ;;  %v3847_v36 = vmul.f32 %v6697_v62, %v7782_v8 }
0x29b2   :  { %v3858_v29 = vadd.f32 %v3857_v21, %v3846_v5  ;;  %v3877_v43 = vrot.slane %v3876_v30, 4 }
0x29b3   :  { %v3867_v1 = vadd.f32 %v3866_v58, %v3847_v36  ;;  %v3886_v61 = vrot.slane %v3885_v18, 4 }
0x29b4   :  { %v3859_v6 = vrot.slane %v3858_v29, 4  ;;  %v3878_v26 = vadd.f32 %v3877_v43, %v3876_v30 }
0x29b5   :  { %v3868_v14 = vrot.slane %v3867_v1, 4  ;;  %v3887_v20 = vadd.f32 %v3886_v61, %v3885_v18 }
0x29b6   :  { %v3860_v25 = vadd.f32 %v3859_v6, %v3858_v29  ;;  %v3879_v50 = vrot.slane %v3878_v26, 2 }
0x29b7   :  { %v3869_v13 = vadd.f32 %v3868_v14, %v3867_v1  ;;  %v3888_v22 = vrot.slane %v3887_v20, 2 }
0x29b8   :  { %v3861_v34 = vrot.slane %v3860_v25, 2  ;;  %v3880_v3 = vadd.f32 %v3879_v50, %v3878_v26 }
0x29b9   :  { %v3870_v55 = vrot.slane %v3869_v13, 2  ;;  %v3889_v37 = vadd.f32 %v3888_v22, %v3887_v20 }
0x29ba   :  { %v3862_v56 = vadd.f32 %v3861_v34, %v3860_v25  ;;  %v3881_v10 = vrot.slane %v3880_v3, 1 }
0x29bb   :  { %v3871_v39 = vadd.f32 %v3870_v55, %v3869_v13  ;;  %v3890_v62 = vrot.slane %v3889_v37, 1 }
0x29bc   :  { %v3863_v12 = vrot.slane %v3862_v56, 1  ;;  %v3882_v51 = vadd.f32 %v3881_v10, %v3880_v3 }
0x29bd   :  { %v3872_v21 = vrot.slane %v3871_v39, 1  ;;  %v3891_v5 = vadd.f32 %v3890_v62, %v3889_v37 }
0x29be   :  { %v3864_v58 = vadd.f32 %v3863_v12, %v3862_v56 }
0x29bf   :  { %v3873_v30 = vadd.f32 %v3872_v21, %v3871_v39 }
0x29c0   :  { %v3896_v18 = vsel %vm1242_vm2, %v3882_v51, %v3864_v58 }
0x29c1   :  { %v3897_v36 = vsel %vm1242_vm2, %v3891_v5, %v3873_v30  ;;  %v3900_v29 = vsel %vm1247_vm3, %v3896_v18, -inf }
0x29c2   :  { %v3901_v43 = vsel %vm1247_vm3, %v3897_v36, -inf }
0x29c3   :  { %v3902_v1 = vmax.f32 %v3900_v29, %v3901_v43 }
0x29c5   :  { %3903 = vmax.xlane.f32.xlu0 %v3902_v1 }
0x2a52   :  { %v3904_v61 = vpop.xlane.xlu0 %3903 }
0x2a53   :  { %v3906_v6 = vrot.slane %v3904_v61, 1  ;;  %v3909_v26 = vsub.f32 %v3864_v58, %v3904_v61  ;;  %v3910_v14 = vsub.f32 %v3873_v30, %v3904_v61 }
0x2a55   :  { %v3911_v20 = vsub.f32 %v3882_v51, %v3906_v6  ;;  %v3912_v25 = vsub.f32 %v3891_v5, %v3906_v6  ;;  %v3913_v50 = vmul.f32 1.442695, %v3909_v26  ;;  %v3915_v34 = vmul.f32 1.442695, %v3910_v14 }
0x2a57   :  { %v3917_v13 = vmul.f32 1.442695, %v3911_v20  ;;  %v3919_v22 = vmul.f32 1.442695, %v3912_v25 }
0x2a59   :  { %6698 = vpow2.f32 %v3917_v13 }
0x2a5a   :  { %6700 = vpow2.f32 %v3919_v22 }
0x2a5b   :  { %6702 = vpow2.f32 %v3913_v50 }
0x2a5c   :  { %6704 = vpow2.f32 %v3915_v34 }
0x2a63   :  { %v6699_v3 = vpop.eup %6698 }
0x2a64   :  { %v6701_v55 = vpop.eup %6700  ;;  %v3925_v37 = vrot.slane %v6699_v3, 7 }
0x2a65   :  { %v6703_v56 = vpop.eup %6702  ;;  %v3927_v10 = vrot.slane %v6701_v55, 7 }
0x2a66   :  { %v6705_v39 = vpop.eup %6704  ;;  %v3926_v62 = vsel %vm1242_vm2, %v3925_v37, %v6703_v56 }
0x2a67   :  { %v3928_v12 = vsel %vm1242_vm2, %v3927_v10, %v6705_v39  ;;  %v3931_v51 = vsel %vm1247_vm3, %v3926_v62, 0.0  ;;  %v9022_v62 = vld [vmem:[#allocation34_spill] sm:$0xff] }
0x2a68   :  { %v3932_v21 = vsel %vm1247_vm3, %v3928_v12, 0.0 }
0x2a69   :  { %v3933_v5 = vadd.f32 %v3932_v21, %v3931_v51  ;;  %v9023_v51 = vld [vmem:[#allocation35_spill] sm:$0xff] }
0x2a6b   :  { %3934 = vadd.xlane.f32.xlu1 %v3933_v5  ;;  %v9024_v5 = vld [vmem:[#allocation30_spill] sm:$0xff] }
0x2af8   :  { %v3935_v58 = vpop.xlane.xlu1 %3934 }
0x2af9   :  { %v3937_v30 = vrot.slane %v3935_v58, 1  ;;  %6706 = vrcp.f32 %v3935_v58  ;;  %v9025_v58 = vld [vmem:[#allocation31_spill] sm:$0xff] }
0x2afb   :  { %6708 = vrcp.f32 %v3937_v30 }
0x2b03   :  { %v6707_v18 = vpop.eup %6706 }
0x2b04   :  { %v3941_v36 = vmul.f32 %v6707_v18, %v6703_v56  ;;  %v3942_v29 = vmul.f32 %v6707_v18, %v6705_v39 }
0x2b05   :  { %v6709_v43 = vpop.eup %6708 }
0x2b06   :  { %v3944_v1 = vmul.f32 %v6709_v43, %v6699_v3  ;;  %v3945_v61 = vmul.f32 %v6709_v43, %v6701_v55  ;;  %v3949_v6 = vrot.slane %v3941_v36, %v7684_v32  ;;  %v3953_v26 = vrot.slane %v3942_v29, %v7684_v32 }
0x2b08   :  { %v3966_v14 = vmul.f32 %v8324_v17, %v3949_v6  ;;  %v3967_v20 = vmul.f32 %v8330_v27, %v3953_v26  ;;  %v3962_v25 = vmul.f32 %v8312_v11, %v3949_v6  ;;  %v3963_v50 = vmul.f32 %v8318_v19, %v3953_v26  ;;  %v9021_v27 = vld [vmem:[#allocation32_spill] sm:$0xff] }
0x2b09   :  { %v3957_v13 = vrot.slane %v3944_v1, %v7684_v32  ;;  %v3961_v22 = vrot.slane %v3945_v61, %v7684_v32  ;;  %v3964_v3 = vmul.f32 %v8300_v38, %v3949_v6  ;;  %v3965_v55 = vmul.f32 %v8306_v4, %v3953_v26 }
0x2b0a   :  { %v3984_v34 = vadd.f32 %v3967_v20, %v3966_v14  ;;  %v3978_v37 = vadd.f32 %v3963_v50, %v3962_v25  ;;  %v3968_v11 = vmul.f32 %v8374_v41, %v3949_v6  ;;  %v3969_v19 = vmul.f32 %v9021_v27, %v3953_v26  ;;  %v9026_v41 = vld [vmem:[#allocation33_spill] sm:$0xff] }
0x2b0b   :  { %v3970_v56 = vmul.f32 %v8362_v63, %v3957_v13  ;;  %v3971_v17 = vmul.f32 %v8368_v23, %v3961_v22  ;;  %v3981_v10 = vadd.f32 %v3965_v55, %v3964_v3  ;;  %v3972_v12 = vmul.f32 %v9022_v62, %v3957_v13 }
0x2b0c   :  { %3985 = vadd.xlane.f32.xlu1 %v3984_v34  ;;  %3979 = vadd.xlane.f32.xlu0 %v3978_v37  ;;  %v3973_v21 = vmul.f32 %v9023_v51, %v3961_v22  ;;  %v3987_v4 = vadd.f32 %v3969_v19, %v3968_v11  ;;  %v3974_v63 = vmul.f32 %v9024_v5, %v3957_v13 }
0x2b0d   :  { %v3990_v39 = vadd.f32 %v3971_v17, %v3970_v56  ;;  %v3975_v23 = vmul.f32 %v9025_v58, %v3961_v22  ;;  %v3976_v18 = vmul.f32 %v9026_v41, %v3957_v13  ;;  %v3977_v36 = vmul.f32 %v8392_v45, %v3961_v22 }
0x2b0e   :  { %v3993_v38 = vadd.f32 %v3973_v21, %v3972_v12 }
0x2b0f   :  { %v3996_v30 = vadd.f32 %v3975_v23, %v3974_v63  ;;  %v3999_v29 = vadd.f32 %v3977_v36, %v3976_v18 }
0x2b10   :  { %3982 = vadd.xlane.f32.xlu0 %v3981_v10  ;;  %3991 = vadd.xlane.f32.xlu1 %v3990_v39 }
0x2b14   :  { %3994 = vadd.xlane.f32.xlu0 %v3993_v38  ;;  %3988 = vadd.xlane.f32.xlu1 %v3987_v4 }
0x2b18   :  { %3997 = vadd.xlane.f32.xlu0 %v3996_v30 }
0x2b1c   :  { %4000 = vadd.xlane.f32.xlu0 %v3999_v29 }
0x2b99   :  { %v3986_v43 = vpop.xlane.xlu1 %3985  ;;  %v3980_v1 = vpop.xlane.xlu0 %3979 }
0x2b9a   :  { %v4013_v50 = vrot.slane %v3980_v1, %v7929_v16  ;;  %v4022_v3 = vrot.slane %v3986_v43, %v8962_v46 }
0x2b9d   :  { %v3983_v61 = vpop.xlane.xlu0 %3982  ;;  %v3992_v6 = vpop.xlane.xlu1 %3991 }
0x2b9e   :  { %v4017_v14 = vrot.slane %v3983_v61, %v7925_v9  ;;  %v4032_v22 = vrot.slane %v3992_v6, %v7929_v16  ;;  %v6789_v6 = vld [vmem:[%s8794_s6] ss:$0 sm:$0xff] }
0x2ba0   :  { %v4018_v45 = vsel %vm1367_vm4, %v4017_v14, %v4013_v50 }
0x2ba1   :  { %v3995_v26 = vpop.xlane.xlu0 %3994  ;;  %v3989_v20 = vpop.xlane.xlu1 %3988  ;;  %v4023_v11 = vsel %vm1374_vm5, %v4022_v3, %v4018_v45 }
0x2ba2   :  { %v4036_v34 = vrot.slane %v3995_v26, %v7925_v9  ;;  %v4027_v37 = vrot.slane %v3989_v20, %v7935_v54 }
0x2ba4   :  { %v4037_v56 = vsel %vm1367_vm4, %v4036_v34, %v4032_v22  ;;  %v4028_v19 = vsel %vm1381_vm6, %v4027_v37, %v4023_v11  ;;  %v6790_v11 = vld [vmem:[%s8797_s9] ss:$0 sm:$0xff] }
0x2ba5   :  { %v3998_v25 = vpop.xlane.xlu0 %3997 }
0x2ba6   :  { %v4041_v13 = vrot.slane %v3998_v25, %v8962_v46 }
0x2ba8   :  { %v4042_v27 = vsel %vm1374_vm5, %v4041_v13, %v4037_v56 }
0x2ba9   :  { %v4001_v55 = vpop.xlane.xlu0 %4000 }
0x2baa   :  { %v4046_v17 = vrot.slane %v4001_v55, %v7935_v54 }
0x2bac   :  { %v4047_v10 = vsel %vm1381_vm6, %v4046_v17, %v4042_v27 }
0x2bad   :  { %v4048_v39 = vsel %vm1242_vm2, %v4047_v10, %v4028_v19 }
0x2bae   :  { %5870 = vmatmul.mubr.msk.f32.vlgmr.msra.gmra.mrb[40].mxu1 %vm174_vm0, %v4048_v39 }
0x2baf   :  { %6370 = vmatpush3.bf16.msra.mxu1 %v7379_v42  ;;  %5891 = vmatprep.mubr.msk.f32.mxu1 %vm6810_vm1, %v8937_v40 }
0x2bb0   :  { %6371 = vmatprep.subr.bf16.mxu1 %v8933_v48 }
0x2bb3   :  { %6373 = vmatpush3.bf16.msra.mxu1 %v7405_v49 }
0x2bb4   :  { %6398 = vmatprep.subr.bf16.mxu1 %v8933_v48 }
0x2bb6   :  { %5892 = vmatmul.mubr.msk.f32.vlgmr.msra.gmra.mrb[42].mxu1 %vm174_vm0, %v8467_v59 }
0x2bb7   :  { %6400 = vmatpush3.bf16.msra.mxu1 %v7544_v44  ;;  %5937 = vmatprep.mubr.msk.f32.mxu1 %vm6810_vm1, %v8937_v40 }
0x2bb8   :  { %6401 = vmatprep.subr.bf16.mxu1 %v8933_v48 }
0x2bbb   :  { %6403 = vmatpush3.bf16.msra.mxu1 %v7550_v47 }
0x2bbc   :  { %6404 = vmatprep.subr.bf16.mxu1 %v8933_v48 }
0x2bbe   :  { %5938 = vmatmul.mubr.msk.f32.vlgmr.msra.gmra.mrb[44].mxu1 %vm174_vm0, %v8486_v31 }
0x2bbf   :  { %6406 = vmatpush3.bf16.msra.mxu1 %v7560_v52  ;;  %5948 = vmatprep.mubr.msk.f32.mxu1 %vm6810_vm1, %v8937_v40 }
0x2bc0   :  { %6407 = vmatprep.subr.bf16.mxu1 %v8933_v48 }
0x2bc3   :  { %6409 = vmatpush3.bf16.msra.mxu1 %v7572_v57 }
0x2bc4   :  { %6410 = vmatprep.subr.bf16.mxu1 %v8933_v48 }
0x2c81   :  { %v4117_v42 = vpop.f32.mrb[40].mxu1 }
0x2c82   :  { %v4188_v49 = vadd.f32 %v8516_v7, %v4117_v42  ;;  %v5871_v44 = vpop.f32.mrb[41].mxu1 }
0x2c84   :  { %v4191_v47 = vadd.f32 %v8437_v35, %v4188_v49 }
0x2c86   :  { %v4199_v59 = vrot.slane %v4191_v47, %v7982_v60  ;;  %v4219_v31 = vsel %vm1247_vm3, %v4191_v47, -inf }
0x2c87   :  { %4220 = vmax.xlane.f32.xlu1 %v4219_v31 }
0x2c88   :  { %v4200_v52 = vcombine.high %v4199_v59, %v4199_v59  ;;  %5230 = vst.sshfl [vmem:[%s8805_s15 + $0x3] sm:$0x1 pattern:$0x73625140] %v4199_v59 }
0x2c89   :  { %v4308_v62 = vpop.f32.mrb[42].mxu1 }
0x2c8a   :  { %5231 = vst.sshfl [vmem:[%s8805_s15 + $0xb] sm:$0x1 pattern:$0x73625140] %v4200_v52  ;;  %v5893_v57 = vpop.f32.mrb[43].mxu1 }
0x2c91   :  { %v4473_v7 = vpop.f32.mrb[44].mxu1 }
0x2c92   :  { %v5939_v12 = vpop.f32.mrb[45].mxu1 }
0x2d14   :  { %v4221_v51 = vpop.xlane.xlu1 %4220 }
0x2d15   :  { %vm4222_vm7 = vcmp.ge.f32.partialorder %v4191_v47, %v4221_v51  ;;  %v9028_v47 = vld [vmem:[#allocation36_spill] sm:$0xff]  ;;  %v9029_v51 = vld [vmem:[#allocation38_spill] sm:$0xff] }
0x2d16   :  { %v4223_v35 = vsel %vm4222_vm7, %v7919_v15, 128 }
0x2d17   :  { %v4224_v21 = vsel %vm1247_vm3, %v4223_v35, 2147483647  ;;  %v9030_v35 = vld [vmem:[#allocation39_spill] sm:$0xff] }
0x2d18   :  { %v4226_v38 = vshra.s32 %v4224_v21, 16  ;;  %v4225_v5 = vand.u32 65535, %v4224_v21 }
0x2d1a   :  { %v4228_v4 = vcvt.s32.f32 %v4226_v38  ;;  %v4227_v58 = vcvt.s32.f32 %v4225_v5 }
0x2d1c   :  { %4229 = vmin.xlane.f32.xlu0 %v4228_v4 }
0x2da9   :  { %v4230_v63 = vpop.xlane.xlu0 %4229 }
0x2daa   :  { %vm4231_vm8 = vcmp.eq.f32.partialorder %v4228_v4, %v4230_v63  ;;  %v4236_v30 = vcvt.f32.s32 %v4230_v63 }
0x2dab   :  { %v4232_v23 = vsel %vm4231_vm8, %v4227_v58, inf  ;;  %v9031_v58 = vld [vmem:[#allocation10_spill] sm:$0xff] }
0x2dac   :  { %4233 = vmin.xlane.f32.xlu1 %v4232_v23  ;;  %v4237_v18 = vshll.u32 %v4236_v30, 16  ;;  %v9032_v30 = vld [vmem:[#allocation12_spill] sm:$0xff] }
0x2e39   :  { %v4234_v41 = vpop.xlane.xlu1 %4233 }
0x2e3a   :  { %v4235_v36 = vcvt.f32.s32 %v4234_v41 }
0x2e3c   :  { %v4238_v29 = vadd.s32 %v4237_v18, %v4235_v36  ;;  %v9033_v18 = vld [vmem:[#allocation13_spill] sm:$0xff] }
0x2e3e   :  { %vm4239_vm9 = vcmp.eq.s32.totalorder %v7919_v15, %v4238_v29  ;;  %v9034_v29 = vld [vmem:[#allocation14_spill] sm:$0xff] }
0x2e3f   :  { %5927 = vmatmul.mubr.msk.f32.vlgmr.msra.gmra.mrb[30].mxu0 %vm4239_vm9, %v8963_v33 }
0x2e40   :  { %6424 = vmatpush3.bf16.msra.mxu0 %v7640_v24  ;;  %5981 = vmatprep.mubr.msk.f32.mxu0 %vm6810_vm1, %v8937_v40 }
0x2e41   :  { %6425 = vmatprep.subr.bf16.mxu0 %v8933_v48 }
0x2e44   :  { %6427 = vmatpush3.bf16.msra.mxu0 %v7653_v28 }
0x2f12   :  { %v4378_v43 = vpop.f32.mrb[30].mxu0 }
0x2f13   :  { %v4379_v1 = vadd.f32 %v4378_v43, %v4308_v62  ;;  %v5928_v61 = vpop.f32.mrb[31].mxu0 }
0x2f15   :  { %v4382_v26 = vadd.f32 %v6789_v6, %v4379_v1  ;;  %v9035_v1 = vld [vmem:[#allocation15_spill] sm:$0xff] }
0x2f17   :  { %6710 = vtanh.f32 %v4382_v26  ;;  %v5235_v24 = vmul.f32 -1.442695, %v4382_v26 }
0x2f19   :  { %6712 = vpow2.f32 %v5235_v24 }
0x2f21   :  { %v6711_v15 = vpop.eup %6710 }
0x2f22   :  { %4392 = vrot.lane.b32.xlu0 %v6711_v15, %s6811_s19  ;;  %v9036_v15 = vld [vmem:[#allocation16_spill] sm:$0xff] }
0x2f23   :  { %v6713_v33 = vpop.eup %6712 }
0x2f24   :  { %v4386_v14 = vadd.f32 1.0, %v6713_v33  ;;  %v9037_v33 = vld [vmem:[#allocation17_spill] sm:$0xff] }
0x2f26   :  { %6714 = vrcp.f32 %v4386_v14 }
0x2f30   :  { %v6715_v20 = vpop.eup %6714 }
0x2f31   :  { %v4390_v50 = vmul.f32 %v6715_v20, %v8462_v2  ;;  %v9027_v2 = vld [vmem:[#allocation9_spill] sm:$0xff] }
0x2f94   :  { %v4393_v25 = vpop.permute.xlu0 %4392 }
0x2f95   :  { %v4395_v28 = vmul.f32 %v6715_v20, %v4393_v25 }
0x2f97   :  { %4397 = vrot.lane.b32.xlu1 %v4395_v28, %s6812_s20  ;;  %v9039_v28 = vld [vmem:[#allocation19_spill] sm:$0xff] }
0x3009   :  { %v4398_v34 = vpop.permute.xlu1 %4397 }
0x300a   :  { %v4400_v13 = vadd.f32 %v4398_v34, %v4390_v50 }
0x300c   :  { %6716 = vtanh.f32 %v4400_v13 }
0x3016   :  { %v6717_v45 = vpop.eup %6716 }
0x3017   :  { %4403 = vrot.lane.b32.xlu1 %v6717_v45, %s6811_s19  ;;  %v9040_v45 = vld [vmem:[#allocation20_spill] sm:$0xff] }
0x3089   :  { %v4404_v22 = vpop.permute.xlu1 %4403 }
0x308a   :  { %v4406_v37 = vmul.f32 %v6715_v20, %v4404_v22  ;;  %v9038_v20 = vld [vmem:[#allocation18_spill] sm:$0xff] }
0x308c   :  { %4478 = vrot.lane.b32.xlu0 %v4406_v37, %s6812_s20  ;;  %v9041_v37 = vld [vmem:[#allocation21_spill] sm:$0xff] }
0x30fe   :  { %v4479_v3 = vpop.permute.xlu0 %4478 }
0x30ff   :  { %5949 = vmatmul.mubr.msk.f32.vlgmr.msra.gmra.mrb[46].mxu1 %vm174_vm0, %v4479_v3 }
0x3100   :  { %6412 = vmatpush3.bf16.msra.mxu1 %v7613_v53  ;;  %5959 = vmatprep.mubr.msk.f32.mxu1 %vm6810_vm1, %v8937_v40 }
0x3101   :  { %6413 = vmatprep.subr.bf16.mxu1 %v8933_v48 }
0x3104   :  { %6415 = vmatpush3.bf16.msra.mxu1 %v9027_v2  ;;  %v9042_v2 = vld [vmem:[#allocation22_spill] sm:$0xff] }
0x3105   :  { %6416 = vmatprep.subr.bf16.mxu1 %v8933_v48 }
0x31d2   :  { %v4548_v55 = vpop.f32.mrb[46].mxu1 }
0x31d3   :  { %v4549_v56 = vadd.f32 %v4548_v55, %v4473_v7  ;;  %v5950_v17 = vpop.f32.mrb[47].mxu1 }
0x31d5   :  { %v4552_v27 = vadd.f32 %v6790_v11, %v4549_v56  ;;  %v9043_v56 = vld [vmem:[#allocation23_spill] sm:$0xff] }
0x31d7   :  { %6718 = vtanh.f32 %v4552_v27  ;;  %v5238_v53 = vmul.f32 -1.442695, %v4552_v27 }
0x31d9   :  { %6720 = vpow2.f32 %v5238_v53  ;;  %v9044_v53 = vld [vmem:[#allocation24_spill] sm:$0xff] }
0x31e1   :  { %v6719_v19 = vpop.eup %6718 }
0x31e2   :  { %4562 = vrot.lane.b32.xlu1 %v6719_v19, %s6811_s19 }
0x31e3   :  { %v6721_v10 = vpop.eup %6720 }
0x31e4   :  { %v4556_v39 = vadd.f32 1.0, %v6721_v10 }
0x31e6   :  { %6722 = vrcp.f32 %v4556_v39  ;;  %v9045_v39 = vld [vmem:[#allocation25_spill] sm:$0xff] }
0x31f0   :  { %v6723_v42 = vpop.eup %6722 }
0x31f1   :  { %v4560_v59 = vmul.f32 %v6723_v42, %v9028_v47 }
0x3254   :  { %v4563_v49 = vpop.permute.xlu1 %4562 }
0x3255   :  { %v4565_v44 = vmul.f32 %v6723_v42, %v4563_v49  ;;  %v9046_v49 = vld [vmem:[#allocation26_spill] sm:$0xff] }
0x3257   :  { %4567 = vrot.lane.b32.xlu0 %v4565_v44, %s6812_s20 }
0x32c9   :  { %v4568_v31 = vpop.permute.xlu0 %4567 }
0x32ca   :  { %v4570_v52 = vadd.f32 %v4568_v31, %v4560_v59  ;;  %v9047_v59 = vld [vmem:[#allocation27_spill] sm:$0xff] }
0x32cc   :  { %6724 = vtanh.f32 %v4570_v52 }
0x32d6   :  { %v6725_v62 = vpop.eup %6724 }
0x32d7   :  { %4573 = vrot.lane.b32.xlu1 %v6725_v62, %s6811_s19 }
0x3349   :  { %v4574_v57 = vpop.permute.xlu1 %4573 }
0x334a   :  { %v4576_v7 = vmul.f32 %v6723_v42, %v4574_v57 }
0x334c   :  { %4578 = vrot.lane.b32.xlu0 %v4576_v7, %s6812_s20 }
0x33be   :  { %v4579_v12 = vpop.permute.xlu0 %4578 }
0x33bf   :  { %5960 = vmatmul.mubr.msk.f32.vlgmr.msra.gmra.mrb[48].mxu1 %vm174_vm0, %v4579_v12  ;;  %5982 = vmatmul.mubr.msk.f32.vlgmr.msra.gmra.mrb[32].mxu0 %vm174_vm0, %v4579_v12 }
0x33c0   :  { %6418 = vmatpush3.bf16.msra.mxu1 %v9029_v51  ;;  %5970 = vmatprep.mubr.msk.f32.mxu1 %vm6810_vm1, %v8937_v40 }
0x33c1   :  { %6419 = vmatprep.subr.bf16.mxu1 %v8933_v48 }
0x33c4   :  { %6421 = vmatpush3.bf16.msra.mxu1 %v9030_v35  ;;  %v9048_v35 = vld [vmem:[#allocation28_spill] sm:$0xff] }
0x3492   :  { %v4648_v21 = vpop.f32.mrb[48].mxu1  ;;  %v8667_v38 = vpop.f32.mrb[32].mxu0 }
0x3493   :  { %v4655_v4 = vrot.slane %v4648_v21, %v7684_v32  ;;  %v5961_v5 = vpop.f32.mrb[49].mxu1  ;;  %v5983_v63 = vpop.f32.mrb[33].mxu0  ;;  %v4674_v23 = vrot.slane %v4648_v21, %v9031_v58 }
0x3495   :  { %4661 = vbcast.lane.b32.xlu0 %v4655_v4, 264  ;;  %4657 = vbcast.lane.b32.xlu1 %v4655_v4, 256 }
0x3499   :  { %4680 = vbcast.lane.b32.xlu0 %v4674_v23, 264  ;;  %4676 = vbcast.lane.b32.xlu1 %v4674_v23, 256 }
0x349d   :  { %4684 = vbcast.lane.b32.xlu0 %v4674_v23, 272  ;;  %4665 = vbcast.lane.b32.xlu1 %v4655_v4, 272 }
0x34a1   :  { %4688 = vbcast.lane.b32.xlu0 %v4674_v23, 280  ;;  %4669 = vbcast.lane.b32.xlu1 %v4655_v4, 280  ;;  %v9049_v4 = vld [vmem:[#allocation11_spill] sm:$0xff] }
0x3507   :  { %v4662_v48 = vpop.permute.xlu0 %4661  ;;  %v4658_v40 = vpop.permute.xlu1 %4657 }
0x3508   :  { %v4692_v41 = vadd.f32 %v9032_v30, %v4662_v48  ;;  %v4693_v36 = vadd.f32 %v9033_v18, %v4662_v48  ;;  %v4690_v43 = vadd.f32 %v9034_v29, %v4658_v40  ;;  %v4691_v61 = vadd.f32 %v9035_v1, %v4658_v40 }
0x350a   :  { %6726 = vtanh.f32 %v4692_v41 }
0x350b   :  { %6728 = vtanh.f32 %v4693_v36  ;;  %v4681_v6 = vpop.permute.xlu0 %4680  ;;  %v4677_v26 = vpop.permute.xlu1 %4676 }
0x350c   :  { %6730 = vtanh.f32 %v4690_v43  ;;  %v4700_v24 = vadd.f32 %v9036_v15, %v4681_v6  ;;  %v4701_v14 = vadd.f32 %v9037_v33, %v4681_v6  ;;  %v4698_v25 = vadd.f32 %v9038_v20, %v4677_v26 }
0x350d   :  { %6732 = vtanh.f32 %v4691_v61  ;;  %v4699_v50 = vadd.f32 %v9039_v28, %v4677_v26 }
0x350e   :  { %6734 = vtanh.f32 %v4700_v24 }
0x350f   :  { %6736 = vtanh.f32 %v4701_v14  ;;  %v4685_v34 = vpop.permute.xlu0 %4684  ;;  %v4666_v13 = vpop.permute.xlu1 %4665 }
0x3510   :  { %6738 = vtanh.f32 %v4698_v25  ;;  %v4702_v22 = vadd.f32 %v9040_v45, %v4685_v34  ;;  %v4703_v3 = vadd.f32 %v9041_v37, %v4685_v34  ;;  %v4694_v55 = vadd.f32 %v9042_v2, %v4666_v13 }
0x3511   :  { %6740 = vtanh.f32 %v4699_v50  ;;  %v4695_v17 = vadd.f32 %v9043_v56, %v4666_v13 }
0x3512   :  { %6742 = vtanh.f32 %v4702_v22 }
0x3513   :  { %6744 = vtanh.f32 %v4703_v3  ;;  %v4689_v11 = vpop.permute.xlu0 %4688  ;;  %v4670_v27 = vpop.permute.xlu1 %4669 }
0x3514   :  { %v6727_v19 = vpop.eup %6726  ;;  %6746 = vtanh.f32 %v4694_v55  ;;  %v4704_v10 = vadd.f32 %v9044_v53, %v4689_v11  ;;  %v4705_v42 = vadd.f32 %v9045_v39, %v4689_v11  ;;  %v4696_v44 = vadd.f32 %v9046_v49, %v4670_v27 }
0x3515   :  { %v6729_v47 = vpop.eup %6728  ;;  %6748 = vtanh.f32 %v4695_v17  ;;  %v4697_v31 = vadd.f32 %v9047_v59, %v4670_v27  ;;  %v4724_v40 = vmul.f32 %v6727_v19, %v9048_v35 }
0x3516   :  { %v6731_v52 = vpop.eup %6730  ;;  %6750 = vtanh.f32 %v4704_v10  ;;  %v4725_v36 = vmul.f32 %v6729_v47, %v9048_v35 }
0x3517   :  { %v6733_v62 = vpop.eup %6732  ;;  %6752 = vtanh.f32 %v4705_v42  ;;  %v4722_v30 = vmul.f32 %v6731_v52, %v9049_v4 }
0x3518   :  { %v6735_v57 = vpop.eup %6734  ;;  %6754 = vtanh.f32 %v4696_v44  ;;  %v4723_v29 = vmul.f32 %v6733_v62, %v9049_v4 }
0x3519   :  { %v6737_v7 = vpop.eup %6736  ;;  %6756 = vtanh.f32 %v4697_v31  ;;  %v4732_v21 = vmul.f32 %v6735_v57, %v9048_v35  ;;  %v4738_v14 = vadd.f32 %v4724_v40, %v4722_v30 }
0x351a   :  { %v6739_v12 = vpop.eup %6738  ;;  %v4733_v58 = vmul.f32 %v6737_v7, %v9048_v35  ;;  %v4747_v50 = vadd.f32 %v4725_v36, %v4723_v29 }
0x351b   :  { %v6741_v51 = vpop.eup %6740  ;;  %v4730_v5 = vmul.f32 %v6739_v12, %v9049_v4 }
0x351c   :  { %v6743_v63 = vpop.eup %6742  ;;  %v4731_v23 = vmul.f32 %v6741_v51, %v9049_v4 }
0x351d   :  { %v6745_v48 = vpop.eup %6744  ;;  %v4734_v41 = vmul.f32 %v6743_v63, %v9020_v0  ;;  %v4756_v61 = vadd.f32 %v4732_v21, %v4730_v5 }
0x351e   :  { %v6747_v18 = vpop.eup %6746  ;;  %v4735_v43 = vmul.f32 %v6745_v48, %v9020_v0  ;;  %v4765_v15 = vadd.f32 %v4733_v58, %v4731_v23 }
0x351f   :  { %v6749_v1 = vpop.eup %6748  ;;  %v4726_v6 = vmul.f32 %v6747_v18, %v9020_v0  ;;  %v4757_v20 = vadd.f32 %v4756_v61, %v4734_v41 }
0x3520   :  { %v6751_v26 = vpop.eup %6750  ;;  %v4727_v24 = vmul.f32 %v6749_v1, %v9020_v0  ;;  %v4766_v34 = vadd.f32 %v4765_v15, %v4735_v43 }
0x3521   :  { %v6753_v33 = vpop.eup %6752  ;;  %v4736_v25 = vmul.f32 %v6751_v26, %v7782_v8  ;;  %v4739_v22 = vadd.f32 %v4738_v14, %v4726_v6 }
0x3522   :  { %v6755_v28 = vpop.eup %6754  ;;  %v4737_v13 = vmul.f32 %v6753_v33, %v7782_v8  ;;  %v4748_v2 = vadd.f32 %v4747_v50, %v4727_v24 }
0x3523   :  { %v6757_v45 = vpop.eup %6756  ;;  %v4758_v37 = vadd.f32 %v4757_v20, %v4736_v25  ;;  %v4728_v3 = vmul.f32 %v6755_v28, %v7782_v8 }
0x3524   :  { %v4767_v55 = vadd.f32 %v4766_v34, %v4737_v13  ;;  %v4729_v56 = vmul.f32 %v6757_v45, %v7782_v8 }
0x3525   :  { %v4740_v0 = vadd.f32 %v4739_v22, %v4728_v3  ;;  %v4759_v17 = vrot.slane %v4758_v37, 4 }
0x3526   :  { %v4749_v11 = vadd.f32 %v4748_v2, %v4729_v56  ;;  %v4768_v27 = vrot.slane %v4767_v55, 4 }
0x3527   :  { %v4741_v19 = vrot.slane %v4740_v0, 4  ;;  %v4760_v53 = vadd.f32 %v4759_v17, %v4758_v37 }
0x3528   :  { %v4750_v10 = vrot.slane %v4749_v11, 4  ;;  %v4769_v39 = vadd.f32 %v4768_v27, %v4767_v55 }
0x3529   :  { %v4742_v42 = vadd.f32 %v4741_v19, %v4740_v0  ;;  %v4761_v49 = vrot.slane %v4760_v53, 2 }
0x352a   :  { %v4751_v44 = vadd.f32 %v4750_v10, %v4749_v11  ;;  %v4770_v47 = vrot.slane %v4769_v39, 2 }
0x352b   :  { %v4743_v59 = vrot.slane %v4742_v42, 2  ;;  %v4762_v31 = vadd.f32 %v4761_v49, %v4760_v53  ;;  %v6791_v53 = vld [vmem:[%s8802_s0 + $0x10] sm:$0xff]  ;;  %v6793_v49 = vld [vmem:[%s8802_s0] sm:$0xff] }
0x352c   :  { %v4752_v52 = vrot.slane %v4751_v44, 2  ;;  %v4771_v62 = vadd.f32 %v4770_v47, %v4769_v39  ;;  %v6792_v39 = vld [vmem:[%s8802_s0 + $0x18] sm:$0xff]  ;;  %v6794_v47 = vld [vmem:[%s8802_s0 + $0x8] sm:$0xff] }
0x352d   :  { %v4744_v57 = vadd.f32 %v4743_v59, %v4742_v42  ;;  %v4763_v7 = vrot.slane %v4762_v31, 1 }
0x352e   :  { %v4753_v12 = vadd.f32 %v4752_v52, %v4751_v44  ;;  %v4772_v8 = vrot.slane %v4771_v62, 1 }
0x352f   :  { %v4745_v51 = vrot.slane %v4744_v57, 1  ;;  %v4764_v35 = vadd.f32 %v4763_v7, %v4762_v31  ;;  %v6795_v31 = vld [vmem:[%s8802_s0 + $0x20] sm:$0xff] }
0x3530   :  { %v4754_v21 = vrot.slane %v4753_v12, 1  ;;  %v4773_v4 = vadd.f32 %v4772_v8, %v4771_v62  ;;  %v6796_v62 = vld [vmem:[%s8802_s0 + $0x28] sm:$0xff] }
0x3531   :  { %v4746_v5 = vadd.f32 %v4745_v51, %v4744_v57 }
0x3532   :  { %v4755_v63 = vadd.f32 %v4754_v21, %v4753_v12 }
0x3533   :  { %v4778_v58 = vsel %vm1242_vm2, %v4764_v35, %v4746_v5 }
0x3534   :  { %v4779_v23 = vsel %vm1242_vm2, %v4773_v4, %v4755_v63  ;;  %v4782_v48 = vsel %vm1247_vm3, %v4778_v58, -inf  ;;  %v6799_v58 = vld [vmem:[%s8802_s0 + $0x60] sm:$0xff] }
0x3535   :  { %v4783_v40 = vsel %vm1247_vm3, %v4779_v23, -inf }
0x3536   :  { %v4784_v30 = vmax.f32 %v4782_v48, %v4783_v40  ;;  %v6800_v48 = vld [vmem:[%s8802_s0 + $0x68] sm:$0xff] }
0x3538   :  { %4785 = vmax.xlane.f32.xlu1 %v4784_v30  ;;  %v6801_v30 = vld [vmem:[%s8802_s0 + $0x40] sm:$0xff] }
0x35c5   :  { %v4786_v41 = vpop.xlane.xlu1 %4785 }
0x35c6   :  { %v4788_v18 = vrot.slane %v4786_v41, 1  ;;  %v4791_v36 = vsub.f32 %v4746_v5, %v4786_v41  ;;  %v4792_v29 = vsub.f32 %v4755_v63, %v4786_v41 }
0x35c8   :  { %v4793_v43 = vsub.f32 %v4764_v35, %v4788_v18  ;;  %v4794_v1 = vsub.f32 %v4773_v4, %v4788_v18  ;;  %v4795_v61 = vmul.f32 1.442695, %v4791_v36  ;;  %v4797_v15 = vmul.f32 1.442695, %v4792_v29  ;;  %v6797_v35 = vld [vmem:[%s8802_s0 + $0x50] sm:$0xff]  ;;  %v6798_v4 = vld [vmem:[%s8802_s0 + $0x58] sm:$0xff] }
0x35c9   :  { %v6802_v18 = vld [vmem:[%s8802_s0 + $0x48] sm:$0xff]  ;;  %v6803_v29 = vld [vmem:[%s8802_s0 + $0x30] sm:$0xff] }
0x35ca   :  { %v4799_v6 = vmul.f32 1.442695, %v4793_v43  ;;  %v4801_v26 = vmul.f32 1.442695, %v4794_v1  ;;  %v6804_v1 = vld [vmem:[%s8802_s0 + $0x38] sm:$0xff] }
0x35cc   :  { %6758 = vpow2.f32 %v4799_v6 }
0x35cd   :  { %6760 = vpow2.f32 %v4801_v26 }
0x35ce   :  { %6762 = vpow2.f32 %v4795_v61 }
0x35cf   :  { %6764 = vpow2.f32 %v4797_v15  ;;  %v6805_v15 = vld [vmem:[%s8802_s0 + $0x70] sm:$0xff] }
0x35d6   :  { %v6759_v24 = vpop.eup %6758 }
0x35d7   :  { %v6761_v33 = vpop.eup %6760  ;;  %v4807_v14 = vrot.slane %v6759_v24, 7 }
0x35d8   :  { %v6763_v20 = vpop.eup %6762  ;;  %v4809_v25 = vrot.slane %v6761_v33, 7 }
0x35d9   :  { %v6765_v28 = vpop.eup %6764  ;;  %v4808_v50 = vsel %vm1242_vm2, %v4807_v14, %v6763_v20 }
0x35da   :  { %v4810_v34 = vsel %vm1242_vm2, %v4809_v25, %v6765_v28  ;;  %v4813_v13 = vsel %vm1247_vm3, %v4808_v50, 0.0 }
0x35db   :  { %v4814_v45 = vsel %vm1247_vm3, %v4810_v34, 0.0 }
0x35dc   :  { %v4815_v22 = vadd.f32 %v4814_v45, %v4813_v13 }
0x35de   :  { %4816 = vadd.xlane.f32.xlu0 %v4815_v22 }
0x366b   :  { %v4817_v37 = vpop.xlane.xlu0 %4816 }
0x366c   :  { %v4819_v3 = vrot.slane %v4817_v37, 1  ;;  %6766 = vrcp.f32 %v4817_v37 }
0x366e   :  { %6768 = vrcp.f32 %v4819_v3 }
0x3676   :  { %v6767_v2 = vpop.eup %6766 }
0x3677   :  { %v4823_v55 = vmul.f32 %v6767_v2, %v6763_v20  ;;  %v4824_v56 = vmul.f32 %v6767_v2, %v6765_v28 }
0x3678   :  { %v6769_v0 = vpop.eup %6768 }
0x3679   :  { %v4826_v17 = vmul.f32 %v6769_v0, %v6759_v24  ;;  %v4827_v11 = vmul.f32 %v6769_v0, %v6761_v33  ;;  %v4831_v27 = vrot.slane %v4823_v55, %v7684_v32  ;;  %v4835_v19 = vrot.slane %v4824_v56, %v7684_v32  ;;  %v6806_v33 = vld [vmem:[%s8802_s0 + $0x78] sm:$0xff] }
0x367b   :  { %v4846_v10 = vmul.f32 %v6791_v53, %v4831_v27  ;;  %v4847_v42 = vmul.f32 %v6792_v39, %v4835_v19  ;;  %v4844_v44 = vmul.f32 %v6793_v49, %v4831_v27  ;;  %v4845_v59 = vmul.f32 %v6794_v47, %v4835_v19 }
0x367c   :  { %v4848_v52 = vmul.f32 %v6795_v31, %v4831_v27  ;;  %v4849_v57 = vmul.f32 %v6796_v62, %v4835_v19  ;;  %v4839_v7 = vrot.slane %v4826_v17, %v7684_v32  ;;  %v4843_v12 = vrot.slane %v4827_v11, %v7684_v32 }
0x367d   :  { %v4863_v8 = vadd.f32 %v4847_v42, %v4846_v10  ;;  %v4860_v51 = vadd.f32 %v4845_v59, %v4844_v44  ;;  %v4850_v43 = vmul.f32 %v6803_v29, %v4831_v27  ;;  %v4851_v61 = vmul.f32 %v6804_v1, %v4835_v19 }
0x367e   :  { %v4854_v21 = vmul.f32 %v6797_v35, %v4839_v7  ;;  %v4855_v5 = vmul.f32 %v6798_v4, %v4843_v12  ;;  %v4866_v63 = vadd.f32 %v4849_v57, %v4848_v52  ;;  %v4856_v32 = vmul.f32 %v6799_v58, %v4839_v7 }
0x367f   :  { %4864 = vadd.xlane.f32.xlu1 %v4863_v8  ;;  %4861 = vadd.xlane.f32.xlu0 %v4860_v51  ;;  %v4857_v40 = vmul.f32 %v6800_v48, %v4843_v12  ;;  %v4852_v41 = vmul.f32 %v6801_v30, %v4839_v7  ;;  %v4853_v36 = vmul.f32 %v6802_v18, %v4843_v12 }
0x3680   :  { %v4875_v23 = vadd.f32 %v4855_v5, %v4854_v21  ;;  %v4858_v24 = vmul.f32 %v6805_v15, %v4839_v7  ;;  %v4859_v14 = vmul.f32 %v6806_v33, %v4843_v12  ;;  %v4869_v25 = vadd.f32 %v4851_v61, %v4850_v43 }
0x3681   :  { %v4878_v6 = vadd.f32 %v4857_v40, %v4856_v32  ;;  %v4872_v26 = vadd.f32 %v4853_v36, %v4852_v41 }
0x3682   :  { %v4881_v20 = vadd.f32 %v4859_v14, %v4858_v24 }
0x3683   :  { %4867 = vadd.xlane.f32.xlu0 %v4866_v63  ;;  %4876 = vadd.xlane.f32.xlu1 %v4875_v23 }
0x3687   :  { %4879 = vadd.xlane.f32.xlu1 %v4878_v6  ;;  %4873 = vadd.xlane.f32.xlu0 %v4872_v26 }
0x368b   :  { %4882 = vadd.xlane.f32.xlu1 %v4881_v20  ;;  %4870 = vadd.xlane.f32.xlu0 %v4869_v25 }
0x370c   :  { %v4865_v28 = vpop.xlane.xlu1 %4864  ;;  %v4862_v50 = vpop.xlane.xlu0 %4861 }
0x370d   :  { %v4899_v37 = vrot.slane %v4865_v28, %v7925_v9  ;;  %v4895_v3 = vrot.slane %v4862_v50, %v7929_v16 }
0x370f   :  { %v4900_v19 = vsel %vm1367_vm4, %v4899_v37, %v4895_v3 }
0x3710   :  { %v4868_v34 = vpop.xlane.xlu0 %4867  ;;  %v4877_v13 = vpop.xlane.xlu1 %4876 }
0x3711   :  { %v4918_v2 = vrot.slane %v4877_v13, %v7925_v9  ;;  %v4904_v56 = vrot.slane %v4868_v34, %v8962_v46 }
0x3713   :  { %v4905_v39 = vsel %vm1374_vm5, %v4904_v56, %v4900_v19 }
0x3714   :  { %v4880_v45 = vpop.xlane.xlu1 %4879  ;;  %v4874_v22 = vpop.xlane.xlu0 %4873 }
0x3715   :  { %v4914_v55 = vrot.slane %v4874_v22, %v7929_v16  ;;  %v4923_v0 = vrot.slane %v4880_v45, %v8962_v46 }
0x3717   :  { %v4919_v17 = vsel %vm1367_vm4, %v4918_v2, %v4914_v55 }
0x3718   :  { %v4883_v11 = vpop.xlane.xlu1 %4882  ;;  %v4871_v27 = vpop.xlane.xlu0 %4870  ;;  %v4924_v9 = vsel %vm1374_vm5, %v4923_v0, %v4919_v17 }
0x3719   :  { %v4928_v53 = vrot.slane %v4883_v11, %v7935_v54  ;;  %v4909_v10 = vrot.slane %v4871_v27, %v7935_v54  ;;  %v6807_v54 = vld [vmem:[%s8804_s14] ss:$0 sm:$0xff] }
0x371b   :  { %v4929_v16 = vsel %vm1381_vm6, %v4928_v53, %v4924_v9  ;;  %v4910_v42 = vsel %vm1381_vm6, %v4909_v10, %v4905_v39 }
0x371c   :  { %v4930_v46 = vsel %vm1242_vm2, %v4929_v16, %v4910_v42 }
0x371d   :  { %5971 = vmatmul.mubr.msk.f32.vlgmr.msra.gmra.mrb[50].mxu1 %vm174_vm0, %v4930_v46 }
0x37f0   :  { %v4999_v49 = vpop.f32.mrb[50].mxu1 }
0x37f1   :  { %v5070_v44 = vadd.f32 %v8667_v38, %v4999_v49  ;;  %v5972_v47 = vpop.f32.mrb[51].mxu1 }
0x37f3   :  { %v5073_v59 = vadd.f32 %v6807_v54, %v5070_v44 }
0x37f5   :  { %v5081_v31 = vrot.slane %v5073_v59, %v7982_v60 }
0x37f7   :  { %v5082_v52 = vcombine.high %v5081_v31, %v5081_v31  ;;  %5242 = vst.sshfl [vmem:[%s8805_s15 + $0x4] sm:$0x1 pattern:$0x73625140] %v5081_v31 }
0x37f9   :  { %5243 = vst.sshfl [vmem:[%s8805_s15 + $0xc] sm:$0x1 pattern:$0x73625140] %v5082_v52 }

</bundles_post_ra>
